<compile_context>
chip_gen: v7x
topology: tpu7x:2x2x1
jax: 0.10.0
libtpu: 0.0.40
codegen_flags: <defaults>
</compile_context>

<pallas_src>
import functools

import jax
import jax.numpy as jnp
from jax import lax
from jax.experimental import pallas as pl
from jax.experimental.pallas import tpu as pltpu


# ----------------------------------------------------------------------------
# Pallas kernel: fused LSTM1 -> (dropout=id) -> LSTM2 -> (dropout=id) -> fc
# ----------------------------------------------------------------------------
def _lstm_kernel(xg1_ref,   # (Tc, BB, 4Hp) f32 : x @ Wih1 + b1 (precomputed)
                 whh1_ref,  # (Hp, 4Hp) bf16
                 wih2_ref,  # (Hp, 4Hp) bf16
                 whh2_ref,  # (Hp, 4Hp) bf16
                 b2_ref,    # (1, 4Hp) f32 : bih2 + bhh2
                 wfc_ref,   # (1, Hp)  f32
                 bfc_ref,   # (1, 1)   f32, SMEM
                 out_ref,   # (BB, 1)  f32
                 h1_ref, c1_ref, h2_ref, c2_ref,   # (BB, Hp) f32 state scratch
                 *, t_valid):
    Tc, BB, G = xg1_ref.shape
    Hp = G // 4
    tci = pl.program_id(1)
    n_tc = pl.num_programs(1)
    mask_tail = (t_valid % Tc) != 0          # static Python bool

    @pl.when(tci == 0)
    def _():
        # PyTorch default zero-initialized (h, c) at the start of each batch
        # block's sequence.
        h1_ref[...] = jnp.zeros_like(h1_ref)
        c1_ref[...] = jnp.zeros_like(c1_ref)
        h2_ref[...] = jnp.zeros_like(h2_ref)
        c2_ref[...] = jnp.zeros_like(c2_ref)

    whh1 = whh1_ref[...]
    wih2 = wih2_ref[...]
    whh2 = whh2_ref[...]
    b2 = jnp.broadcast_to(b2_ref[...], (BB, G))   # hoisted out of the loop
    t_base = tci * Tc

    def gate_update(g, c_prev):
        # PyTorch gate order i | f | g | o ; Hp is a multiple of 128 so these
        # slices are lane-aligned (no per-step XLU shifts).
        i_g = jax.nn.sigmoid(g[:, 0 * Hp:1 * Hp])
        f_g = jax.nn.sigmoid(g[:, 1 * Hp:2 * Hp])
        g_g = jnp.tanh(g[:, 2 * Hp:3 * Hp])
        o_g = jax.nn.sigmoid(g[:, 3 * Hp:4 * Hp])
        c_new = f_g * c_prev + i_g * g_g
        h_new = o_g * jnp.tanh(c_new)
        return h_new, c_new

    def step(t, carry):
        h1, c1, h2, c2 = carry
        # Layer-2 recurrent matmul depends only on h2_{t-1}: issue it first so
        # the MXU work overlaps layer-1's gate math.
        g2_rec = jnp.dot(h2.astype(jnp.bfloat16), whh2,
                         preferred_element_type=jnp.float32)
        # Layer 1: input projection precomputed -> only the recurrent matmul
        # remains on the serial critical path.
        g1 = xg1_ref[t] + jnp.dot(h1.astype(jnp.bfloat16), whh1,
                                  preferred_element_type=jnp.float32)
        h1n, c1n = gate_update(g1, c1)
        # dropout1: identity (eval mode)
        g2 = (g2_rec
              + jnp.dot(h1n.astype(jnp.bfloat16), wih2,
                        preferred_element_type=jnp.float32)
              + b2)
        h2n, c2n = gate_update(g2, c2)
        # dropout2: identity (eval mode)
        if mask_tail:
            # Padded time steps in the last chunk must not advance the state.
            valid = (t_base + t) < t_valid
            h1n = jnp.where(valid, h1n, h1)
            c1n = jnp.where(valid, c1n, c1)
            h2n = jnp.where(valid, h2n, h2)
            c2n = jnp.where(valid, c2n, c2)
        return h1n, c1n, h2n, c2n

    carry0 = (h1_ref[...], c1_ref[...], h2_ref[...], c2_ref[...])
    h1, c1, h2, c2 = lax.fori_loop(0, Tc, step, carry0, unroll=min(Tc, 8))
    h1_ref[...], c1_ref[...] = h1, c1
    h2_ref[...], c2_ref[...] = h2, c2

    @pl.when(tci == n_tc - 1)
    def _():
        # fc head on the last hidden state: VPU multiply + lane reduction
        # instead of an N=1 MXU matmul; fc bias scalar read from SMEM.
        out_ref[...] = (jnp.sum(h2 * wfc_ref[...], axis=-1, keepdims=True)
                        + bfc_ref[0, 0])


# ----------------------------------------------------------------------------
# Parameter repacking (PyTorch layout -> kernel layout, gate-wise zero pad)
# ----------------------------------------------------------------------------
def _round_up(n, m):
    return ((n + m - 1) // m) * m


def _pad_gate_weight(w, H, Hp, in_dim, in_pad, dtype):
    """(4H, in_dim) PyTorch layout -> (in_pad, 4*Hp) kernel layout."""
    w4 = w.reshape(4, H, in_dim)
    w4 = jnp.pad(w4, ((0, 0), (0, Hp - H), (0, in_pad - in_dim)))
    return w4.reshape(4 * Hp, in_pad).T.astype(dtype)


def _pad_gate_bias(b, H, Hp):
    b4 = b.reshape(4, H)
    b4 = jnp.pad(b4, ((0, 0), (0, Hp - H)))
    return b4.reshape(1, 4 * Hp).astype(jnp.float32)


# ----------------------------------------------------------------------------
# Wrapper: padding, blocking, pallas_call
# ----------------------------------------------------------------------------
def cost_predictor_lstm(x, params):
    """x: (B, T, D) batch_first (PyTorch convention).  Returns (B, 1)."""
    B, T, D = x.shape
    H = params["whh1"].shape[1]          # PyTorch whh: (4H, H)

    Hp = _round_up(H, 128)               # lane-aligned gate slices
    G = 4 * Hp

    # Batch padding / blocking.  For 16 <= B <= 256 split the batch into two
    # 'parallel' blocks so v7x's two TensorCores both get work; for larger B
    # use 128-row blocks.  Zero-padded batch rows are sliced off at the end.
    if B < 16:
        Bp = _round_up(max(B, 8), 8)
        BB = Bp
    elif B <= 256:
        Bp = _round_up(B, 16)
        BB = Bp // 2
    else:
        Bp = _round_up(B, 128)
        BB = 128

    # Time chunking: xg blocks are (Tc, BB, G); Tc <= 32 keeps the
    # double-buffered block well inside v7x's 64 MiB VMEM for any T.
    Tc = min(T, 32)
    Tp = _round_up(T, Tc)

    # Kernel-friendly layouts.  Gate-wise zero padding keeps padded hidden
    # units exactly zero (sigmoid(0)*tanh(0) paths), so padding does not
    # change the result.  MXU weight operands are bf16; state stays f32.
    whh1 = _pad_gate_weight(params["whh1"], H, Hp, H, Hp, jnp.bfloat16)
    wih2 = _pad_gate_weight(params["wih2"], H, Hp, H, Hp, jnp.bfloat16)
    whh2 = _pad_gate_weight(params["whh2"], H, Hp, H, Hp, jnp.bfloat16)
    b2 = _pad_gate_bias(params["bih2"] + params["bhh2"], H, Hp)
    wfc = jnp.pad(params["wfc"], ((0, 0), (0, Hp - H))).astype(jnp.float32)
    bfc = params["bfc"].reshape(1, 1).astype(jnp.float32)

    # Layer-1 input projection hoisted to XLA (K = D is tiny; an in-kernel MXU
    # GEMM would waste most of the MXU depth).  Streamed in as a pipelined
    # input, which also removes the old in-kernel (T, BB, G) scratch.
    wih1 = _pad_gate_weight(params["wih1"], H, Hp, D, D, jnp.float32)   # (D, G)
    b1 = _pad_gate_bias(params["bih1"] + params["bhh1"], H, Hp)         # (1, G)
    xg1 = jnp.dot(x.astype(jnp.float32).reshape(B * T, D), wih1,
                  precision=lax.Precision.HIGHEST) + b1                 # (B*T, G)
    xg1 = xg1.reshape(B, T, G).transpose(1, 0, 2)                       # (T, B, G)
    xg1 = jnp.pad(xg1, ((0, Tp - T), (0, Bp - B), (0, 0)))              # (Tp, Bp, G)

    grid = (Bp // BB, Tp // Tc)

    # Explicit VMEM budget: double-buffered xg block + resident weights +
    # state scratch + slack (never below the 32 MiB default scoped limit).
    vmem_bytes = (2 * Tc * BB * G * 4                      # xg double buffer
                  + 2 * (3 * Hp * G * 2 + G * 4 + Hp * 4)  # resident weights
                  + 4 * BB * Hp * 4                        # state scratch
                  + 2 * BB * 4                             # output
                  + (4 << 20))                             # slack
    vmem_bytes = min(max(int(vmem_bytes), 32 << 20), 100 << 20)

    kernel = functools.partial(_lstm_kernel, t_valid=T)

    out = pl.pallas_call(
        kernel,
        out_shape=jax.ShapeDtypeStruct((Bp, 1), jnp.float32),
        grid=grid,
        in_specs=[
            pl.BlockSpec((Tc, BB, G), lambda b, t: (t, b, 0)),   # xg1 (pipelined)
            pl.BlockSpec((Hp, G), lambda b, t: (0, 0)),          # whh1 (resident)
            pl.BlockSpec((Hp, G), lambda b, t: (0, 0)),          # wih2 (resident)
            pl.BlockSpec((Hp, G), lambda b, t: (0, 0)),          # whh2 (resident)
            pl.BlockSpec((1, G), lambda b, t: (0, 0)),           # b2   (resident)
            pl.BlockSpec((1, Hp), lambda b, t: (0, 0)),          # wfc  (resident)
            pl.BlockSpec(memory_space=pltpu.MemorySpace.SMEM),   # bfc scalar
        ],
        out_specs=pl.BlockSpec((BB, 1), lambda b, t: (b, 0)),
        scratch_shapes=[pltpu.VMEM((BB, Hp), jnp.float32)] * 4,  # h1 c1 h2 c2
        compiler_params=pltpu.CompilerParams(
            dimension_semantics=("parallel", "arbitrary"),
            vmem_limit_bytes=vmem_bytes),
    )(xg1, whh1, wih2, whh2, b2, wfc, bfc)
    return out[:B]


# ----------------------------------------------------------------------------
# Pure-JAX reference (same math, f32 everywhere) for correctness check
# ----------------------------------------------------------------------------
def reference_forward(x, params):
    H = params["whh1"].shape[1]

    def run_lstm(seq, wih, whh, bih, bhh):
        B = seq.shape[0]

        def step(carry, x_t):
            h, c = carry
            g = x_t @ wih.T + h @ whh.T + bih + bhh
            i_g = jax.nn.sigmoid(g[:, 0 * H:1 * H])
            f_g = jax.nn.sigmoid(g[:, 1 * H:2 * H])
            g_g = jnp.tanh(g[:, 2 * H:3 * H])
            o_g = jax.nn.sigmoid(g[:, 3 * H:4 * H])
            c_new = f_g * c + i_g * g_g
            h_new = o_g * jnp.tanh(c_new)
            return (h_new, c_new), h_new

        h0 = jnp.zeros((B, H), jnp.float32)
        c0 = jnp.zeros((B, H), jnp.float32)
        (_, _), hs = lax.scan(step, (h0, c0), jnp.transpose(seq, (1, 0, 2)))
        return jnp.transpose(hs, (1, 0, 2))  # (B, T, H)

    h1 = run_lstm(x, params["wih1"], params["whh1"],
                  params["bih1"], params["bhh1"])
    h2 = run_lstm(h1, params["wih2"], params["whh2"],
                  params["bih2"], params["bhh2"])
    return h2[:, -1, :] @ params["wfc"].T + params["bfc"]


# ----------------------------------------------------------------------------
if __name__ == "__main__":
    B, T, D, H = 2, 8, 4, 128   # hidden_dim matches the module default (128)

    key = jax.random.PRNGKey(0)
    keys = jax.random.split(key, 11)
    s = 0.1

    # Deterministic synthetic parameters, PyTorch layouts:
    # weight_ih_l0: (4H, D), weight_hh_l0: (4H, H), biases: (4H,)
    params = {
        "wih1": s * jax.random.normal(keys[0], (4 * H, D), jnp.float32),
        "whh1": s * jax.random.normal(keys[1], (4 * H, H), jnp.float32),
        "bih1": s * jax.random.normal(keys[2], (4 * H,), jnp.float32),
        "bhh1": s * jax.random.normal(keys[3], (4 * H,), jnp.float32),
        "wih2": s * jax.random.normal(keys[4], (4 * H, H), jnp.float32),
        "whh2": s * jax.random.normal(keys[5], (4 * H, H), jnp.float32),
        "bih2": s * jax.random.normal(keys[6], (4 * H,), jnp.float32),
        "bhh2": s * jax.random.normal(keys[7], (4 * H,), jnp.float32),
        "wfc": s * jax.random.normal(keys[8], (1, H), jnp.float32),
        "bfc": s * jax.random.normal(keys[9], (1,), jnp.float32),
    }

    x = jax.random.normal(keys[10], (B, T, D), jnp.float32)

    out = jax.block_until_ready(cost_predictor_lstm(x, params))

    with jax.default_matmul_precision("highest"):
        ref = reference_forward(x, params)

    assert out.shape == (B, 1), out.shape
    # Kernel uses bf16 MXU operands (f32 accumulation / state), so allow a
    # bf16-level tolerance vs. the all-f32 reference.
    assert jnp.allclose(out, ref, atol=2e-2, rtol=2e-2), (out, ref)

    print("KERNEL_OK")
</pallas_src>

<mosaic_0001>
module attributes {stable_mosaic.version = 11 : i64} {
  func.func @_lstm_kernel(%arg0: i32, %arg1: i32, %arg2: memref<8x8x512xf32, #tpu.memory_space<vmem>>, %arg3: memref<128x512xbf16, #tpu.memory_space<vmem>>, %arg4: memref<128x512xbf16, #tpu.memory_space<vmem>>, %arg5: memref<128x512xbf16, #tpu.memory_space<vmem>>, %arg6: memref<1x512xf32, #tpu.memory_space<vmem>>, %arg7: memref<1x128xf32, #tpu.memory_space<vmem>>, %arg8: memref<1x1xf32, #tpu.memory_space<smem>>, %arg9: memref<8x1xf32, #tpu.memory_space<vmem>>, %arg10: memref<8x128xf32, #tpu.memory_space<vmem>>, %arg11: memref<8x128xf32, #tpu.memory_space<vmem>>, %arg12: memref<8x128xf32, #tpu.memory_space<vmem>>, %arg13: memref<8x128xf32, #tpu.memory_space<vmem>>) attributes {dimension_semantics = [#tpu.dimension_semantics<parallel>, #tpu.dimension_semantics<arbitrary>], iteration_bounds = array<i64: 1, 1>, scalar_prefetch = 0 : i64, scratch_operands = 4 : i64, tpu.core_type = #tpu.core_type<tc>, window_params = [{transform_indices = @transform_0, window_bounds = array<i64: 8, 8, 512>}, {pipeline_mode = #tpu.pipeline_mode<synchronous>, transform_indices = @transform_1, window_bounds = array<i64: 128, 512>}, {pipeline_mode = #tpu.pipeline_mode<synchronous>, transform_indices = @transform_2, window_bounds = array<i64: 128, 512>}, {pipeline_mode = #tpu.pipeline_mode<synchronous>, transform_indices = @transform_3, window_bounds = array<i64: 128, 512>}, {pipeline_mode = #tpu.pipeline_mode<synchronous>, transform_indices = @transform_4, window_bounds = array<i64: 1, 512>}, {pipeline_mode = #tpu.pipeline_mode<synchronous>, transform_indices = @transform_5, window_bounds = array<i64: 1, 128>}, {transform_indices = @transform_6, window_bounds = array<i64: 1, 1>}, {transform_indices = @transform_7, window_bounds = array<i64: 8, 1>}]} {
    %c0_i32 = arith.constant 0 : i32
    %0 = arith.cmpi eq, %arg1, %c0_i32 : i32
    %1 = arith.extui %0 : i1 to i32
    %c0_i32_0 = arith.constant 0 : i32
    %2 = arith.cmpi ne, %1, %c0_i32_0 : i32
    scf.if %2 {
      %cst_114 = arith.constant 0.000000e+00 : f32
      %516 = vector.broadcast %cst_114 : f32 to vector<8x128xf32>
      %c0_115 = arith.constant 0 : index
      %c0_116 = arith.constant 0 : index
      %517 = vector.load %arg10[%c0_115, %c0_116] : memref<8x128xf32, #tpu.memory_space<vmem>>, vector<8x128xf32>
      tpu.vector_store %arg10[%c0_115, %c0_116], %516 {strides = array<i32>} : memref<8x128xf32, #tpu.memory_space<vmem>>, vector<8x128xf32>,
      %cst_117 = arith.constant 0.000000e+00 : f32
      %518 = vector.broadcast %cst_117 : f32 to vector<8x128xf32>
      %c0_118 = arith.constant 0 : index
      %c0_119 = arith.constant 0 : index
      %519 = vector.load %arg11[%c0_118, %c0_119] : memref<8x128xf32, #tpu.memory_space<vmem>>, vector<8x128xf32>
      tpu.vector_store %arg11[%c0_118, %c0_119], %518 {strides = array<i32>} : memref<8x128xf32, #tpu.memory_space<vmem>>, vector<8x128xf32>,
      %cst_120 = arith.constant 0.000000e+00 : f32
      %520 = vector.broadcast %cst_120 : f32 to vector<8x128xf32>
      %c0_121 = arith.constant 0 : index
      %c0_122 = arith.constant 0 : index
      %521 = vector.load %arg12[%c0_121, %c0_122] : memref<8x128xf32, #tpu.memory_space<vmem>>, vector<8x128xf32>
      tpu.vector_store %arg12[%c0_121, %c0_122], %520 {strides = array<i32>} : memref<8x128xf32, #tpu.memory_space<vmem>>, vector<8x128xf32>,
      %cst_123 = arith.constant 0.000000e+00 : f32
      %522 = vector.broadcast %cst_123 : f32 to vector<8x128xf32>
      %c0_124 = arith.constant 0 : index
      %c0_125 = arith.constant 0 : index
      %523 = vector.load %arg13[%c0_124, %c0_125] : memref<8x128xf32, #tpu.memory_space<vmem>>, vector<8x128xf32>
      tpu.vector_store %arg13[%c0_124, %c0_125], %522 {strides = array<i32>} : memref<8x128xf32, #tpu.memory_space<vmem>>, vector<8x128xf32>,
    } else {
    }
    %c0 = arith.constant 0 : index
    %c0_1 = arith.constant 0 : index
    %3 = vector.load %arg3[%c0, %c0_1] : memref<128x512xbf16, #tpu.memory_space<vmem>>, vector<128x512xbf16>
    %c0_2 = arith.constant 0 : index
    %c0_3 = arith.constant 0 : index
    %4 = vector.load %arg4[%c0_2, %c0_3] : memref<128x512xbf16, #tpu.memory_space<vmem>>, vector<128x512xbf16>
    %c0_4 = arith.constant 0 : index
    %c0_5 = arith.constant 0 : index
    %5 = vector.load %arg5[%c0_4, %c0_5] : memref<128x512xbf16, #tpu.memory_space<vmem>>, vector<128x512xbf16>
    %c0_6 = arith.constant 0 : index
    %c0_7 = arith.constant 0 : index
    %6 = vector.load %arg6[%c0_6, %c0_7] : memref<1x512xf32, #tpu.memory_space<vmem>>, vector<1x512xf32>
    %7 = vector.shape_cast %6 : vector<1x512xf32> to vector<1x512xf32>
    %8 = vector.broadcast %7 : vector<1x512xf32> to vector<8x512xf32>
    %c0_8 = arith.constant 0 : index
    %c0_9 = arith.constant 0 : index
    %9 = vector.load %arg10[%c0_8, %c0_9] : memref<8x128xf32, #tpu.memory_space<vmem>>, vector<8x128xf32>
    %c0_10 = arith.constant 0 : index
    %c0_11 = arith.constant 0 : index
    %10 = vector.load %arg11[%c0_10, %c0_11] : memref<8x128xf32, #tpu.memory_space<vmem>>, vector<8x128xf32>
    %c0_12 = arith.constant 0 : index
    %c0_13 = arith.constant 0 : index
    %11 = vector.load %arg12[%c0_12, %c0_13] : memref<8x128xf32, #tpu.memory_space<vmem>>, vector<8x128xf32>
    %c0_14 = arith.constant 0 : index
    %c0_15 = arith.constant 0 : index
    %12 = vector.load %arg13[%c0_14, %c0_15] : memref<8x128xf32, #tpu.memory_space<vmem>>, vector<8x128xf32>
    %c0_i32_16 = arith.constant 0 : i32
    %13 = arith.truncf %11 : vector<8x128xf32> to vector<8x128xbf16>
    %cst = arith.constant dense<0.000000e+00> : vector<8x512xf32>
    %14 = tpu.matmul %13, %5, %cst {dimension_numbers = #tpu.dot_dimension_numbers<[1], [0], [0], [1], [0, 0, 1, 1], [], []>} : vector<8x128xbf16>, vector<128x512xbf16>, vector<8x512xf32> -> vector<8x512xf32>
    %15 = arith.index_cast %c0_i32_16 : i32 to index
    %c0_17 = arith.constant 0 : index
    %c0_18 = arith.constant 0 : index
    %16 = vector.load %arg2[%15, %c0_17, %c0_18] : memref<8x8x512xf32, #tpu.memory_space<vmem>>, vector<1x8x512xf32>
    %17 = vector.shape_cast %16 : vector<1x8x512xf32> to vector<8x512xf32>
    %18 = arith.truncf %9 : vector<8x128xf32> to vector<8x128xbf16>
    %cst_19 = arith.constant dense<0.000000e+00> : vector<8x512xf32>
    %19 = tpu.matmul %18, %3, %cst_19 {dimension_numbers = #tpu.dot_dimension_numbers<[1], [0], [0], [1], [0, 0, 1, 1], [], []>} : vector<8x128xbf16>, vector<128x512xbf16>, vector<8x512xf32> -> vector<8x512xf32>
    %20 = arith.addf %17, %19 : vector<8x512xf32>
    %21 = vector.extract_strided_slice %20 {offsets = [0, 0], sizes = [8, 128], strides = [1, 1]} : vector<8x512xf32> to vector<8x128xf32>
    %22 = arith.negf %21 : vector<8x128xf32>
    %23 = math.exp %22 : vector<8x128xf32>
    %cst_20 = arith.constant 1.000000e+00 : f32
    %24 = vector.broadcast %cst_20 : f32 to vector<8x128xf32>
    %25 = arith.addf %24, %23 : vector<8x128xf32>
    %26 = arith.divf %24, %25 : vector<8x128xf32>
    %27 = vector.extract_strided_slice %20 {offsets = [0, 128], sizes = [8, 128], strides = [1, 1]} : vector<8x512xf32> to vector<8x128xf32>
    %28 = arith.negf %27 : vector<8x128xf32>
    %29 = math.exp %28 : vector<8x128xf32>
    %cst_21 = arith.constant 1.000000e+00 : f32
    %30 = vector.broadcast %cst_21 : f32 to vector<8x128xf32>
    %31 = arith.addf %30, %29 : vector<8x128xf32>
    %32 = arith.divf %30, %31 : vector<8x128xf32>
    %33 = vector.extract_strided_slice %20 {offsets = [0, 256], sizes = [8, 128], strides = [1, 1]} : vector<8x512xf32> to vector<8x128xf32>
    %34 = math.tanh %33 : vector<8x128xf32>
    %35 = vector.extract_strided_slice %20 {offsets = [0, 384], sizes = [8, 128], strides = [1, 1]} : vector<8x512xf32> to vector<8x128xf32>
    %36 = arith.negf %35 : vector<8x128xf32>
    %37 = math.exp %36 : vector<8x128xf32>
    %cst_22 = arith.constant 1.000000e+00 : f32
    %38 = vector.broadcast %cst_22 : f32 to vector<8x128xf32>
    %39 = arith.addf %38, %37 : vector<8x128xf32>
    %40 = arith.divf %38, %39 : vector<8x128xf32>
    %41 = arith.mulf %32, %10 : vector<8x128xf32>
    %42 = arith.mulf %26, %34 : vector<8x128xf32>
    %43 = arith.addf %41, %42 : vector<8x128xf32>
    %44 = math.tanh %43 : vector<8x128xf32>
    %45 = arith.mulf %40, %44 : vector<8x128xf32>
    %46 = arith.truncf %45 : vector<8x128xf32> to vector<8x128xbf16>
    %cst_23 = arith.constant dense<0.000000e+00> : vector<8x512xf32>
    %47 = tpu.matmul %46, %4, %cst_23 {dimension_numbers = #tpu.dot_dimension_numbers<[1], [0], [0], [1], [0, 0, 1, 1], [], []>} : vector<8x128xbf16>, vector<128x512xbf16>, vector<8x512xf32> -> vector<8x512xf32>
    %48 = arith.addf %14, %47 : vector<8x512xf32>
    %49 = arith.addf %48, %8 : vector<8x512xf32>
    %50 = vector.extract_strided_slice %49 {offsets = [0, 0], sizes = [8, 128], strides = [1, 1]} : vector<8x512xf32> to vector<8x128xf32>
    %51 = arith.negf %50 : vector<8x128xf32>
    %52 = math.exp %51 : vector<8x128xf32>
    %cst_24 = arith.constant 1.000000e+00 : f32
    %53 = vector.broadcast %cst_24 : f32 to vector<8x128xf32>
    %54 = arith.addf %53, %52 : vector<8x128xf32>
    %55 = arith.divf %53, %54 : vector<8x128xf32>
    %56 = vector.extract_strided_slice %49 {offsets = [0, 128], sizes = [8, 128], strides = [1, 1]} : vector<8x512xf32> to vector<8x128xf32>
    %57 = arith.negf %56 : vector<8x128xf32>
    %58 = math.exp %57 : vector<8x128xf32>
    %cst_25 = arith.constant 1.000000e+00 : f32
    %59 = vector.broadcast %cst_25 : f32 to vector<8x128xf32>
    %60 = arith.addf %59, %58 : vector<8x128xf32>
    %61 = arith.divf %59, %60 : vector<8x128xf32>
    %62 = vector.extract_strided_slice %49 {offsets = [0, 256], sizes = [8, 128], strides = [1, 1]} : vector<8x512xf32> to vector<8x128xf32>
    %63 = math.tanh %62 : vector<8x128xf32>
    %64 = vector.extract_strided_slice %49 {offsets = [0, 384], sizes = [8, 128], strides = [1, 1]} : vector<8x512xf32> to vector<8x128xf32>
    %65 = arith.negf %64 : vector<8x128xf32>
    %66 = math.exp %65 : vector<8x128xf32>
    %cst_26 = arith.constant 1.000000e+00 : f32
    %67 = vector.broadcast %cst_26 : f32 to vector<8x128xf32>
    %68 = arith.addf %67, %66 : vector<8x128xf32>
    %69 = arith.divf %67, %68 : vector<8x128xf32>
    %70 = arith.mulf %61, %12 : vector<8x128xf32>
    %71 = arith.mulf %55, %63 : vector<8x128xf32>
    %72 = arith.addf %70, %71 : vector<8x128xf32>
    %73 = math.tanh %72 : vector<8x128xf32>
    %74 = arith.mulf %69, %73 : vector<8x128xf32>
    %c1_i32 = arith.constant 1 : i32
    %75 = arith.truncf %74 : vector<8x128xf32> to vector<8x128xbf16>
    %cst_27 = arith.constant dense<0.000000e+00> : vector<8x512xf32>
    %76 = tpu.matmul %75, %5, %cst_27 {dimension_numbers = #tpu.dot_dimension_numbers<[1], [0], [0], [1], [0, 0, 1, 1], [], []>} : vector<8x128xbf16>, vector<128x512xbf16>, vector<8x512xf32> -> vector<8x512xf32>
    %77 = arith.index_cast %c1_i32 : i32 to index
    %c0_28 = arith.constant 0 : index
    %c0_29 = arith.constant 0 : index
    %78 = vector.load %arg2[%77, %c0_28, %c0_29] : memref<8x8x512xf32, #tpu.memory_space<vmem>>, vector<1x8x512xf32>
    %79 = vector.shape_cast %78 : vector<1x8x512xf32> to vector<8x512xf32>
    %80 = arith.truncf %45 : vector<8x128xf32> to vector<8x128xbf16>
    %cst_30 = arith.constant dense<0.000000e+00> : vector<8x512xf32>
    %81 = tpu.matmul %80, %3, %cst_30 {dimension_numbers = #tpu.dot_dimension_numbers<[1], [0], [0], [1], [0, 0, 1, 1], [], []>} : vector<8x128xbf16>, vector<128x512xbf16>, vector<8x512xf32> -> vector<8x512xf32>
    %82 = arith.addf %79, %81 : vector<8x512xf32>
    %83 = vector.extract_strided_slice %82 {offsets = [0, 0], sizes = [8, 128], strides = [1, 1]} : vector<8x512xf32> to vector<8x128xf32>
    %84 = arith.negf %83 : vector<8x128xf32>
    %85 = math.exp %84 : vector<8x128xf32>
    %cst_31 = arith.constant 1.000000e+00 : f32
    %86 = vector.broadcast %cst_31 : f32 to vector<8x128xf32>
    %87 = arith.addf %86, %85 : vector<8x128xf32>
    %88 = arith.divf %86, %87 : vector<8x128xf32>
    %89 = vector.extract_strided_slice %82 {offsets = [0, 128], sizes = [8, 128], strides = [1, 1]} : vector<8x512xf32> to vector<8x128xf32>
    %90 = arith.negf %89 : vector<8x128xf32>
    %91 = math.exp %90 : vector<8x128xf32>
    %cst_32 = arith.constant 1.000000e+00 : f32
    %92 = vector.broadcast %cst_32 : f32 to vector<8x128xf32>
    %93 = arith.addf %92, %91 : vector<8x128xf32>
    %94 = arith.divf %92, %93 : vector<8x128xf32>
    %95 = vector.extract_strided_slice %82 {offsets = [0, 256], sizes = [8, 128], strides = [1, 1]} : vector<8x512xf32> to vector<8x128xf32>
    %96 = math.tanh %95 : vector<8x128xf32>
    %97 = vector.extract_strided_slice %82 {offsets = [0, 384], sizes = [8, 128], strides = [1, 1]} : vector<8x512xf32> to vector<8x128xf32>
    %98 = arith.negf %97 : vector<8x128xf32>
    %99 = math.exp %98 : vector<8x128xf32>
    %cst_33 = arith.constant 1.000000e+00 : f32
    %100 = vector.broadcast %cst_33 : f32 to vector<8x128xf32>
    %101 = arith.addf %100, %99 : vector<8x128xf32>
    %102 = arith.divf %100, %101 : vector<8x128xf32>
    %103 = arith.mulf %94, %43 : vector<8x128xf32>
    %104 = arith.mulf %88, %96 : vector<8x128xf32>
    %105 = arith.addf %103, %104 : vector<8x128xf32>
    %106 = math.tanh %105 : vector<8x128xf32>
    %107 = arith.mulf %102, %106 : vector<8x128xf32>
    %108 = arith.truncf %107 : vector<8x128xf32> to vector<8x128xbf16>
    %cst_34 = arith.constant dense<0.000000e+00> : vector<8x512xf32>
    %109 = tpu.matmul %108, %4, %cst_34 {dimension_numbers = #tpu.dot_dimension_numbers<[1], [0], [0], [1], [0, 0, 1, 1], [], []>} : vector<8x128xbf16>, vector<128x512xbf16>, vector<8x512xf32> -> vector<8x512xf32>
    %110 = arith.addf %76, %109 : vector<8x512xf32>
    %111 = arith.addf %110, %8 : vector<8x512xf32>
    %112 = vector.extract_strided_slice %111 {offsets = [0, 0], sizes = [8, 128], strides = [1, 1]} : vector<8x512xf32> to vector<8x128xf32>
    %113 = arith.negf %112 : vector<8x128xf32>
    %114 = math.exp %113 : vector<8x128xf32>
    %cst_35 = arith.constant 1.000000e+00 : f32
    %115 = vector.broadcast %cst_35 : f32 to vector<8x128xf32>
    %116 = arith.addf %115, %114 : vector<8x128xf32>
    %117 = arith.divf %115, %116 : vector<8x128xf32>
    %118 = vector.extract_strided_slice %111 {offsets = [0, 128], sizes = [8, 128], strides = [1, 1]} : vector<8x512xf32> to vector<8x128xf32>
    %119 = arith.negf %118 : vector<8x128xf32>
    %120 = math.exp %119 : vector<8x128xf32>
    %cst_36 = arith.constant 1.000000e+00 : f32
    %121 = vector.broadcast %cst_36 : f32 to vector<8x128xf32>
    %122 = arith.addf %121, %120 : vector<8x128xf32>
    %123 = arith.divf %121, %122 : vector<8x128xf32>
    %124 = vector.extract_strided_slice %111 {offsets = [0, 256], sizes = [8, 128], strides = [1, 1]} : vector<8x512xf32> to vector<8x128xf32>
    %125 = math.tanh %124 : vector<8x128xf32>
    %126 = vector.extract_strided_slice %111 {offsets = [0, 384], sizes = [8, 128], strides = [1, 1]} : vector<8x512xf32> to vector<8x128xf32>
    %127 = arith.negf %126 : vector<8x128xf32>
    %128 = math.exp %127 : vector<8x128xf32>
    %cst_37 = arith.constant 1.000000e+00 : f32
    %129 = vector.broadcast %cst_37 : f32 to vector<8x128xf32>
    %130 = arith.addf %129, %128 : vector<8x128xf32>
    %131 = arith.divf %129, %130 : vector<8x128xf32>
    %132 = arith.mulf %123, %72 : vector<8x128xf32>
    %133 = arith.mulf %117, %125 : vector<8x128xf32>
    %134 = arith.addf %132, %133 : vector<8x128xf32>
    %135 = math.tanh %134 : vector<8x128xf32>
    %136 = arith.mulf %131, %135 : vector<8x128xf32>
    %c2_i32 = arith.constant 2 : i32
    %137 = arith.truncf %136 : vector<8x128xf32> to vector<8x128xbf16>
    %cst_38 = arith.constant dense<0.000000e+00> : vector<8x512xf32>
    %138 = tpu.matmul %137, %5, %cst_38 {dimension_numbers = #tpu.dot_dimension_numbers<[1], [0], [0], [1], [0, 0, 1, 1], [], []>} : vector<8x128xbf16>, vector<128x512xbf16>, vector<8x512xf32> -> vector<8x512xf32>
    %139 = arith.index_cast %c2_i32 : i32 to index
    %c0_39 = arith.constant 0 : index
    %c0_40 = arith.constant 0 : index
    %140 = vector.load %arg2[%139, %c0_39, %c0_40] : memref<8x8x512xf32, #tpu.memory_space<vmem>>, vector<1x8x512xf32>
    %141 = vector.shape_cast %140 : vector<1x8x512xf32> to vector<8x512xf32>
    %142 = arith.truncf %107 : vector<8x128xf32> to vector<8x128xbf16>
    %cst_41 = arith.constant dense<0.000000e+00> : vector<8x512xf32>
    %143 = tpu.matmul %142, %3, %cst_41 {dimension_numbers = #tpu.dot_dimension_numbers<[1], [0], [0], [1], [0, 0, 1, 1], [], []>} : vector<8x128xbf16>, vector<128x512xbf16>, vector<8x512xf32> -> vector<8x512xf32>
    %144 = arith.addf %141, %143 : vector<8x512xf32>
    %145 = vector.extract_strided_slice %144 {offsets = [0, 0], sizes = [8, 128], strides = [1, 1]} : vector<8x512xf32> to vector<8x128xf32>
    %146 = arith.negf %145 : vector<8x128xf32>
    %147 = math.exp %146 : vector<8x128xf32>
    %cst_42 = arith.constant 1.000000e+00 : f32
    %148 = vector.broadcast %cst_42 : f32 to vector<8x128xf32>
    %149 = arith.addf %148, %147 : vector<8x128xf32>
    %150 = arith.divf %148, %149 : vector<8x128xf32>
    %151 = vector.extract_strided_slice %144 {offsets = [0, 128], sizes = [8, 128], strides = [1, 1]} : vector<8x512xf32> to vector<8x128xf32>
    %152 = arith.negf %151 : vector<8x128xf32>
    %153 = math.exp %152 : vector<8x128xf32>
    %cst_43 = arith.constant 1.000000e+00 : f32
    %154 = vector.broadcast %cst_43 : f32 to vector<8x128xf32>
    %155 = arith.addf %154, %153 : vector<8x128xf32>
    %156 = arith.divf %154, %155 : vector<8x128xf32>
    %157 = vector.extract_strided_slice %144 {offsets = [0, 256], sizes = [8, 128], strides = [1, 1]} : vector<8x512xf32> to vector<8x128xf32>
    %158 = math.tanh %157 : vector<8x128xf32>
    %159 = vector.extract_strided_slice %144 {offsets = [0, 384], sizes = [8, 128], strides = [1, 1]} : vector<8x512xf32> to vector<8x128xf32>
    %160 = arith.negf %159 : vector<8x128xf32>
    %161 = math.exp %160 : vector<8x128xf32>
    %cst_44 = arith.constant 1.000000e+00 : f32
    %162 = vector.broadcast %cst_44 : f32 to vector<8x128xf32>
    %163 = arith.addf %162, %161 : vector<8x128xf32>
    %164 = arith.divf %162, %163 : vector<8x128xf32>
    %165 = arith.mulf %156, %105 : vector<8x128xf32>
    %166 = arith.mulf %150, %158 : vector<8x128xf32>
    %167 = arith.addf %165, %166 : vector<8x128xf32>
    %168 = math.tanh %167 : vector<8x128xf32>
    %169 = arith.mulf %164, %168 : vector<8x128xf32>
    %170 = arith.truncf %169 : vector<8x128xf32> to vector<8x128xbf16>
    %cst_45 = arith.constant dense<0.000000e+00> : vector<8x512xf32>
    %171 = tpu.matmul %170, %4, %cst_45 {dimension_numbers = #tpu.dot_dimension_numbers<[1], [0], [0], [1], [0, 0, 1, 1], [], []>} : vector<8x128xbf16>, vector<128x512xbf16>, vector<8x512xf32> -> vector<8x512xf32>
    %172 = arith.addf %138, %171 : vector<8x512xf32>
    %173 = arith.addf %172, %8 : vector<8x512xf32>
    %174 = vector.extract_strided_slice %173 {offsets = [0, 0], sizes = [8, 128], strides = [1, 1]} : vector<8x512xf32> to vector<8x128xf32>
    %175 = arith.negf %174 : vector<8x128xf32>
    %176 = math.exp %175 : vector<8x128xf32>
    %cst_46 = arith.constant 1.000000e+00 : f32
    %177 = vector.broadcast %cst_46 : f32 to vector<8x128xf32>
    %178 = arith.addf %177, %176 : vector<8x128xf32>
    %179 = arith.divf %177, %178 : vector<8x128xf32>
    %180 = vector.extract_strided_slice %173 {offsets = [0, 128], sizes = [8, 128], strides = [1, 1]} : vector<8x512xf32> to vector<8x128xf32>
    %181 = arith.negf %180 : vector<8x128xf32>
    %182 = math.exp %181 : vector<8x128xf32>
    %cst_47 = arith.constant 1.000000e+00 : f32
    %183 = vector.broadcast %cst_47 : f32 to vector<8x128xf32>
    %184 = arith.addf %183, %182 : vector<8x128xf32>
    %185 = arith.divf %183, %184 : vector<8x128xf32>
    %186 = vector.extract_strided_slice %173 {offsets = [0, 256], sizes = [8, 128], strides = [1, 1]} : vector<8x512xf32> to vector<8x128xf32>
    %187 = math.tanh %186 : vector<8x128xf32>
    %188 = vector.extract_strided_slice %173 {offsets = [0, 384], sizes = [8, 128], strides = [1, 1]} : vector<8x512xf32> to vector<8x128xf32>
    %189 = arith.negf %188 : vector<8x128xf32>
    %190 = math.exp %189 : vector<8x128xf32>
    %cst_48 = arith.constant 1.000000e+00 : f32
    %191 = vector.broadcast %cst_48 : f32 to vector<8x128xf32>
    %192 = arith.addf %191, %190 : vector<8x128xf32>
    %193 = arith.divf %191, %192 : vector<8x128xf32>
    %194 = arith.mulf %185, %134 : vector<8x128xf32>
    %195 = arith.mulf %179, %187 : vector<8x128xf32>
    %196 = arith.addf %194, %195 : vector<8x128xf32>
    %197 = math.tanh %196 : vector<8x128xf32>
    %198 = arith.mulf %193, %197 : vector<8x128xf32>
    %c3_i32 = arith.constant 3 : i32
    %199 = arith.truncf %198 : vector<8x128xf32> to vector<8x128xbf16>
    %cst_49 = arith.constant dense<0.000000e+00> : vector<8x512xf32>
    %200 = tpu.matmul %199, %5, %cst_49 {dimension_numbers = #tpu.dot_dimension_numbers<[1], [0], [0], [1], [0, 0, 1, 1], [], []>} : vector<8x128xbf16>, vector<128x512xbf16>, vector<8x512xf32> -> vector<8x512xf32>
    %201 = arith.index_cast %c3_i32 : i32 to index
    %c0_50 = arith.constant 0 : index
    %c0_51 = arith.constant 0 : index
    %202 = vector.load %arg2[%201, %c0_50, %c0_51] : memref<8x8x512xf32, #tpu.memory_space<vmem>>, vector<1x8x512xf32>
    %203 = vector.shape_cast %202 : vector<1x8x512xf32> to vector<8x512xf32>
    %204 = arith.truncf %169 : vector<8x128xf32> to vector<8x128xbf16>
    %cst_52 = arith.constant dense<0.000000e+00> : vector<8x512xf32>
    %205 = tpu.matmul %204, %3, %cst_52 {dimension_numbers = #tpu.dot_dimension_numbers<[1], [0], [0], [1], [0, 0, 1, 1], [], []>} : vector<8x128xbf16>, vector<128x512xbf16>, vector<8x512xf32> -> vector<8x512xf32>
    %206 = arith.addf %203, %205 : vector<8x512xf32>
    %207 = vector.extract_strided_slice %206 {offsets = [0, 0], sizes = [8, 128], strides = [1, 1]} : vector<8x512xf32> to vector<8x128xf32>
    %208 = arith.negf %207 : vector<8x128xf32>
    %209 = math.exp %208 : vector<8x128xf32>
    %cst_53 = arith.constant 1.000000e+00 : f32
    %210 = vector.broadcast %cst_53 : f32 to vector<8x128xf32>
    %211 = arith.addf %210, %209 : vector<8x128xf32>
    %212 = arith.divf %210, %211 : vector<8x128xf32>
    %213 = vector.extract_strided_slice %206 {offsets = [0, 128], sizes = [8, 128], strides = [1, 1]} : vector<8x512xf32> to vector<8x128xf32>
    %214 = arith.negf %213 : vector<8x128xf32>
    %215 = math.exp %214 : vector<8x128xf32>
    %cst_54 = arith.constant 1.000000e+00 : f32
    %216 = vector.broadcast %cst_54 : f32 to vector<8x128xf32>
    %217 = arith.addf %216, %215 : vector<8x128xf32>
    %218 = arith.divf %216, %217 : vector<8x128xf32>
    %219 = vector.extract_strided_slice %206 {offsets = [0, 256], sizes = [8, 128], strides = [1, 1]} : vector<8x512xf32> to vector<8x128xf32>
    %220 = math.tanh %219 : vector<8x128xf32>
    %221 = vector.extract_strided_slice %206 {offsets = [0, 384], sizes = [8, 128], strides = [1, 1]} : vector<8x512xf32> to vector<8x128xf32>
    %222 = arith.negf %221 : vector<8x128xf32>
    %223 = math.exp %222 : vector<8x128xf32>
    %cst_55 = arith.constant 1.000000e+00 : f32
    %224 = vector.broadcast %cst_55 : f32 to vector<8x128xf32>
    %225 = arith.addf %224, %223 : vector<8x128xf32>
    %226 = arith.divf %224, %225 : vector<8x128xf32>
    %227 = arith.mulf %218, %167 : vector<8x128xf32>
    %228 = arith.mulf %212, %220 : vector<8x128xf32>
    %229 = arith.addf %227, %228 : vector<8x128xf32>
    %230 = math.tanh %229 : vector<8x128xf32>
    %231 = arith.mulf %226, %230 : vector<8x128xf32>
    %232 = arith.truncf %231 : vector<8x128xf32> to vector<8x128xbf16>
    %cst_56 = arith.constant dense<0.000000e+00> : vector<8x512xf32>
    %233 = tpu.matmul %232, %4, %cst_56 {dimension_numbers = #tpu.dot_dimension_numbers<[1], [0], [0], [1], [0, 0, 1, 1], [], []>} : vector<8x128xbf16>, vector<128x512xbf16>, vector<8x512xf32> -> vector<8x512xf32>
    %234 = arith.addf %200, %233 : vector<8x512xf32>
    %235 = arith.addf %234, %8 : vector<8x512xf32>
    %236 = vector.extract_strided_slice %235 {offsets = [0, 0], sizes = [8, 128], strides = [1, 1]} : vector<8x512xf32> to vector<8x128xf32>
    %237 = arith.negf %236 : vector<8x128xf32>
    %238 = math.exp %237 : vector<8x128xf32>
    %cst_57 = arith.constant 1.000000e+00 : f32
    %239 = vector.broadcast %cst_57 : f32 to vector<8x128xf32>
    %240 = arith.addf %239, %238 : vector<8x128xf32>
    %241 = arith.divf %239, %240 : vector<8x128xf32>
    %242 = vector.extract_strided_slice %235 {offsets = [0, 128], sizes = [8, 128], strides = [1, 1]} : vector<8x512xf32> to vector<8x128xf32>
    %243 = arith.negf %242 : vector<8x128xf32>
    %244 = math.exp %243 : vector<8x128xf32>
    %cst_58 = arith.constant 1.000000e+00 : f32
    %245 = vector.broadcast %cst_58 : f32 to vector<8x128xf32>
    %246 = arith.addf %245, %244 : vector<8x128xf32>
    %247 = arith.divf %245, %246 : vector<8x128xf32>
    %248 = vector.extract_strided_slice %235 {offsets = [0, 256], sizes = [8, 128], strides = [1, 1]} : vector<8x512xf32> to vector<8x128xf32>
    %249 = math.tanh %248 : vector<8x128xf32>
    %250 = vector.extract_strided_slice %235 {offsets = [0, 384], sizes = [8, 128], strides = [1, 1]} : vector<8x512xf32> to vector<8x128xf32>
    %251 = arith.negf %250 : vector<8x128xf32>
    %252 = math.exp %251 : vector<8x128xf32>
    %cst_59 = arith.constant 1.000000e+00 : f32
    %253 = vector.broadcast %cst_59 : f32 to vector<8x128xf32>
    %254 = arith.addf %253, %252 : vector<8x128xf32>
    %255 = arith.divf %253, %254 : vector<8x128xf32>
    %256 = arith.mulf %247, %196 : vector<8x128xf32>
    %257 = arith.mulf %241, %249 : vector<8x128xf32>
    %258 = arith.addf %256, %257 : vector<8x128xf32>
    %259 = math.tanh %258 : vector<8x128xf32>
    %260 = arith.mulf %255, %259 : vector<8x128xf32>
    %c4_i32 = arith.constant 4 : i32
    %261 = arith.truncf %260 : vector<8x128xf32> to vector<8x128xbf16>
    %cst_60 = arith.constant dense<0.000000e+00> : vector<8x512xf32>
    %262 = tpu.matmul %261, %5, %cst_60 {dimension_numbers = #tpu.dot_dimension_numbers<[1], [0], [0], [1], [0, 0, 1, 1], [], []>} : vector<8x128xbf16>, vector<128x512xbf16>, vector<8x512xf32> -> vector<8x512xf32>
    %263 = arith.index_cast %c4_i32 : i32 to index
    %c0_61 = arith.constant 0 : index
    %c0_62 = arith.constant 0 : index
    %264 = vector.load %arg2[%263, %c0_61, %c0_62] : memref<8x8x512xf32, #tpu.memory_space<vmem>>, vector<1x8x512xf32>
    %265 = vector.shape_cast %264 : vector<1x8x512xf32> to vector<8x512xf32>
    %266 = arith.truncf %231 : vector<8x128xf32> to vector<8x128xbf16>
    %cst_63 = arith.constant dense<0.000000e+00> : vector<8x512xf32>
    %267 = tpu.matmul %266, %3, %cst_63 {dimension_numbers = #tpu.dot_dimension_numbers<[1], [0], [0], [1], [0, 0, 1, 1], [], []>} : vector<8x128xbf16>, vector<128x512xbf16>, vector<8x512xf32> -> vector<8x512xf32>
    %268 = arith.addf %265, %267 : vector<8x512xf32>
    %269 = vector.extract_strided_slice %268 {offsets = [0, 0], sizes = [8, 128], strides = [1, 1]} : vector<8x512xf32> to vector<8x128xf32>
    %270 = arith.negf %269 : vector<8x128xf32>
    %271 = math.exp %270 : vector<8x128xf32>
    %cst_64 = arith.constant 1.000000e+00 : f32
    %272 = vector.broadcast %cst_64 : f32 to vector<8x128xf32>
    %273 = arith.addf %272, %271 : vector<8x128xf32>
    %274 = arith.divf %272, %273 : vector<8x128xf32>
    %275 = vector.extract_strided_slice %268 {offsets = [0, 128], sizes = [8, 128], strides = [1, 1]} : vector<8x512xf32> to vector<8x128xf32>
    %276 = arith.negf %275 : vector<8x128xf32>
    %277 = math.exp %276 : vector<8x128xf32>
    %cst_65 = arith.constant 1.000000e+00 : f32
    %278 = vector.broadcast %cst_65 : f32 to vector<8x128xf32>
    %279 = arith.addf %278, %277 : vector<8x128xf32>
    %280 = arith.divf %278, %279 : vector<8x128xf32>
    %281 = vector.extract_strided_slice %268 {offsets = [0, 256], sizes = [8, 128], strides = [1, 1]} : vector<8x512xf32> to vector<8x128xf32>
    %282 = math.tanh %281 : vector<8x128xf32>
    %283 = vector.extract_strided_slice %268 {offsets = [0, 384], sizes = [8, 128], strides = [1, 1]} : vector<8x512xf32> to vector<8x128xf32>
    %284 = arith.negf %283 : vector<8x128xf32>
    %285 = math.exp %284 : vector<8x128xf32>
    %cst_66 = arith.constant 1.000000e+00 : f32
    %286 = vector.broadcast %cst_66 : f32 to vector<8x128xf32>
    %287 = arith.addf %286, %285 : vector<8x128xf32>
    %288 = arith.divf %286, %287 : vector<8x128xf32>
    %289 = arith.mulf %280, %229 : vector<8x128xf32>
    %290 = arith.mulf %274, %282 : vector<8x128xf32>
    %291 = arith.addf %289, %290 : vector<8x128xf32>
    %292 = math.tanh %291 : vector<8x128xf32>
    %293 = arith.mulf %288, %292 : vector<8x128xf32>
    %294 = arith.truncf %293 : vector<8x128xf32> to vector<8x128xbf16>
    %cst_67 = arith.constant dense<0.000000e+00> : vector<8x512xf32>
    %295 = tpu.matmul %294, %4, %cst_67 {dimension_numbers = #tpu.dot_dimension_numbers<[1], [0], [0], [1], [0, 0, 1, 1], [], []>} : vector<8x128xbf16>, vector<128x512xbf16>, vector<8x512xf32> -> vector<8x512xf32>
    %296 = arith.addf %262, %295 : vector<8x512xf32>
    %297 = arith.addf %296, %8 : vector<8x512xf32>
    %298 = vector.extract_strided_slice %297 {offsets = [0, 0], sizes = [8, 128], strides = [1, 1]} : vector<8x512xf32> to vector<8x128xf32>
    %299 = arith.negf %298 : vector<8x128xf32>
    %300 = math.exp %299 : vector<8x128xf32>
    %cst_68 = arith.constant 1.000000e+00 : f32
    %301 = vector.broadcast %cst_68 : f32 to vector<8x128xf32>
    %302 = arith.addf %301, %300 : vector<8x128xf32>
    %303 = arith.divf %301, %302 : vector<8x128xf32>
    %304 = vector.extract_strided_slice %297 {offsets = [0, 128], sizes = [8, 128], strides = [1, 1]} : vector<8x512xf32> to vector<8x128xf32>
    %305 = arith.negf %304 : vector<8x128xf32>
    %306 = math.exp %305 : vector<8x128xf32>
    %cst_69 = arith.constant 1.000000e+00 : f32
    %307 = vector.broadcast %cst_69 : f32 to vector<8x128xf32>
    %308 = arith.addf %307, %306 : vector<8x128xf32>
    %309 = arith.divf %307, %308 : vector<8x128xf32>
    %310 = vector.extract_strided_slice %297 {offsets = [0, 256], sizes = [8, 128], strides = [1, 1]} : vector<8x512xf32> to vector<8x128xf32>
    %311 = math.tanh %310 : vector<8x128xf32>
    %312 = vector.extract_strided_slice %297 {offsets = [0, 384], sizes = [8, 128], strides = [1, 1]} : vector<8x512xf32> to vector<8x128xf32>
    %313 = arith.negf %312 : vector<8x128xf32>
    %314 = math.exp %313 : vector<8x128xf32>
    %cst_70 = arith.constant 1.000000e+00 : f32
    %315 = vector.broadcast %cst_70 : f32 to vector<8x128xf32>
    %316 = arith.addf %315, %314 : vector<8x128xf32>
    %317 = arith.divf %315, %316 : vector<8x128xf32>
    %318 = arith.mulf %309, %258 : vector<8x128xf32>
    %319 = arith.mulf %303, %311 : vector<8x128xf32>
    %320 = arith.addf %318, %319 : vector<8x128xf32>
    %321 = math.tanh %320 : vector<8x128xf32>
    %322 = arith.mulf %317, %321 : vector<8x128xf32>
    %c5_i32 = arith.constant 5 : i32
    %323 = arith.truncf %322 : vector<8x128xf32> to vector<8x128xbf16>
    %cst_71 = arith.constant dense<0.000000e+00> : vector<8x512xf32>
    %324 = tpu.matmul %323, %5, %cst_71 {dimension_numbers = #tpu.dot_dimension_numbers<[1], [0], [0], [1], [0, 0, 1, 1], [], []>} : vector<8x128xbf16>, vector<128x512xbf16>, vector<8x512xf32> -> vector<8x512xf32>
    %325 = arith.index_cast %c5_i32 : i32 to index
    %c0_72 = arith.constant 0 : index
    %c0_73 = arith.constant 0 : index
    %326 = vector.load %arg2[%325, %c0_72, %c0_73] : memref<8x8x512xf32, #tpu.memory_space<vmem>>, vector<1x8x512xf32>
    %327 = vector.shape_cast %326 : vector<1x8x512xf32> to vector<8x512xf32>
    %328 = arith.truncf %293 : vector<8x128xf32> to vector<8x128xbf16>
    %cst_74 = arith.constant dense<0.000000e+00> : vector<8x512xf32>
    %329 = tpu.matmul %328, %3, %cst_74 {dimension_numbers = #tpu.dot_dimension_numbers<[1], [0], [0], [1], [0, 0, 1, 1], [], []>} : vector<8x128xbf16>, vector<128x512xbf16>, vector<8x512xf32> -> vector<8x512xf32>
    %330 = arith.addf %327, %329 : vector<8x512xf32>
    %331 = vector.extract_strided_slice %330 {offsets = [0, 0], sizes = [8, 128], strides = [1, 1]} : vector<8x512xf32> to vector<8x128xf32>
    %332 = arith.negf %331 : vector<8x128xf32>
    %333 = math.exp %332 : vector<8x128xf32>
    %cst_75 = arith.constant 1.000000e+00 : f32
    %334 = vector.broadcast %cst_75 : f32 to vector<8x128xf32>
    %335 = arith.addf %334, %333 : vector<8x128xf32>
    %336 = arith.divf %334, %335 : vector<8x128xf32>
    %337 = vector.extract_strided_slice %330 {offsets = [0, 128], sizes = [8, 128], strides = [1, 1]} : vector<8x512xf32> to vector<8x128xf32>
    %338 = arith.negf %337 : vector<8x128xf32>
    %339 = math.exp %338 : vector<8x128xf32>
    %cst_76 = arith.constant 1.000000e+00 : f32
    %340 = vector.broadcast %cst_76 : f32 to vector<8x128xf32>
    %341 = arith.addf %340, %339 : vector<8x128xf32>
    %342 = arith.divf %340, %341 : vector<8x128xf32>
    %343 = vector.extract_strided_slice %330 {offsets = [0, 256], sizes = [8, 128], strides = [1, 1]} : vector<8x512xf32> to vector<8x128xf32>
    %344 = math.tanh %343 : vector<8x128xf32>
    %345 = vector.extract_strided_slice %330 {offsets = [0, 384], sizes = [8, 128], strides = [1, 1]} : vector<8x512xf32> to vector<8x128xf32>
    %346 = arith.negf %345 : vector<8x128xf32>
    %347 = math.exp %346 : vector<8x128xf32>
    %cst_77 = arith.constant 1.000000e+00 : f32
    %348 = vector.broadcast %cst_77 : f32 to vector<8x128xf32>
    %349 = arith.addf %348, %347 : vector<8x128xf32>
    %350 = arith.divf %348, %349 : vector<8x128xf32>
    %351 = arith.mulf %342, %291 : vector<8x128xf32>
    %352 = arith.mulf %336, %344 : vector<8x128xf32>
    %353 = arith.addf %351, %352 : vector<8x128xf32>
    %354 = math.tanh %353 : vector<8x128xf32>
    %355 = arith.mulf %350, %354 : vector<8x128xf32>
    %356 = arith.truncf %355 : vector<8x128xf32> to vector<8x128xbf16>
    %cst_78 = arith.constant dense<0.000000e+00> : vector<8x512xf32>
    %357 = tpu.matmul %356, %4, %cst_78 {dimension_numbers = #tpu.dot_dimension_numbers<[1], [0], [0], [1], [0, 0, 1, 1], [], []>} : vector<8x128xbf16>, vector<128x512xbf16>, vector<8x512xf32> -> vector<8x512xf32>
    %358 = arith.addf %324, %357 : vector<8x512xf32>
    %359 = arith.addf %358, %8 : vector<8x512xf32>
    %360 = vector.extract_strided_slice %359 {offsets = [0, 0], sizes = [8, 128], strides = [1, 1]} : vector<8x512xf32> to vector<8x128xf32>
    %361 = arith.negf %360 : vector<8x128xf32>
    %362 = math.exp %361 : vector<8x128xf32>
    %cst_79 = arith.constant 1.000000e+00 : f32
    %363 = vector.broadcast %cst_79 : f32 to vector<8x128xf32>
    %364 = arith.addf %363, %362 : vector<8x128xf32>
    %365 = arith.divf %363, %364 : vector<8x128xf32>
    %366 = vector.extract_strided_slice %359 {offsets = [0, 128], sizes = [8, 128], strides = [1, 1]} : vector<8x512xf32> to vector<8x128xf32>
    %367 = arith.negf %366 : vector<8x128xf32>
    %368 = math.exp %367 : vector<8x128xf32>
    %cst_80 = arith.constant 1.000000e+00 : f32
    %369 = vector.broadcast %cst_80 : f32 to vector<8x128xf32>
    %370 = arith.addf %369, %368 : vector<8x128xf32>
    %371 = arith.divf %369, %370 : vector<8x128xf32>
    %372 = vector.extract_strided_slice %359 {offsets = [0, 256], sizes = [8, 128], strides = [1, 1]} : vector<8x512xf32> to vector<8x128xf32>
    %373 = math.tanh %372 : vector<8x128xf32>
    %374 = vector.extract_strided_slice %359 {offsets = [0, 384], sizes = [8, 128], strides = [1, 1]} : vector<8x512xf32> to vector<8x128xf32>
    %375 = arith.negf %374 : vector<8x128xf32>
    %376 = math.exp %375 : vector<8x128xf32>
    %cst_81 = arith.constant 1.000000e+00 : f32
    %377 = vector.broadcast %cst_81 : f32 to vector<8x128xf32>
    %378 = arith.addf %377, %376 : vector<8x128xf32>
    %379 = arith.divf %377, %378 : vector<8x128xf32>
    %380 = arith.mulf %371, %320 : vector<8x128xf32>
    %381 = arith.mulf %365, %373 : vector<8x128xf32>
    %382 = arith.addf %380, %381 : vector<8x128xf32>
    %383 = math.tanh %382 : vector<8x128xf32>
    %384 = arith.mulf %379, %383 : vector<8x128xf32>
    %c6_i32 = arith.constant 6 : i32
    %385 = arith.truncf %384 : vector<8x128xf32> to vector<8x128xbf16>
    %cst_82 = arith.constant dense<0.000000e+00> : vector<8x512xf32>
    %386 = tpu.matmul %385, %5, %cst_82 {dimension_numbers = #tpu.dot_dimension_numbers<[1], [0], [0], [1], [0, 0, 1, 1], [], []>} : vector<8x128xbf16>, vector<128x512xbf16>, vector<8x512xf32> -> vector<8x512xf32>
    %387 = arith.index_cast %c6_i32 : i32 to index
    %c0_83 = arith.constant 0 : index
    %c0_84 = arith.constant 0 : index
    %388 = vector.load %arg2[%387, %c0_83, %c0_84] : memref<8x8x512xf32, #tpu.memory_space<vmem>>, vector<1x8x512xf32>
    %389 = vector.shape_cast %388 : vector<1x8x512xf32> to vector<8x512xf32>
    %390 = arith.truncf %355 : vector<8x128xf32> to vector<8x128xbf16>
    %cst_85 = arith.constant dense<0.000000e+00> : vector<8x512xf32>
    %391 = tpu.matmul %390, %3, %cst_85 {dimension_numbers = #tpu.dot_dimension_numbers<[1], [0], [0], [1], [0, 0, 1, 1], [], []>} : vector<8x128xbf16>, vector<128x512xbf16>, vector<8x512xf32> -> vector<8x512xf32>
    %392 = arith.addf %389, %391 : vector<8x512xf32>
    %393 = vector.extract_strided_slice %392 {offsets = [0, 0], sizes = [8, 128], strides = [1, 1]} : vector<8x512xf32> to vector<8x128xf32>
    %394 = arith.negf %393 : vector<8x128xf32>
    %395 = math.exp %394 : vector<8x128xf32>
    %cst_86 = arith.constant 1.000000e+00 : f32
    %396 = vector.broadcast %cst_86 : f32 to vector<8x128xf32>
    %397 = arith.addf %396, %395 : vector<8x128xf32>
    %398 = arith.divf %396, %397 : vector<8x128xf32>
    %399 = vector.extract_strided_slice %392 {offsets = [0, 128], sizes = [8, 128], strides = [1, 1]} : vector<8x512xf32> to vector<8x128xf32>
    %400 = arith.negf %399 : vector<8x128xf32>
    %401 = math.exp %400 : vector<8x128xf32>
    %cst_87 = arith.constant 1.000000e+00 : f32
    %402 = vector.broadcast %cst_87 : f32 to vector<8x128xf32>
    %403 = arith.addf %402, %401 : vector<8x128xf32>
    %404 = arith.divf %402, %403 : vector<8x128xf32>
    %405 = vector.extract_strided_slice %392 {offsets = [0, 256], sizes = [8, 128], strides = [1, 1]} : vector<8x512xf32> to vector<8x128xf32>
    %406 = math.tanh %405 : vector<8x128xf32>
    %407 = vector.extract_strided_slice %392 {offsets = [0, 384], sizes = [8, 128], strides = [1, 1]} : vector<8x512xf32> to vector<8x128xf32>
    %408 = arith.negf %407 : vector<8x128xf32>
    %409 = math.exp %408 : vector<8x128xf32>
    %cst_88 = arith.constant 1.000000e+00 : f32
    %410 = vector.broadcast %cst_88 : f32 to vector<8x128xf32>
    %411 = arith.addf %410, %409 : vector<8x128xf32>
    %412 = arith.divf %410, %411 : vector<8x128xf32>
    %413 = arith.mulf %404, %353 : vector<8x128xf32>
    %414 = arith.mulf %398, %406 : vector<8x128xf32>
    %415 = arith.addf %413, %414 : vector<8x128xf32>
    %416 = math.tanh %415 : vector<8x128xf32>
    %417 = arith.mulf %412, %416 : vector<8x128xf32>
    %418 = arith.truncf %417 : vector<8x128xf32> to vector<8x128xbf16>
    %cst_89 = arith.constant dense<0.000000e+00> : vector<8x512xf32>
    %419 = tpu.matmul %418, %4, %cst_89 {dimension_numbers = #tpu.dot_dimension_numbers<[1], [0], [0], [1], [0, 0, 1, 1], [], []>} : vector<8x128xbf16>, vector<128x512xbf16>, vector<8x512xf32> -> vector<8x512xf32>
    %420 = arith.addf %386, %419 : vector<8x512xf32>
    %421 = arith.addf %420, %8 : vector<8x512xf32>
    %422 = vector.extract_strided_slice %421 {offsets = [0, 0], sizes = [8, 128], strides = [1, 1]} : vector<8x512xf32> to vector<8x128xf32>
    %423 = arith.negf %422 : vector<8x128xf32>
    %424 = math.exp %423 : vector<8x128xf32>
    %cst_90 = arith.constant 1.000000e+00 : f32
    %425 = vector.broadcast %cst_90 : f32 to vector<8x128xf32>
    %426 = arith.addf %425, %424 : vector<8x128xf32>
    %427 = arith.divf %425, %426 : vector<8x128xf32>
    %428 = vector.extract_strided_slice %421 {offsets = [0, 128], sizes = [8, 128], strides = [1, 1]} : vector<8x512xf32> to vector<8x128xf32>
    %429 = arith.negf %428 : vector<8x128xf32>
    %430 = math.exp %429 : vector<8x128xf32>
    %cst_91 = arith.constant 1.000000e+00 : f32
    %431 = vector.broadcast %cst_91 : f32 to vector<8x128xf32>
    %432 = arith.addf %431, %430 : vector<8x128xf32>
    %433 = arith.divf %431, %432 : vector<8x128xf32>
    %434 = vector.extract_strided_slice %421 {offsets = [0, 256], sizes = [8, 128], strides = [1, 1]} : vector<8x512xf32> to vector<8x128xf32>
    %435 = math.tanh %434 : vector<8x128xf32>
    %436 = vector.extract_strided_slice %421 {offsets = [0, 384], sizes = [8, 128], strides = [1, 1]} : vector<8x512xf32> to vector<8x128xf32>
    %437 = arith.negf %436 : vector<8x128xf32>
    %438 = math.exp %437 : vector<8x128xf32>
    %cst_92 = arith.constant 1.000000e+00 : f32
    %439 = vector.broadcast %cst_92 : f32 to vector<8x128xf32>
    %440 = arith.addf %439, %438 : vector<8x128xf32>
    %441 = arith.divf %439, %440 : vector<8x128xf32>
    %442 = arith.mulf %433, %382 : vector<8x128xf32>
    %443 = arith.mulf %427, %435 : vector<8x128xf32>
    %444 = arith.addf %442, %443 : vector<8x128xf32>
    %445 = math.tanh %444 : vector<8x128xf32>
    %446 = arith.mulf %441, %445 : vector<8x128xf32>
    %c7_i32 = arith.constant 7 : i32
    %447 = arith.truncf %446 : vector<8x128xf32> to vector<8x128xbf16>
    %cst_93 = arith.constant dense<0.000000e+00> : vector<8x512xf32>
    %448 = tpu.matmul %447, %5, %cst_93 {dimension_numbers = #tpu.dot_dimension_numbers<[1], [0], [0], [1], [0, 0, 1, 1], [], []>} : vector<8x128xbf16>, vector<128x512xbf16>, vector<8x512xf32> -> vector<8x512xf32>
    %449 = arith.index_cast %c7_i32 : i32 to index
    %c0_94 = arith.constant 0 : index
    %c0_95 = arith.constant 0 : index
    %450 = vector.load %arg2[%449, %c0_94, %c0_95] : memref<8x8x512xf32, #tpu.memory_space<vmem>>, vector<1x8x512xf32>
    %451 = vector.shape_cast %450 : vector<1x8x512xf32> to vector<8x512xf32>
    %452 = arith.truncf %417 : vector<8x128xf32> to vector<8x128xbf16>
    %cst_96 = arith.constant dense<0.000000e+00> : vector<8x512xf32>
    %453 = tpu.matmul %452, %3, %cst_96 {dimension_numbers = #tpu.dot_dimension_numbers<[1], [0], [0], [1], [0, 0, 1, 1], [], []>} : vector<8x128xbf16>, vector<128x512xbf16>, vector<8x512xf32> -> vector<8x512xf32>
    %454 = arith.addf %451, %453 : vector<8x512xf32>
    %455 = vector.extract_strided_slice %454 {offsets = [0, 0], sizes = [8, 128], strides = [1, 1]} : vector<8x512xf32> to vector<8x128xf32>
    %456 = arith.negf %455 : vector<8x128xf32>
    %457 = math.exp %456 : vector<8x128xf32>
    %cst_97 = arith.constant 1.000000e+00 : f32
    %458 = vector.broadcast %cst_97 : f32 to vector<8x128xf32>
    %459 = arith.addf %458, %457 : vector<8x128xf32>
    %460 = arith.divf %458, %459 : vector<8x128xf32>
    %461 = vector.extract_strided_slice %454 {offsets = [0, 128], sizes = [8, 128], strides = [1, 1]} : vector<8x512xf32> to vector<8x128xf32>
    %462 = arith.negf %461 : vector<8x128xf32>
    %463 = math.exp %462 : vector<8x128xf32>
    %cst_98 = arith.constant 1.000000e+00 : f32
    %464 = vector.broadcast %cst_98 : f32 to vector<8x128xf32>
    %465 = arith.addf %464, %463 : vector<8x128xf32>
    %466 = arith.divf %464, %465 : vector<8x128xf32>
    %467 = vector.extract_strided_slice %454 {offsets = [0, 256], sizes = [8, 128], strides = [1, 1]} : vector<8x512xf32> to vector<8x128xf32>
    %468 = math.tanh %467 : vector<8x128xf32>
    %469 = vector.extract_strided_slice %454 {offsets = [0, 384], sizes = [8, 128], strides = [1, 1]} : vector<8x512xf32> to vector<8x128xf32>
    %470 = arith.negf %469 : vector<8x128xf32>
    %471 = math.exp %470 : vector<8x128xf32>
    %cst_99 = arith.constant 1.000000e+00 : f32
    %472 = vector.broadcast %cst_99 : f32 to vector<8x128xf32>
    %473 = arith.addf %472, %471 : vector<8x128xf32>
    %474 = arith.divf %472, %473 : vector<8x128xf32>
    %475 = arith.mulf %466, %415 : vector<8x128xf32>
    %476 = arith.mulf %460, %468 : vector<8x128xf32>
    %477 = arith.addf %475, %476 : vector<8x128xf32>
    %478 = math.tanh %477 : vector<8x128xf32>
    %479 = arith.mulf %474, %478 : vector<8x128xf32>
    %480 = arith.truncf %479 : vector<8x128xf32> to vector<8x128xbf16>
    %cst_100 = arith.constant dense<0.000000e+00> : vector<8x512xf32>
    %481 = tpu.matmul %480, %4, %cst_100 {dimension_numbers = #tpu.dot_dimension_numbers<[1], [0], [0], [1], [0, 0, 1, 1], [], []>} : vector<8x128xbf16>, vector<128x512xbf16>, vector<8x512xf32> -> vector<8x512xf32>
    %482 = arith.addf %448, %481 : vector<8x512xf32>
    %483 = arith.addf %482, %8 : vector<8x512xf32>
    %484 = vector.extract_strided_slice %483 {offsets = [0, 0], sizes = [8, 128], strides = [1, 1]} : vector<8x512xf32> to vector<8x128xf32>
    %485 = arith.negf %484 : vector<8x128xf32>
    %486 = math.exp %485 : vector<8x128xf32>
    %cst_101 = arith.constant 1.000000e+00 : f32
    %487 = vector.broadcast %cst_101 : f32 to vector<8x128xf32>
    %488 = arith.addf %487, %486 : vector<8x128xf32>
    %489 = arith.divf %487, %488 : vector<8x128xf32>
    %490 = vector.extract_strided_slice %483 {offsets = [0, 128], sizes = [8, 128], strides = [1, 1]} : vector<8x512xf32> to vector<8x128xf32>
    %491 = arith.negf %490 : vector<8x128xf32>
    %492 = math.exp %491 : vector<8x128xf32>
    %cst_102 = arith.constant 1.000000e+00 : f32
    %493 = vector.broadcast %cst_102 : f32 to vector<8x128xf32>
    %494 = arith.addf %493, %492 : vector<8x128xf32>
    %495 = arith.divf %493, %494 : vector<8x128xf32>
    %496 = vector.extract_strided_slice %483 {offsets = [0, 256], sizes = [8, 128], strides = [1, 1]} : vector<8x512xf32> to vector<8x128xf32>
    %497 = math.tanh %496 : vector<8x128xf32>
    %498 = vector.extract_strided_slice %483 {offsets = [0, 384], sizes = [8, 128], strides = [1, 1]} : vector<8x512xf32> to vector<8x128xf32>
    %499 = arith.negf %498 : vector<8x128xf32>
    %500 = math.exp %499 : vector<8x128xf32>
    %cst_103 = arith.constant 1.000000e+00 : f32
    %501 = vector.broadcast %cst_103 : f32 to vector<8x128xf32>
    %502 = arith.addf %501, %500 : vector<8x128xf32>
    %503 = arith.divf %501, %502 : vector<8x128xf32>
    %504 = arith.mulf %495, %444 : vector<8x128xf32>
    %505 = arith.mulf %489, %497 : vector<8x128xf32>
    %506 = arith.addf %504, %505 : vector<8x128xf32>
    %507 = math.tanh %506 : vector<8x128xf32>
    %508 = arith.mulf %503, %507 : vector<8x128xf32>
    %c8_i32 = arith.constant 8 : i32
    %c0_104 = arith.constant 0 : index
    %c0_105 = arith.constant 0 : index
    %509 = vector.load %arg10[%c0_104, %c0_105] : memref<8x128xf32, #tpu.memory_space<vmem>>, vector<8x128xf32>
    tpu.vector_store %arg10[%c0_104, %c0_105], %479 {strides = array<i32>} : memref<8x128xf32, #tpu.memory_space<vmem>>, vector<8x128xf32>,
    %c0_106 = arith.constant 0 : index
    %c0_107 = arith.constant 0 : index
    %510 = vector.load %arg11[%c0_106, %c0_107] : memref<8x128xf32, #tpu.memory_space<vmem>>, vector<8x128xf32>
    tpu.vector_store %arg11[%c0_106, %c0_107], %477 {strides = array<i32>} : memref<8x128xf32, #tpu.memory_space<vmem>>, vector<8x128xf32>,
    %c0_108 = arith.constant 0 : index
    %c0_109 = arith.constant 0 : index
    %511 = vector.load %arg12[%c0_108, %c0_109] : memref<8x128xf32, #tpu.memory_space<vmem>>, vector<8x128xf32>
    tpu.vector_store %arg12[%c0_108, %c0_109], %508 {strides = array<i32>} : memref<8x128xf32, #tpu.memory_space<vmem>>, vector<8x128xf32>,
    %c0_110 = arith.constant 0 : index
    %c0_111 = arith.constant 0 : index
    %512 = vector.load %arg13[%c0_110, %c0_111] : memref<8x128xf32, #tpu.memory_space<vmem>>, vector<8x128xf32>
    tpu.vector_store %arg13[%c0_110, %c0_111], %506 {strides = array<i32>} : memref<8x128xf32, #tpu.memory_space<vmem>>, vector<8x128xf32>,
    %c0_i32_112 = arith.constant 0 : i32
    %513 = arith.cmpi eq, %arg1, %c0_i32_112 : i32
    %514 = arith.extui %513 : i1 to i32
    %c0_i32_113 = arith.constant 0 : i32
    %515 = arith.cmpi ne, %514, %c0_i32_113 : i32
    scf.if %515 {
      %c0_114 = arith.constant 0 : index
      %c0_115 = arith.constant 0 : index
      %516 = vector.load %arg7[%c0_114, %c0_115] : memref<1x128xf32, #tpu.memory_space<vmem>>, vector<1x128xf32>
      %517 = vector.broadcast %516 : vector<1x128xf32> to vector<8x128xf32>
      %518 = arith.mulf %508, %517 : vector<8x128xf32>
      %cst_116 = arith.constant dense<0.000000e+00> : vector<8xf32>
      %519 = vector.multi_reduction <add>, %518, %cst_116 [1] : vector<8x128xf32> to vector<8xf32>
      %520 = vector.shape_cast %519 : vector<8xf32> to vector<8x1xf32>
      %c0_117 = arith.constant 0 : index
      %c0_118 = arith.constant 0 : index
      %521 = memref.load %arg8[%c0_117, %c0_118] : memref<1x1xf32, #tpu.memory_space<smem>>
      %522 = vector.broadcast %521 : f32 to vector<8x1xf32>
      %523 = arith.addf %520, %522 : vector<8x1xf32>
      %c0_119 = arith.constant 0 : index
      %c0_120 = arith.constant 0 : index
      %524 = vector.load %arg9[%c0_119, %c0_120] : memref<8x1xf32, #tpu.memory_space<vmem>>, vector<8x1xf32>
      tpu.vector_store %arg9[%c0_119, %c0_120], %523 {strides = array<i32>} : memref<8x1xf32, #tpu.memory_space<vmem>>, vector<8x1xf32>,
    } else {
    }
    return
  }
  func.func @transform_0(%arg0: i32, %arg1: i32) -> (i32, i32, i32) {
    %c0_i32 = arith.constant 0 : i32
    %c0_i32_0 = arith.constant 0 : i32
    return %arg1, %arg0, %c0_i32 : i32, i32, i32
  }
  func.func @transform_1(%arg0: i32, %arg1: i32) -> (i32, i32) {
    %c0_i32 = arith.constant 0 : i32
    %c0_i32_0 = arith.constant 0 : i32
    %c0_i32_1 = arith.constant 0 : i32
    return %c0_i32, %c0_i32_0 : i32, i32
  }
  func.func @transform_2(%arg0: i32, %arg1: i32) -> (i32, i32) {
    %c0_i32 = arith.constant 0 : i32
    %c0_i32_0 = arith.constant 0 : i32
    %c0_i32_1 = arith.constant 0 : i32
    return %c0_i32, %c0_i32_0 : i32, i32
  }
  func.func @transform_3(%arg0: i32, %arg1: i32) -> (i32, i32) {
    %c0_i32 = arith.constant 0 : i32
    %c0_i32_0 = arith.constant 0 : i32
    %c0_i32_1 = arith.constant 0 : i32
    return %c0_i32, %c0_i32_0 : i32, i32
  }
  func.func @transform_4(%arg0: i32, %arg1: i32) -> (i32, i32) {
    %c0_i32 = arith.constant 0 : i32
    %c0_i32_0 = arith.constant 0 : i32
    %c0_i32_1 = arith.constant 0 : i32
    return %c0_i32, %c0_i32_0 : i32, i32
  }
  func.func @transform_5(%arg0: i32, %arg1: i32) -> (i32, i32) {
    %c0_i32 = arith.constant 0 : i32
    %c0_i32_0 = arith.constant 0 : i32
    %c0_i32_1 = arith.constant 0 : i32
    return %c0_i32, %c0_i32_0 : i32, i32
  }
  func.func @transform_6(%arg0: i32, %arg1: i32) -> (i32, i32) {
    %c0_i32 = arith.constant 0 : i32
    %c0_i32_0 = arith.constant 0 : i32
    %c0_i32_1 = arith.constant 0 : i32
    return %c0_i32, %c0_i32_0 : i32, i32
  }
  func.func @transform_7(%arg0: i32, %arg1: i32) -> (i32, i32) {
    %c0_i32 = arith.constant 0 : i32
    %c0_i32_0 = arith.constant 0 : i32
    return %arg0, %c0_i32 : i32, i32
  }
}

</mosaic_0001>

<bundles_post_ra>
// kernel: tpu_custom_call.1
= control target key start
LH: loop header
LB: loop body
LE: loop exit
PB: predicated region body
PF: predicated region fallthrough
CT: control target
= control target key end

     0   :  { %13 = vsyncpa [#allocation8], 0  ;;  %s5728_s0 = inlined_call_operand.hbm [shape: f32[8,8,512], index: 0, kind: input, shape index: {}]   ;;  %s5729_s1 = inlined_call_operand.hbm [shape: bf16[128,512], index: 1, kind: input, shape index: {}]   ;;  %s5730_s2 = inlined_call_operand.hbm [shape: bf16[128,512], index: 2, kind: input, shape index: {}]   ;;  %s5731_s3 = inlined_call_operand.hbm [shape: bf16[128,512], index: 3, kind: input, shape index: {}]   ;;  %s5732_s4 = inlined_call_operand.vmem [shape: f32[1,512], index: 4, kind: input, shape index: {}]   ;;  %s5733_s5 = inlined_call_operand.vmem [shape: f32[1,128], index: 5, kind: input, shape index: {}]   ;;  %s5734_s6 = inlined_call_operand.<no memory space> [shape: f32[1,1], index: 6, kind: input, shape index: {}]   ;;  %s5735_s7 = inlined_call_operand.vmem [shape: f32[8,1], index: 7, kind: output, shape index: {}]  }
   0x1   :  { %14 = vsyncpa [#allocation10], 0 }
   0x2   :  { %15 = vsyncpa [#allocation13], 0  ;;  %s4035_s24 = smov [#allocation9]   ;;  %s3941_s28 = scalar_lea.hbm %s5729_s1, 4096 }
   0x3   :  { %s33_s25 = sshll.u32 %s4035_s24, 4  ;;  %p3942_p0 = scmp.ne.s32.totalorder %s5729_s1, %s3941_s28  ;;  %s34_s25 = int_to_ptr.vmem [resolvable:$true] %s33_s25 }
   0x4   :  { %p3945_p1 = scmp.lt.u32.totalorder %s3941_s28, %s5729_s1 }
   0x6   :  { %p3947_p2 = pnand %p3945_p1, %p3942_p0 }
   0x8   :  { %3950 = shalt.err (!%p3947_p2)
}
   0x9   :  { %s3951_s10 = scalar_lea.vmem %s34_s25, 4096  ;;  %p3956_p4 = scmp.lt.s32.totalorder %s34_s25, %s34_s25 }
   0xa   :  { %p3952_p3 = scmp.ne.s32.totalorder %s34_s25, %s3951_s10  ;;  %p3957_p5 = scmp.lt.s32.totalorder %s3951_s10, %s3951_s10 }
   0xc   :  { %p3958_p6 = por %p3957_p5, %p3956_p4 }
   0xe   :  { %p3959_p7 = pnand %p3958_p6, %p3952_p3 }
  0x10   :  { %3962 = shalt.err (!%p3959_p7)
}
  0x11   :  { %s4036_s11 = smov 256   ;;  %s4037_s12 = smov 16  }
  0x12   :  { %39 = dma.hbm_to_vmem [thread:$0]  %s5729_s1, 4096, %s34_s25, [#allocation10], %s4036_s11, %s4036_s11, %s4037_s12  }
  0x13   :  { %s4038_s15 = smov [#allocation7]   ;;  %s3963_s19 = scalar_lea.hbm %s5728_s0, 4096 }
  0x14   :  { %s21_s16 = sshll.u32 %s4038_s15, 4  ;;  %p3964_p8 = scmp.ne.s32.totalorder %s5728_s0, %s3963_s19  ;;  %s22_s16 = int_to_ptr.vmem [resolvable:$true] %s21_s16 }
  0x15   :  { %p3967_p9 = scmp.lt.u32.totalorder %s3963_s19, %s5728_s0 }
  0x17   :  { %p3969_p10 = pnand %p3967_p9, %p3964_p8 }
  0x19   :  { %3972 = shalt.err (!%p3969_p10)
}
  0x1a   :  { %s3973_s24 = scalar_lea.vmem %s22_s16, 4096  ;;  %p3978_p12 = scmp.lt.s32.totalorder %s22_s16, %s22_s16 }
  0x1b   :  { %p3974_p11 = scmp.ne.s32.totalorder %s22_s16, %s3973_s24  ;;  %p3979_p13 = scmp.lt.s32.totalorder %s3973_s24, %s3973_s24 }
  0x1d   :  { %p3980_p0 = por %p3979_p13, %p3978_p12 }
  0x1f   :  { %p3981_p1 = pnand %p3980_p0, %p3974_p11 }
  0x21   :  { %3984 = shalt.err (!%p3981_p1)
}
  0x22   :  { %s4039_s1 = smov 512   ;;  %s4040_s25 = smov 32  }
  0x23   :  { %27 = dma.hbm_to_vmem [thread:$0]  %s5728_s0, 4096, %s22_s16, [#allocation8], %s4039_s1, %s4039_s1, %s4040_s25  }
  0x24   :  { %s4041_s28 = smov [#allocation11]   ;;  %s4042_s30 = smov [#allocation12]  }
  0x25   :  { %s45_s29 = sshll.u32 %s4041_s28, 4  ;;  %s57_s8 = sshll.u32 %s4042_s30, 4  ;;  %s46_s29 = int_to_ptr.vmem [resolvable:$true] %s45_s29  ;;  %s4112_s8 = int_to_ptr.vmem [resolvable:$true] %s57_s8 }
  0x26   :  { %s3985_s13 = scalar_lea.hbm %s5730_s2, 4096 }
  0x27   :  { %p3986_p2 = scmp.ne.s32.totalorder %s5730_s2, %s3985_s13  ;;  %p3989_p3 = scmp.lt.u32.totalorder %s3985_s13, %s5730_s2 }
  0x29   :  { %p3991_p4 = pnand %p3989_p3, %p3986_p2 }
  0x2b   :  { %3994 = shalt.err (!%p3991_p4)
}
  0x2c   :  { %s3995_s0 = scalar_lea.vmem %s46_s29, 4096  ;;  %p4000_p6 = scmp.lt.s32.totalorder %s46_s29, %s46_s29 }
  0x2d   :  { %p3996_p5 = scmp.ne.s32.totalorder %s46_s29, %s3995_s0  ;;  %p4001_p7 = scmp.lt.s32.totalorder %s3995_s0, %s3995_s0 }
  0x2f   :  { %p4002_p8 = por %p4001_p7, %p4000_p6 }
  0x31   :  { %p4003_p9 = pnand %p4002_p8, %p3996_p5 }
  0x33   :  { %4006 = shalt.err (!%p4003_p9)
}
  0x34   :  { %51 = dma.hbm_to_vmem [thread:$0]  %s5730_s2, 4096, %s46_s29, [#allocation10], %s4036_s11, %s4036_s11, %s4037_s12  }
  0x35   :  { %s4007_s22 = scalar_lea.hbm %s5731_s3, 4096 }
  0x36   :  { %p4008_p10 = scmp.ne.s32.totalorder %s5731_s3, %s4007_s22  ;;  %p4011_p11 = scmp.lt.u32.totalorder %s4007_s22, %s5731_s3 }
  0x38   :  { %p4013_p12 = pnand %p4011_p11, %p4008_p10 }
  0x3a   :  { %4016 = shalt.err (!%p4013_p12)
}
  0x3b   :  { %s4017_s26 = scalar_lea.vmem %s4112_s8, 4096  ;;  %p4022_p0 = scmp.lt.s32.totalorder %s4112_s8, %s4112_s8 }
  0x3c   :  { %p4018_p13 = scmp.ne.s32.totalorder %s4112_s8, %s4017_s26  ;;  %p4023_p1 = scmp.lt.s32.totalorder %s4017_s26, %s4017_s26 }
  0x3e   :  { %p4024_p2 = por %p4023_p1, %p4022_p0 }
  0x40   :  { %p4025_p3 = pnand %p4024_p2, %p4018_p13 }
  0x42   :  { %4028 = shalt.err (!%p4025_p3)
}
  0x43   :  { %63 = dma.hbm_to_vmem [thread:$0]  %s5731_s3, 4096, %s4112_s8, [#allocation13], %s4036_s11, %s4036_s11, %s4037_s12  }
  0x44   :  { %4029 = dma.done.wait [#allocation8], 4096  }
  0x45   :  { %4030 = vsyncadd [#allocation8], 4294963200 }
  0x46   :  { %4031 = dma.done.wait [#allocation10], 8192  }
  0x47   :  { %4032 = vsyncadd [#allocation10], 4294959104 }
  0x48   :  { %4033 = dma.done.wait [#allocation13], 4096  }
  0x49   :  { %4034 = vsyncadd [#allocation13], 4294963200  ;;  %v5738_v0 = vmov 0   ;;  %v4151_v1 = vld [vmem:[#allocation9 + $0x4] ss:$16 sps:$4 sm:$0xff]   ;;  %v5736_v33 = vmov 0.0|0.0  }
  0x4a   :  { %411 = vmatprep.mubr.bf16.mxu0 %v5738_v0  ;;  %452 = vmatprep.mubr.bf16.mxu1 %v5738_v0  ;;  %v4153_v2 = vld [vmem:[#allocation9] ss:$16 sps:$4 sm:$0xff]   ;;  %v4156_v3 = vld [vmem:[#allocation9 + $0x24] ss:$16 sps:$4 sm:$0xff]   ;;  %v4164_v6 = vld [vmem:[#allocation9 + $0xc] ss:$16 sps:$4 sm:$0xff]  }
  0x4b   :  { %379 = vmatprep.subr.bf16.mxu0 %v4151_v1  ;;  %v4159_v4 = vld [vmem:[#allocation9 + $0x20] ss:$16 sps:$4 sm:$0xff]   ;;  %v4162_v5 = vld [vmem:[#allocation9 + $0x44] ss:$16 sps:$4 sm:$0xff]   ;;  %v4166_v7 = vld [vmem:[#allocation9 + $0x8] ss:$16 sps:$4 sm:$0xff]   ;;  %420 = vmatprep.subr.bf16.mxu1 %v4164_v6 }
  0x4c   :  { %380 = vmatpush1.bf16.msra.mxu0 %v4153_v2  ;;  %v4169_v8 = vld [vmem:[#allocation9 + $0x40] ss:$16 sps:$4 sm:$0xff]   ;;  %v4173_v9 = vld [vmem:[#allocation9 + $0x64] ss:$16 sps:$4 sm:$0xff]   ;;  %421 = vmatpush1.bf16.msra.mxu1 %v4166_v7  ;;  %v4176_v10 = vld [vmem:[#allocation9 + $0x2c] ss:$16 sps:$4 sm:$0xff]  }
  0x4d   :  { %381 = vmatprep.subr.bf16.mxu0 %v4156_v3  ;;  %v4178_v11 = vld [vmem:[#allocation9 + $0x28] ss:$16 sps:$4 sm:$0xff]   ;;  %422 = vmatprep.subr.bf16.mxu1 %v4176_v10  ;;  %v4182_v12 = vld [vmem:[#allocation9 + $0x60] ss:$16 sps:$4 sm:$0xff]   ;;  %v4184_v13 = vld [vmem:[#allocation9 + $0x84] ss:$16 sps:$4 sm:$0xff]  }
  0x4e   :  { %v4186_v14 = vld [vmem:[#allocation9 + $0x4c] ss:$16 sps:$4 sm:$0xff]   ;;  %v4190_v15 = vld [vmem:[#allocation9 + $0x48] ss:$16 sps:$4 sm:$0xff]   ;;  %v4196_v17 = vld [vmem:[#allocation9 + $0x80] ss:$16 sps:$4 sm:$0xff]  }
  0x4f   :  { %v4193_v16 = vld [vmem:[#allocation9 + $0x6c] ss:$16 sps:$4 sm:$0xff]   ;;  %v4199_v18 = vld [vmem:[#allocation9 + $0xa4] ss:$16 sps:$4 sm:$0xff]   ;;  %v4202_v19 = vld [vmem:[#allocation9 + $0x68] ss:$16 sps:$4 sm:$0xff]  }
  0x50   :  { %382 = vmatpush1.bf16.msra.mxu0 %v4159_v4  ;;  %423 = vmatpush1.bf16.msra.mxu1 %v4178_v11  ;;  %v4205_v20 = vld [vmem:[#allocation9 + $0x8c] ss:$16 sps:$4 sm:$0xff]   ;;  %v4208_v21 = vld [vmem:[#allocation9 + $0xa0] ss:$16 sps:$4 sm:$0xff]   ;;  %v4210_v22 = vld [vmem:[#allocation9 + $0xc4] ss:$16 sps:$4 sm:$0xff]  }
  0x51   :  { %383 = vmatprep.subr.bf16.mxu0 %v4162_v5  ;;  %424 = vmatprep.subr.bf16.mxu1 %v4186_v14  ;;  %v4214_v23 = vld [vmem:[#allocation9 + $0x88] ss:$16 sps:$4 sm:$0xff]   ;;  %v4216_v24 = vld [vmem:[#allocation9 + $0xc0] ss:$16 sps:$4 sm:$0xff]   ;;  %v4219_v25 = vld [vmem:[#allocation9 + $0xac] ss:$16 sps:$4 sm:$0xff]  }
  0x52   :  { %v4221_v26 = vld [vmem:[#allocation9 + $0xe4] ss:$16 sps:$4 sm:$0xff]   ;;  %v4223_v27 = vld [vmem:[#allocation9 + $0xa8] ss:$16 sps:$4 sm:$0xff]   ;;  %v4226_v28 = vld [vmem:[#allocation9 + $0xcc] ss:$16 sps:$4 sm:$0xff]  }
  0x53   :  { %v4230_v29 = vld [vmem:[#allocation9 + $0xe0] ss:$16 sps:$4 sm:$0xff]   ;;  %v4233_v30 = vld [vmem:[#allocation9 + $0xc8] ss:$16 sps:$4 sm:$0xff]   ;;  %v4236_v31 = vld [vmem:[#allocation9 + $0xec] ss:$16 sps:$4 sm:$0xff]  }
  0x54   :  { %384 = vmatpush1.bf16.msra.mxu0 %v4169_v8  ;;  %425 = vmatpush1.bf16.msra.mxu1 %v4190_v15  ;;  %v4241_v32 = vld [vmem:[#allocation9 + $0xe8] ss:$16 sps:$4 sm:$0xff]   ;;  %v4251_v34 = vld [vmem:[#allocation11 + $0x4] ss:$16 sps:$4 sm:$0xff]   ;;  %v4253_v35 = vld [vmem:[#allocation11 + $0xc] ss:$16 sps:$4 sm:$0xff]  }
  0x55   :  { %385 = vmatprep.subr.bf16.mxu0 %v4173_v9  ;;  %426 = vmatprep.subr.bf16.mxu1 %v4193_v16  ;;  %v4255_v36 = vld [vmem:[#allocation11] ss:$16 sps:$4 sm:$0xff]   ;;  %v4259_v37 = vld [vmem:[#allocation11 + $0x8] ss:$16 sps:$4 sm:$0xff]   ;;  %v4263_v38 = vld [vmem:[#allocation11 + $0x24] ss:$16 sps:$4 sm:$0xff]  }
  0x56   :  { %v4265_v39 = vld [vmem:[#allocation11 + $0x2c] ss:$16 sps:$4 sm:$0xff]   ;;  %v4267_v40 = vld [vmem:[#allocation11 + $0x20] ss:$16 sps:$4 sm:$0xff]   ;;  %v4269_v41 = vld [vmem:[#allocation11 + $0x28] ss:$16 sps:$4 sm:$0xff]  }
  0x57   :  { %v4275_v42 = vld [vmem:[#allocation11 + $0x44] ss:$16 sps:$4 sm:$0xff]   ;;  %v4277_v43 = vld [vmem:[#allocation11 + $0x4c] ss:$16 sps:$4 sm:$0xff]   ;;  %v4279_v44 = vld [vmem:[#allocation11 + $0x40] ss:$16 sps:$4 sm:$0xff]  }
  0x58   :  { %386 = vmatpush1.bf16.msra.mxu0 %v4182_v12  ;;  %427 = vmatpush1.bf16.msra.mxu1 %v4202_v19  ;;  %6003 = vst [vmem:[#allocation17_spill] sm:$0xff] %v4279_v44  ;;  %v4281_v45 = vld [vmem:[#allocation11 + $0x48] ss:$16 sps:$4 sm:$0xff]   ;;  %v4287_v46 = vld [vmem:[#allocation11 + $0x64] ss:$16 sps:$4 sm:$0xff]   ;;  %vm3185_vm0 = vcmask 7168  }
  0x59   :  { %387 = vmatprep.subr.bf16.mxu0 %v4184_v13  ;;  %428 = vmatprep.subr.bf16.mxu1 %v4205_v20  ;;  %6004 = vst [vmem:[#allocation18_spill] sm:$0xff] %v4281_v45  ;;  %6005 = vst [vmem:[#allocation19_spill] sm:$0xff] %v4287_v46  ;;  %v4289_v47 = vld [vmem:[#allocation11 + $0x6c] ss:$16 sps:$4 sm:$0xff]   ;;  %v4291_v48 = vld [vmem:[#allocation11 + $0x60] ss:$16 sps:$4 sm:$0xff]  }
  0x5a   :  { %6006 = vst [vmem:[#allocation20_spill] sm:$0xff] %v4289_v47  ;;  %6007 = vst [vmem:[#allocation21_spill] sm:$0xff] %v4291_v48  ;;  %v4293_v49 = vld [vmem:[#allocation11 + $0x68] ss:$16 sps:$4 sm:$0xff]   ;;  %v4299_v50 = vld [vmem:[#allocation11 + $0x84] ss:$16 sps:$4 sm:$0xff]  }
  0x5b   :  { %6008 = vst [vmem:[#allocation22_spill] sm:$0xff] %v4293_v49  ;;  %6009 = vst [vmem:[#allocation23_spill] sm:$0xff] %v4299_v50  ;;  %v4301_v51 = vld [vmem:[#allocation11 + $0x8c] ss:$16 sps:$4 sm:$0xff]   ;;  %v4303_v52 = vld [vmem:[#allocation11 + $0x80] ss:$16 sps:$4 sm:$0xff]  }
  0x5c   :  { %388 = vmatpush1.bf16.msra.mxu0 %v4196_v17  ;;  %429 = vmatpush1.bf16.msra.mxu1 %v4214_v23  ;;  %6010 = vst [vmem:[#allocation24_spill] sm:$0xff] %v4301_v51  ;;  %6011 = vst [vmem:[#allocation25_spill] sm:$0xff] %v4303_v52  ;;  %v4305_v53 = vld [vmem:[#allocation11 + $0x88] ss:$16 sps:$4 sm:$0xff]   ;;  %v4311_v54 = vld [vmem:[#allocation11 + $0xa4] ss:$16 sps:$4 sm:$0xff]  }
  0x5d   :  { %389 = vmatprep.subr.bf16.mxu0 %v4199_v18  ;;  %430 = vmatprep.subr.bf16.mxu1 %v4219_v25  ;;  %6012 = vst [vmem:[#allocation26_spill] sm:$0xff] %v4305_v53  ;;  %6013 = vst [vmem:[#allocation27_spill] sm:$0xff] %v4311_v54  ;;  %v4313_v55 = vld [vmem:[#allocation11 + $0xac] ss:$16 sps:$4 sm:$0xff]   ;;  %v4315_v56 = vld [vmem:[#allocation11 + $0xa0] ss:$16 sps:$4 sm:$0xff]  }
  0x5e   :  { %6014 = vst [vmem:[#allocation28_spill] sm:$0xff] %v4313_v55  ;;  %6015 = vst [vmem:[#allocation29_spill] sm:$0xff] %v4315_v56  ;;  %v4317_v57 = vld [vmem:[#allocation11 + $0xa8] ss:$16 sps:$4 sm:$0xff]   ;;  %v4319_v58 = vld [vmem:[#allocation11 + $0xc4] ss:$16 sps:$4 sm:$0xff]  }
  0x5f   :  { %6016 = vst [vmem:[#allocation30_spill] sm:$0xff] %v4317_v57  ;;  %6017 = vst [vmem:[#allocation31_spill] sm:$0xff] %v4319_v58  ;;  %v4321_v59 = vld [vmem:[#allocation11 + $0xcc] ss:$16 sps:$4 sm:$0xff]   ;;  %v4326_v60 = vld [vmem:[#allocation11 + $0xc0] ss:$16 sps:$4 sm:$0xff]  }
  0x60   :  { %390 = vmatpush1.bf16.msra.mxu0 %v4208_v21  ;;  %431 = vmatpush1.bf16.msra.mxu1 %v4223_v27  ;;  %6018 = vst [vmem:[#allocation32_spill] sm:$0xff] %v4321_v59  ;;  %6019 = vst [vmem:[#allocation33_spill] sm:$0xff] %v4326_v60  ;;  %v4330_v61 = vld [vmem:[#allocation11 + $0xc8] ss:$16 sps:$4 sm:$0xff]   ;;  %v4332_v62 = vld [vmem:[#allocation11 + $0xe4] ss:$16 sps:$4 sm:$0xff]  }
  0x61   :  { %391 = vmatprep.subr.bf16.mxu0 %v4210_v22  ;;  %432 = vmatprep.subr.bf16.mxu1 %v4226_v28  ;;  %6020 = vst [vmem:[#allocation34_spill] sm:$0xff] %v4330_v61  ;;  %6021 = vst [vmem:[#allocation35_spill] sm:$0xff] %v4332_v62  ;;  %v4335_v63 = vld [vmem:[#allocation11 + $0xec] ss:$16 sps:$4 sm:$0xff]  }
  0x62   :  { %6022 = vst [vmem:[#allocation36_spill] sm:$0xff] %v4335_v63 }
  0x64   :  { %392 = vmatpush1.bf16.msra.mxu0 %v4216_v24  ;;  %433 = vmatpush1.bf16.msra.mxu1 %v4233_v30 }
  0x65   :  { %393 = vmatprep.subr.bf16.mxu0 %v4221_v26  ;;  %434 = vmatprep.subr.bf16.mxu1 %v4236_v31 }
  0x68   :  { %394 = vmatpush1.bf16.msra.mxu0 %v4230_v29  ;;  %435 = vmatpush1.bf16.msra.mxu1 %v4241_v32 }
  0x69   :  { %650 = vmatprep.subr.bf16.mxu0 %v4251_v34  ;;  %691 = vmatprep.subr.bf16.mxu1 %v4253_v35 }
  0x6b   :  { %412 = vmatmul.mubr.bf16.vlgmr.msra.gmra.mrb[0].mxu0 %v5736_v33  ;;  %453 = vmatmul.mubr.bf16.vlgmr.msra.gmra.mrb[0].mxu1 %v5736_v33  ;;  %v4338_v33 = vld [vmem:[#allocation11 + $0xe0] ss:$16 sps:$4 sm:$0xff]  }
  0x6c   :  { %682 = vmatprep.mubr.bf16.mxu0 %v5738_v0  ;;  %723 = vmatprep.mubr.bf16.mxu1 %v5738_v0  ;;  %6023 = vst [vmem:[#allocation37_spill] sm:$0xff] %v4338_v33  ;;  %v4342_v0 = vld [vmem:[#allocation11 + $0xe8] ss:$16 sps:$4 sm:$0xff]  }
  0x6d   :  { %651 = vmatpush1.bf16.msra.mxu0 %v4255_v36  ;;  %692 = vmatpush1.bf16.msra.mxu1 %v4259_v37  ;;  %6024 = vst [vmem:[#allocation38_spill] sm:$0xff] %v4342_v0 }
  0x6e   :  { %652 = vmatprep.subr.bf16.mxu0 %v4263_v38  ;;  %693 = vmatprep.subr.bf16.mxu1 %v4265_v39 }
  0x71   :  { %653 = vmatpush1.bf16.msra.mxu0 %v4267_v40  ;;  %694 = vmatpush1.bf16.msra.mxu1 %v4269_v41 }
  0x72   :  { %654 = vmatprep.subr.bf16.mxu0 %v4275_v42  ;;  %695 = vmatprep.subr.bf16.mxu1 %v4277_v43 }
  0x75   :  { %655 = vmatpush1.bf16.msra.mxu0 %v4279_v44  ;;  %696 = vmatpush1.bf16.msra.mxu1 %v4281_v45 }
  0x76   :  { %656 = vmatprep.subr.bf16.mxu0 %v4287_v46  ;;  %697 = vmatprep.subr.bf16.mxu1 %v4289_v47 }
  0x79   :  { %657 = vmatpush1.bf16.msra.mxu0 %v4291_v48  ;;  %698 = vmatpush1.bf16.msra.mxu1 %v4293_v49  ;;  %v216_v48 = vld [vmem:[#allocation7 + $0x10] sm:$0xff] }
  0x7a   :  { %658 = vmatprep.subr.bf16.mxu0 %v4299_v50  ;;  %699 = vmatprep.subr.bf16.mxu1 %v4301_v51  ;;  %v217_v51 = vld [vmem:[#allocation7 + $0x18] sm:$0xff] }
  0x7d   :  { %659 = vmatpush1.bf16.msra.mxu0 %v4303_v52  ;;  %700 = vmatpush1.bf16.msra.mxu1 %v4305_v53 }
  0x7e   :  { %660 = vmatprep.subr.bf16.mxu0 %v4311_v54  ;;  %701 = vmatprep.subr.bf16.mxu1 %v4313_v55 }
  0x81   :  { %661 = vmatpush1.bf16.msra.mxu0 %v4315_v56  ;;  %702 = vmatpush1.bf16.msra.mxu1 %v4317_v57  ;;  %v4344_v57 = vld [vmem:[#allocation12 + $0x4] ss:$16 sps:$4 sm:$0xff]  }
  0x82   :  { %662 = vmatprep.subr.bf16.mxu0 %v4319_v58  ;;  %703 = vmatprep.subr.bf16.mxu1 %v4321_v59  ;;  %6025 = vst [vmem:[#allocation39_spill] sm:$0xff] %v4344_v57  ;;  %v4347_v58 = vld [vmem:[#allocation12 + $0xc] ss:$16 sps:$4 sm:$0xff]  }
  0x83   :  { %6026 = vst [vmem:[#allocation40_spill] sm:$0xff] %v4347_v58 }
  0x85   :  { %663 = vmatpush1.bf16.msra.mxu0 %v4326_v60  ;;  %704 = vmatpush1.bf16.msra.mxu1 %v4330_v61  ;;  %v214_v60 = vld [vmem:[#allocation7] sm:$0xff]  ;;  %v215_v61 = vld [vmem:[#allocation7 + $0x8] sm:$0xff] }
  0x86   :  { %664 = vmatprep.subr.bf16.mxu0 %v4332_v62  ;;  %705 = vmatprep.subr.bf16.mxu1 %v4335_v63 }
  0x89   :  { %665 = vmatpush1.bf16.msra.mxu0 %v4338_v33  ;;  %706 = vmatpush1.bf16.msra.mxu1 %v4342_v0 }
  0x8a   :  { %892 = vmatprep.subr.bf16.mxu0 %v4344_v57  ;;  %933 = vmatprep.subr.bf16.mxu1 %v4347_v58 }
 0x13e   :  { %v413_v59 = vpop.f32.mrb[0].mxu0  ;;  %v454_v50 = vpop.f32.mrb[0].mxu1 }
 0x13f   :  { %v461_v62 = vadd.f32 %v413_v59, %v214_v60  ;;  %v415_v56 = vpop.f32.mrb[1].mxu0  ;;  %v456_v33 = vpop.f32.mrb[1].mxu1  ;;  %v463_v47 = vadd.f32 %v454_v50, %v216_v48 }
 0x140   :  { %v462_v55 = vadd.f32 %v415_v56, %v215_v61  ;;  %v417_v54 = vpop.f32.mrb[2].mxu0  ;;  %v464_v0 = vadd.f32 %v456_v33, %v217_v51  ;;  %v458_v49 = vpop.f32.mrb[2].mxu1 }
 0x141   :  { %v3226_v53 = vmul.f32 -1.442695, %v461_v62  ;;  %v418_v52 = vpop.f32.mrb[3].mxu0  ;;  %v459_v57 = vpop.f32.mrb[3].mxu1 }
 0x142   :  { %v3227_v63 = vmul.f32 -1.442695, %v462_v55  ;;  %v3228_v58 = vmul.f32 -1.442695, %v464_v0  ;;  %v4362_v57 = vld [vmem:[#allocation12 + $0x24] ss:$16 sps:$4 sm:$0xff]  }
 0x143   :  { %3493 = vpow2.f32 %v3226_v53 }
 0x144   :  { %3495 = vpow2.f32 %v3227_v63  ;;  %v4370_v63 = vld [vmem:[#allocation12 + $0x20] ss:$16 sps:$4 sm:$0xff]  }
 0x145   :  { %3497 = vpow2.f32 %v3228_v58  ;;  %v4364_v58 = vld [vmem:[#allocation12 + $0x2c] ss:$16 sps:$4 sm:$0xff]  }
 0x146   :  { %3499 = vtanh.f32 %v463_v47  ;;  %v4358_v47 = vld [vmem:[#allocation12 + $0x8] ss:$16 sps:$4 sm:$0xff]  }
 0x14d   :  { %v3494_v46 = vpop.eup %3493 }
 0x14e   :  { %v3496_v59 = vpop.eup %3495  ;;  %v468_v60 = vadd.f32 1.0, %v3494_v46  ;;  %v4356_v46 = vld [vmem:[#allocation12] ss:$16 sps:$4 sm:$0xff]  }
 0x14f   :  { %v474_v54 = vadd.f32 1.0, %v3496_v59  ;;  %v3498_v52 = vpop.eup %3497  ;;  %v4372_v59 = vld [vmem:[#allocation12 + $0x28] ss:$16 sps:$4 sm:$0xff]  }
 0x150   :  { %3501 = vrcp.f32 %v468_v60  ;;  %v3500_v55 = vpop.eup %3499  ;;  %v481_v56 = vadd.f32 1.0, %v3498_v52  ;;  %v4376_v60 = vld [vmem:[#allocation12 + $0x44] ss:$16 sps:$4 sm:$0xff]   ;;  %v6027_v52 = vmov 0  }
 0x151   :  { %3503 = vrcp.f32 %v474_v54  ;;  %v4378_v54 = vld [vmem:[#allocation12 + $0x4c] ss:$16 sps:$4 sm:$0xff]  }
 0x152   :  { %3505 = vrcp.f32 %v481_v56  ;;  %v4390_v56 = vld [vmem:[#allocation12 + $0x64] ss:$16 sps:$4 sm:$0xff]  }
 0x153   :  { %6030 = vst [vmem:[#allocation43_spill] sm:$0xff] %v4390_v56 }
 0x15a   :  { %v3502_v53 = vpop.eup %3501 }
 0x15b   :  { %v3504_v61 = vpop.eup %3503  ;;  %v485_v62 = vmul.f32 %v3502_v53, %v3500_v55  ;;  %v4384_v55 = vld [vmem:[#allocation12 + $0x40] ss:$16 sps:$4 sm:$0xff]   ;;  %v4386_v53 = vld [vmem:[#allocation12 + $0x48] ss:$16 sps:$4 sm:$0xff]  }
 0x15c   :  { %v484_v33 = vmul.f32 0.0, %v3504_v61  ;;  %v3506_v0 = vpop.eup %3505  ;;  %6028 = vst [vmem:[#allocation41_spill] sm:$0xff] %v4384_v55  ;;  %6029 = vst [vmem:[#allocation42_spill] sm:$0xff] %v4386_v53  ;;  %v4392_v61 = vld [vmem:[#allocation12 + $0x6c] ss:$16 sps:$4 sm:$0xff]  }
 0x15d   :  { %6031 = vst [vmem:[#allocation44_spill] sm:$0xff] %v4392_v61 }
 0x15e   :  { %v4353_v49 = vadd.f32 %v485_v62, %v484_v33  ;;  %v4396_v62 = vld [vmem:[#allocation12 + $0x60] ss:$16 sps:$4 sm:$0xff]   ;;  %v4398_v33 = vld [vmem:[#allocation12 + $0x68] ss:$16 sps:$4 sm:$0xff]  }
 0x15f   :  { %6032 = vst [vmem:[#allocation45_spill] sm:$0xff] %v4396_v62  ;;  %6033 = vst [vmem:[#allocation46_spill] sm:$0xff] %v4398_v33 }
 0x160   :  { %3507 = vtanh.f32 %v4353_v49 }
 0x16a   :  { %v3508_v48 = vpop.eup %3507 }
 0x16b   :  { %v488_v50 = vmul.f32 %v3508_v48, %v3506_v0  ;;  %v4402_v0 = vld [vmem:[#allocation12 + $0x84] ss:$16 sps:$4 sm:$0xff]   ;;  %v4404_v48 = vld [vmem:[#allocation12 + $0x8c] ss:$16 sps:$4 sm:$0xff]  }
 0x16c   :  { %6034 = vst [vmem:[#allocation47_spill] sm:$0xff] %v4402_v0  ;;  %6035 = vst [vmem:[#allocation48_spill] sm:$0xff] %v4404_v48 }
 0x16d   :  { %v4360_v51 = vpack.c.bf16 %v488_v50, %v488_v50  ;;  %v4408_v50 = vld [vmem:[#allocation12 + $0x80] ss:$16 sps:$4 sm:$0xff]  }
 0x16e   :  { %6036 = vst [vmem:[#allocation49_spill] sm:$0xff] %v4408_v50 }
 0x16f   :  { %683 = vmatmul.mubr.bf16.vlgmr.msra.gmra.mrb[4].mxu0 %v4360_v51  ;;  %724 = vmatmul.mubr.bf16.vlgmr.msra.gmra.mrb[4].mxu1 %v4360_v51 }
 0x170   :  { %893 = vmatpush1.bf16.msra.mxu0 %v4356_v46  ;;  %934 = vmatpush1.bf16.msra.mxu1 %v4358_v47 }
 0x171   :  { %894 = vmatprep.subr.bf16.mxu0 %v4362_v57  ;;  %935 = vmatprep.subr.bf16.mxu1 %v4364_v58 }
 0x172   :  { %924 = vmatprep.mubr.bf16.mxu0 %v6027_v52  ;;  %965 = vmatprep.mubr.bf16.mxu1 %v6027_v52 }
 0x174   :  { %895 = vmatpush1.bf16.msra.mxu0 %v4370_v63  ;;  %936 = vmatpush1.bf16.msra.mxu1 %v4372_v59 }
 0x175   :  { %896 = vmatprep.subr.bf16.mxu0 %v4376_v60  ;;  %937 = vmatprep.subr.bf16.mxu1 %v4378_v54 }
 0x178   :  { %897 = vmatpush1.bf16.msra.mxu0 %v4384_v55  ;;  %938 = vmatpush1.bf16.msra.mxu1 %v4386_v53  ;;  %v4410_v55 = vld [vmem:[#allocation12 + $0x88] ss:$16 sps:$4 sm:$0xff]   ;;  %v4414_v53 = vld [vmem:[#allocation12 + $0xa4] ss:$16 sps:$4 sm:$0xff]  }
 0x179   :  { %898 = vmatprep.subr.bf16.mxu0 %v4390_v56  ;;  %939 = vmatprep.subr.bf16.mxu1 %v4392_v61  ;;  %6037 = vst [vmem:[#allocation50_spill] sm:$0xff] %v4410_v55  ;;  %6038 = vst [vmem:[#allocation51_spill] sm:$0xff] %v4414_v53  ;;  %v4416_v56 = vld [vmem:[#allocation12 + $0xac] ss:$16 sps:$4 sm:$0xff]   ;;  %v4420_v61 = vld [vmem:[#allocation12 + $0xa0] ss:$16 sps:$4 sm:$0xff]  }
 0x17a   :  { %6039 = vst [vmem:[#allocation52_spill] sm:$0xff] %v4416_v56  ;;  %6040 = vst [vmem:[#allocation53_spill] sm:$0xff] %v4420_v61 }
 0x17c   :  { %899 = vmatpush1.bf16.msra.mxu0 %v4396_v62  ;;  %940 = vmatpush1.bf16.msra.mxu1 %v4398_v33  ;;  %v4422_v62 = vld [vmem:[#allocation12 + $0xa8] ss:$16 sps:$4 sm:$0xff]   ;;  %v4426_v33 = vld [vmem:[#allocation12 + $0xc4] ss:$16 sps:$4 sm:$0xff]  }
 0x17d   :  { %900 = vmatprep.subr.bf16.mxu0 %v4402_v0  ;;  %941 = vmatprep.subr.bf16.mxu1 %v4404_v48  ;;  %v4428_v0 = vld [vmem:[#allocation12 + $0xcc] ss:$16 sps:$4 sm:$0xff]   ;;  %v4432_v48 = vld [vmem:[#allocation12 + $0xc0] ss:$16 sps:$4 sm:$0xff]  }
 0x17e   :  { %6041 = vst [vmem:[#allocation54_spill] sm:$0xff] %v4428_v0 }
 0x180   :  { %901 = vmatpush1.bf16.msra.mxu0 %v4408_v50  ;;  %942 = vmatpush1.bf16.msra.mxu1 %v4410_v55  ;;  %v4434_v50 = vld [vmem:[#allocation12 + $0xc8] ss:$16 sps:$4 sm:$0xff]   ;;  %v4438_v55 = vld [vmem:[#allocation12 + $0xe4] ss:$16 sps:$4 sm:$0xff]  }
 0x181   :  { %902 = vmatprep.subr.bf16.mxu0 %v4414_v53  ;;  %943 = vmatprep.subr.bf16.mxu1 %v4416_v56  ;;  %v4440_v53 = vld [vmem:[#allocation12 + $0xec] ss:$16 sps:$4 sm:$0xff]   ;;  %v4444_v56 = vld [vmem:[#allocation12 + $0xe0] ss:$16 sps:$4 sm:$0xff]  }
 0x184   :  { %903 = vmatpush1.bf16.msra.mxu0 %v4420_v61  ;;  %944 = vmatpush1.bf16.msra.mxu1 %v4422_v62  ;;  %v4446_v61 = vld [vmem:[#allocation12 + $0xe8] ss:$16 sps:$4 sm:$0xff]  }
 0x185   :  { %904 = vmatprep.subr.bf16.mxu0 %v4426_v33  ;;  %945 = vmatprep.subr.bf16.mxu1 %v4428_v0  ;;  %v6042_v0 = vmov 0.0|0.0  }
 0x188   :  { %905 = vmatpush1.bf16.msra.mxu0 %v4432_v48  ;;  %946 = vmatpush1.bf16.msra.mxu1 %v4434_v50 }
 0x189   :  { %906 = vmatprep.subr.bf16.mxu0 %v4438_v55  ;;  %947 = vmatprep.subr.bf16.mxu1 %v4440_v53 }
 0x18c   :  { %907 = vmatpush1.bf16.msra.mxu0 %v4444_v56  ;;  %948 = vmatpush1.bf16.msra.mxu1 %v4446_v61 }
 0x18d   :  { %1008 = vmatprep.subr.bf16.mxu0 %v4151_v1  ;;  %1049 = vmatprep.subr.bf16.mxu1 %v4164_v6  ;;  %v6043_v1 = vld [vmem:[#allocation19_spill] sm:$0xff]  ;;  %v6048_v6 = vld [vmem:[#allocation24_spill] sm:$0xff] }
 0x18f   :  { %925 = vmatmul.mubr.bf16.vlgmr.msra.gmra.mrb[8].mxu0 %v6042_v0  ;;  %966 = vmatmul.mubr.bf16.vlgmr.msra.gmra.mrb[8].mxu1 %v6042_v0 }
 0x190   :  { %1009 = vmatpush1.bf16.msra.mxu0 %v4153_v2  ;;  %1050 = vmatpush1.bf16.msra.mxu1 %v4166_v7  ;;  %v6044_v2 = vld [vmem:[#allocation20_spill] sm:$0xff]  ;;  %v6049_v7 = vld [vmem:[#allocation25_spill] sm:$0xff] }
 0x191   :  { %1010 = vmatprep.subr.bf16.mxu0 %v4156_v3  ;;  %1051 = vmatprep.subr.bf16.mxu1 %v4176_v10  ;;  %v6045_v3 = vld [vmem:[#allocation21_spill] sm:$0xff]  ;;  %v6052_v10 = vld [vmem:[#allocation28_spill] sm:$0xff] }
 0x192   :  { %1040 = vmatprep.mubr.bf16.mxu0 %v6027_v52  ;;  %1081 = vmatprep.mubr.bf16.mxu1 %v6027_v52 }
 0x194   :  { %1011 = vmatpush1.bf16.msra.mxu0 %v4159_v4  ;;  %1052 = vmatpush1.bf16.msra.mxu1 %v4178_v11  ;;  %v6046_v4 = vld [vmem:[#allocation22_spill] sm:$0xff]  ;;  %v6053_v11 = vld [vmem:[#allocation29_spill] sm:$0xff] }
 0x195   :  { %1012 = vmatprep.subr.bf16.mxu0 %v4162_v5  ;;  %1053 = vmatprep.subr.bf16.mxu1 %v4186_v14  ;;  %v6047_v5 = vld [vmem:[#allocation23_spill] sm:$0xff]  ;;  %v6056_v14 = vld [vmem:[#allocation32_spill] sm:$0xff] }
 0x198   :  { %1013 = vmatpush1.bf16.msra.mxu0 %v4169_v8  ;;  %1054 = vmatpush1.bf16.msra.mxu1 %v4190_v15  ;;  %v6050_v8 = vld [vmem:[#allocation26_spill] sm:$0xff]  ;;  %v6057_v15 = vld [vmem:[#allocation33_spill] sm:$0xff] }
 0x199   :  { %1014 = vmatprep.subr.bf16.mxu0 %v4173_v9  ;;  %1055 = vmatprep.subr.bf16.mxu1 %v4193_v16  ;;  %v6051_v9 = vld [vmem:[#allocation27_spill] sm:$0xff]  ;;  %v6058_v16 = vld [vmem:[#allocation34_spill] sm:$0xff] }
 0x19c   :  { %1015 = vmatpush1.bf16.msra.mxu0 %v4182_v12  ;;  %1056 = vmatpush1.bf16.msra.mxu1 %v4202_v19  ;;  %v6054_v12 = vld [vmem:[#allocation30_spill] sm:$0xff]  ;;  %v6061_v19 = vld [vmem:[#allocation37_spill] sm:$0xff] }
 0x19d   :  { %1016 = vmatprep.subr.bf16.mxu0 %v4184_v13  ;;  %1057 = vmatprep.subr.bf16.mxu1 %v4205_v20  ;;  %v6055_v13 = vld [vmem:[#allocation31_spill] sm:$0xff]  ;;  %v6062_v20 = vld [vmem:[#allocation38_spill] sm:$0xff] }
 0x1a0   :  { %1017 = vmatpush1.bf16.msra.mxu0 %v4196_v17  ;;  %1058 = vmatpush1.bf16.msra.mxu1 %v4214_v23  ;;  %v6059_v17 = vld [vmem:[#allocation35_spill] sm:$0xff] }
 0x1a1   :  { %1018 = vmatprep.subr.bf16.mxu0 %v4199_v18  ;;  %1059 = vmatprep.subr.bf16.mxu1 %v4219_v25  ;;  %v6060_v18 = vld [vmem:[#allocation36_spill] sm:$0xff] }
 0x1a4   :  { %1019 = vmatpush1.bf16.msra.mxu0 %v4208_v21  ;;  %1060 = vmatpush1.bf16.msra.mxu1 %v4223_v27  ;;  %v6063_v21 = vld [vmem:[#allocation39_spill] sm:$0xff] }
 0x1a5   :  { %1020 = vmatprep.subr.bf16.mxu0 %v4210_v22  ;;  %1061 = vmatprep.subr.bf16.mxu1 %v4226_v28  ;;  %v6064_v22 = vld [vmem:[#allocation40_spill] sm:$0xff] }
 0x1a8   :  { %1021 = vmatpush1.bf16.msra.mxu0 %v4216_v24  ;;  %1062 = vmatpush1.bf16.msra.mxu1 %v4233_v30 }
 0x1a9   :  { %1022 = vmatprep.subr.bf16.mxu0 %v4221_v26  ;;  %1063 = vmatprep.subr.bf16.mxu1 %v4236_v31 }
 0x1ac   :  { %1023 = vmatpush1.bf16.msra.mxu0 %v4230_v29  ;;  %1064 = vmatpush1.bf16.msra.mxu1 %v4241_v32 }
 0x1ad   :  { %1119 = vmatprep.subr.bf16.mxu0 %v4251_v34  ;;  %1160 = vmatprep.subr.bf16.mxu1 %v4253_v35 }
 0x1af   :  { %1041 = vmatmul.mubr.bf16.vlgmr.msra.gmra.mrb[12].mxu0 %v4360_v51  ;;  %1082 = vmatmul.mubr.bf16.vlgmr.msra.gmra.mrb[12].mxu1 %v4360_v51 }
 0x1b0   :  { %1120 = vmatpush1.bf16.msra.mxu0 %v4255_v36  ;;  %1161 = vmatpush1.bf16.msra.mxu1 %v4259_v37 }
 0x1b1   :  { %1121 = vmatprep.subr.bf16.mxu0 %v4263_v38  ;;  %1162 = vmatprep.subr.bf16.mxu1 %v4265_v39 }
 0x1b2   :  { %1151 = vmatprep.mubr.bf16.mxu0 %v6027_v52  ;;  %1192 = vmatprep.mubr.bf16.mxu1 %v6027_v52 }
 0x1b4   :  { %1122 = vmatpush1.bf16.msra.mxu0 %v4267_v40  ;;  %1163 = vmatpush1.bf16.msra.mxu1 %v4269_v41 }
 0x1b5   :  { %1123 = vmatprep.subr.bf16.mxu0 %v4275_v42  ;;  %1164 = vmatprep.subr.bf16.mxu1 %v4277_v43 }
 0x1b8   :  { %1124 = vmatpush1.bf16.msra.mxu0 %v4279_v44  ;;  %1165 = vmatpush1.bf16.msra.mxu1 %v4281_v45 }
 0x1b9   :  { %1125 = vmatprep.subr.bf16.mxu0 %v6043_v1  ;;  %1166 = vmatprep.subr.bf16.mxu1 %v6044_v2 }
 0x1bc   :  { %1126 = vmatpush1.bf16.msra.mxu0 %v6045_v3  ;;  %1167 = vmatpush1.bf16.msra.mxu1 %v6046_v4 }
 0x1bd   :  { %1127 = vmatprep.subr.bf16.mxu0 %v6047_v5  ;;  %1168 = vmatprep.subr.bf16.mxu1 %v6048_v6 }
 0x1c0   :  { %1128 = vmatpush1.bf16.msra.mxu0 %v6049_v7  ;;  %1169 = vmatpush1.bf16.msra.mxu1 %v6050_v8 }
 0x1c1   :  { %1129 = vmatprep.subr.bf16.mxu0 %v6051_v9  ;;  %1170 = vmatprep.subr.bf16.mxu1 %v6052_v10  ;;  %v189_v10 = vlaneseq }
 0x1c4   :  { %1130 = vmatpush1.bf16.msra.mxu0 %v6053_v11  ;;  %1171 = vmatpush1.bf16.msra.mxu1 %v6054_v12 }
 0x1c5   :  { %1131 = vmatprep.subr.bf16.mxu0 %v6055_v13  ;;  %1172 = vmatprep.subr.bf16.mxu1 %v6056_v14 }
 0x1c8   :  { %1132 = vmatpush1.bf16.msra.mxu0 %v6057_v15  ;;  %1173 = vmatpush1.bf16.msra.mxu1 %v6058_v16 }
 0x1c9   :  { %1133 = vmatprep.subr.bf16.mxu0 %v6059_v17  ;;  %1174 = vmatprep.subr.bf16.mxu1 %v6060_v18  ;;  %v4526_v17 = vshrl.u32 %v189_v10, 7 }
 0x1cb   :  { %v191_v18 = vsub.s32 0, %v4526_v17 }
 0x1cc   :  { %1134 = vmatpush1.bf16.msra.mxu0 %v6061_v19  ;;  %1175 = vmatpush1.bf16.msra.mxu1 %v6062_v20  ;;  %v4532_v20 = vld [vmem:[%s5732_s4] sm:$0xf] }
 0x1cd   :  { %1201 = vmatprep.subr.bf16.mxu0 %v6063_v21  ;;  %1242 = vmatprep.subr.bf16.mxu1 %v6064_v22  ;;  %v195_v22 = vsub.s32 1, %v4526_v17  ;;  %v4536_v21 = vrot.slane %v4532_v20, %v191_v18 }
 0x1cf   :  { %6065 = vst [vmem:[#allocation55_spill] sm:$0xff] %v4536_v21 }
 0x242   :  { %v684_v51 = vpop.f32.mrb[4].mxu0  ;;  %v725_v0 = vpop.f32.mrb[4].mxu1 }
 0x243   :  { %v686_v13 = vpop.f32.mrb[5].mxu0  ;;  %v727_v14 = vpop.f32.mrb[5].mxu1 }
 0x244   :  { %v688_v12 = vpop.f32.mrb[6].mxu0  ;;  %v729_v15 = vpop.f32.mrb[6].mxu1 }
 0x245   :  { %v689_v11 = vpop.f32.mrb[7].mxu0  ;;  %v730_v16 = vpop.f32.mrb[7].mxu1 }
 0x246   :  { %v4539_v11 = vrot.slane %v4532_v20, %v195_v22  ;;  %v199_v22 = vsub.s32 2, %v4526_v17 }
 0x248   :  { %6066 = vst [vmem:[#allocation56_spill] sm:$0xff] %v4539_v11 }
 0x262   :  { %v926_v19 = vpop.f32.mrb[8].mxu0  ;;  %v967_v12 = vpop.f32.mrb[8].mxu1 }
 0x263   :  { %v927_v15 = vadd.f32 %v926_v19, %v684_v51  ;;  %v968_v10 = vadd.f32 %v967_v12, %v725_v0  ;;  %v928_v16 = vpop.f32.mrb[9].mxu0  ;;  %v969_v9 = vpop.f32.mrb[9].mxu1  ;;  %v4547_v19 = vrot.slane %v4532_v20, %v199_v22  ;;  %v1005_v51 = vld [vmem:[#allocation7 + $0x28] sm:$0xff] }
 0x264   :  { %v929_v8 = vadd.f32 %v928_v16, %v686_v13  ;;  %v4541_v7 = vadd.f32 %v969_v9, %v727_v14  ;;  %v930_v6 = vpop.f32.mrb[10].mxu0  ;;  %v971_v5 = vpop.f32.mrb[10].mxu1 }
 0x265   :  { %v974_v4 = vadd.f32 %v927_v15, %v4536_v21  ;;  %v931_v3 = vpop.f32.mrb[11].mxu0  ;;  %v972_v2 = vpop.f32.mrb[11].mxu1  ;;  %6067 = vst [vmem:[#allocation57_spill] sm:$0xff] %v4547_v19  ;;  %v976_v9 = vadd.f32 %v968_v10, %v4547_v19 }
 0x266   :  { %v975_v18 = vadd.f32 %v929_v8, %v4539_v11  ;;  %v1007_v11 = vld [vmem:[#allocation7 + $0x38] sm:$0xff] }
 0x267   :  { %v3293_v1 = vmul.f32 -1.442695, %v974_v4  ;;  %v1004_v4 = vld [vmem:[#allocation7 + $0x20] sm:$0xff] }
 0x268   :  { %v3294_v45 = vmul.f32 -1.442695, %v975_v18 }
 0x269   :  { %3509 = vpow2.f32 %v3293_v1 }
 0x26a   :  { %3511 = vpow2.f32 %v3294_v45 }
 0x26b   :  { %3513 = vtanh.f32 %v976_v9 }
 0x273   :  { %v3510_v13 = vpop.eup %3509 }
 0x274   :  { %v3512_v6 = vpop.eup %3511  ;;  %v981_v5 = vadd.f32 1.0, %v3510_v13 }
 0x275   :  { %v987_v14 = vadd.f32 1.0, %v3512_v6  ;;  %v3514_v2 = vpop.eup %3513 }
 0x276   :  { %3515 = vrcp.f32 %v981_v5 }
 0x277   :  { %3517 = vrcp.f32 %v987_v14 }
 0x280   :  { %v3516_v3 = vpop.eup %3515 }
 0x281   :  { %v3518_v8 = vpop.eup %3517  ;;  %v998_v1 = vmul.f32 %v3516_v3, %v3514_v2  ;;  %v1006_v3 = vld [vmem:[#allocation7 + $0x30] sm:$0xff] }
 0x282   :  { %v997_v0 = vmul.f32 0.0, %v3518_v8  ;;  %v1042_v45 = vpop.f32.mrb[12].mxu0  ;;  %v1083_v12 = vpop.f32.mrb[12].mxu1 }
 0x283   :  { %v1090_v15 = vadd.f32 %v1042_v45, %v1004_v4  ;;  %v1044_v16 = vpop.f32.mrb[13].mxu0  ;;  %v1085_v18 = vpop.f32.mrb[13].mxu1  ;;  %v1092_v21 = vadd.f32 %v1083_v12, %v1006_v3 }
 0x284   :  { %v4550_v10 = vadd.f32 %v998_v1, %v997_v0  ;;  %v1091_v22 = vadd.f32 %v1044_v16, %v1005_v51  ;;  %v1046_v13 = vpop.f32.mrb[14].mxu0  ;;  %v1087_v9 = vpop.f32.mrb[14].mxu1  ;;  %v1093_v2 = vadd.f32 %v1085_v18, %v1007_v11  ;;  %v203_v11 = vsub.s32 3, %v4526_v17  ;;  %v6069_v17 = vld [vmem:[#allocation42_spill] sm:$0xff] }
 0x285   :  { %v3296_v6 = vmul.f32 -1.442695, %v1090_v15  ;;  %v1047_v5 = vpop.f32.mrb[15].mxu0  ;;  %v1088_v14 = vpop.f32.mrb[15].mxu1 }
 0x286   :  { %v3297_v19 = vmul.f32 -1.442695, %v1091_v22  ;;  %v3298_v8 = vmul.f32 -1.442695, %v1093_v2  ;;  %v6071_v2 = vld [vmem:[#allocation44_spill] sm:$0xff] }
 0x287   :  { %3519 = vpow2.f32 %v3296_v6 }
 0x288   :  { %3521 = vpow2.f32 %v3297_v19 }
 0x289   :  { %3523 = vpow2.f32 %v3298_v8  ;;  %v6072_v8 = vld [vmem:[#allocation45_spill] sm:$0xff] }
 0x28a   :  { %3525 = vtanh.f32 %v1092_v21 }
 0x291   :  { %v3520_v44 = vpop.eup %3519 }
 0x292   :  { %v3522_v4 = vpop.eup %3521  ;;  %v1097_v45 = vadd.f32 1.0, %v3520_v44  ;;  %v4558_v44 = vrot.slane %v4532_v20, %v203_v11  ;;  %v6070_v20 = vld [vmem:[#allocation43_spill] sm:$0xff] }
 0x293   :  { %v1103_v1 = vadd.f32 1.0, %v3522_v4  ;;  %v3524_v51 = vpop.eup %3523  ;;  %v6073_v4 = vld [vmem:[#allocation46_spill] sm:$0xff] }
 0x294   :  { %3527 = vrcp.f32 %v1097_v45  ;;  %v3526_v0 = vpop.eup %3525  ;;  %v1110_v13 = vadd.f32 1.0, %v3524_v51  ;;  %v977_v21 = vadd.f32 %v4541_v7, %v4558_v44  ;;  %v6068_v7 = vld [vmem:[#allocation41_spill] sm:$0xff]  ;;  %v6074_v45 = vld [vmem:[#allocation47_spill] sm:$0xff] }
 0x295   :  { %3529 = vrcp.f32 %v1103_v1  ;;  %v6075_v1 = vld [vmem:[#allocation48_spill] sm:$0xff]  ;;  %v6076_v51 = vld [vmem:[#allocation49_spill] sm:$0xff] }
 0x296   :  { %3531 = vrcp.f32 %v1110_v13  ;;  %v3295_v9 = vmul.f32 -1.442695, %v977_v21  ;;  %v6081_v13 = vld [vmem:[#allocation54_spill] sm:$0xff] }
 0x29e   :  { %v3528_v15 = vpop.eup %3527 }
 0x29f   :  { %v3530_v16 = vpop.eup %3529  ;;  %v1114_v22 = vmul.f32 %v3528_v15, %v3526_v0  ;;  %v6077_v0 = vld [vmem:[#allocation50_spill] sm:$0xff]  ;;  %v6078_v15 = vld [vmem:[#allocation51_spill] sm:$0xff] }
 0x2a0   :  { %v1113_v19 = vmul.f32 %v3530_v16, %v4353_v49  ;;  %v3532_v12 = vpop.eup %3531  ;;  %v6079_v16 = vld [vmem:[#allocation52_spill] sm:$0xff] }
 0x2a2   :  { %v4554_v18 = vadd.f32 %v1114_v22, %v1113_v19  ;;  %v6080_v22 = vld [vmem:[#allocation53_spill] sm:$0xff] }
 0x2a4   :  { %3533 = vtanh.f32 %v4554_v18 }
 0x2a5   :  { %3535 = vpow2.f32 %v3295_v9  ;;  %v4599_v9 = vld [vmem:[#allocation9 + $0x4] ss:$16 sps:$4 sm:$0xff]  }
 0x2a6   :  { %3537 = vtanh.f32 %v4550_v10 }
 0x2ae   :  { %v3534_v6 = vpop.eup %3533 }
 0x2af   :  { %v1117_v5 = vmul.f32 %v3534_v6, %v3532_v12  ;;  %v3536_v49 = vpop.eup %3535  ;;  %v4602_v6 = vld [vmem:[#allocation9 + $0xc] ss:$16 sps:$4 sm:$0xff]  }
 0x2b0   :  { %v994_v3 = vadd.f32 1.0, %v3536_v49  ;;  %v3538_v19 = vpop.eup %3537  ;;  %v4608_v49 = vld [vmem:[#allocation9 + $0x8] ss:$16 sps:$4 sm:$0xff]  }
 0x2b1   :  { %v4562_v14 = vpack.c.bf16 %v1117_v5, %v1117_v5  ;;  %v4605_v5 = vld [vmem:[#allocation9] ss:$16 sps:$4 sm:$0xff]   ;;  %6082 = vst [vmem:[#allocation41_spill] sm:$0xff] %v4608_v49 }
 0x2b2   :  { %3539 = vrcp.f32 %v994_v3  ;;  %v4611_v3 = vld [vmem:[#allocation9 + $0x24] ss:$16 sps:$4 sm:$0xff]  }
 0x2b3   :  { %1152 = vmatmul.mubr.bf16.vlgmr.msra.gmra.mrb[16].mxu0 %v4562_v14  ;;  %1193 = vmatmul.mubr.bf16.vlgmr.msra.gmra.mrb[16].mxu1 %v4562_v14  ;;  %6083 = vst [vmem:[#allocation42_spill] sm:$0xff] %v4611_v3 }
 0x2b4   :  { %1202 = vmatpush1.bf16.msra.mxu0 %v4356_v46  ;;  %1243 = vmatpush1.bf16.msra.mxu1 %v4358_v47 }
 0x2b5   :  { %1203 = vmatprep.subr.bf16.mxu0 %v4362_v57  ;;  %1244 = vmatprep.subr.bf16.mxu1 %v4364_v58 }
 0x2b6   :  { %1233 = vmatprep.mubr.bf16.mxu0 %v6027_v52  ;;  %1274 = vmatprep.mubr.bf16.mxu1 %v6027_v52 }
 0x2b8   :  { %1204 = vmatpush1.bf16.msra.mxu0 %v4370_v63  ;;  %1245 = vmatpush1.bf16.msra.mxu1 %v4372_v59 }
 0x2b9   :  { %1205 = vmatprep.subr.bf16.mxu0 %v4376_v60  ;;  %1246 = vmatprep.subr.bf16.mxu1 %v4378_v54 }
 0x2bc   :  { %1206 = vmatpush1.bf16.msra.mxu0 %v6068_v7  ;;  %1247 = vmatpush1.bf16.msra.mxu1 %v6069_v17  ;;  %v3540_v11 = vpop.eup %3539 }
 0x2bd   :  { %1207 = vmatprep.subr.bf16.mxu0 %v6070_v20  ;;  %1248 = vmatprep.subr.bf16.mxu1 %v6071_v2  ;;  %v1001_v21 = vmul.f32 %v3540_v11, %v3538_v19  ;;  %v4614_v19 = vld [vmem:[#allocation9 + $0x2c] ss:$16 sps:$4 sm:$0xff]   ;;  %v4619_v11 = vld [vmem:[#allocation9 + $0x20] ss:$16 sps:$4 sm:$0xff]  }
 0x2be   :  { %6084 = vst [vmem:[#allocation43_spill] sm:$0xff] %v4614_v19  ;;  %6085 = vst [vmem:[#allocation44_spill] sm:$0xff] %v4619_v11 }
 0x2bf   :  { %v1002_v12 = vpack.c.bf16 %v1001_v21, %v1001_v21  ;;  %v4622_v21 = vld [vmem:[#allocation9 + $0x28] ss:$16 sps:$4 sm:$0xff]  }
 0x2c0   :  { %1208 = vmatpush1.bf16.msra.mxu0 %v6072_v8  ;;  %1249 = vmatpush1.bf16.msra.mxu1 %v6073_v4  ;;  %6086 = vst [vmem:[#allocation45_spill] sm:$0xff] %v4622_v21 }
 0x2c1   :  { %1209 = vmatprep.subr.bf16.mxu0 %v6074_v45  ;;  %1250 = vmatprep.subr.bf16.mxu1 %v6075_v1 }
 0x2c4   :  { %1210 = vmatpush1.bf16.msra.mxu0 %v6076_v51  ;;  %1251 = vmatpush1.bf16.msra.mxu1 %v6077_v0 }
 0x2c5   :  { %1211 = vmatprep.subr.bf16.mxu0 %v6078_v15  ;;  %1252 = vmatprep.subr.bf16.mxu1 %v6079_v16 }
 0x2c8   :  { %1212 = vmatpush1.bf16.msra.mxu0 %v6080_v22  ;;  %1253 = vmatpush1.bf16.msra.mxu1 %v4422_v62 }
 0x2c9   :  { %1213 = vmatprep.subr.bf16.mxu0 %v4426_v33  ;;  %1254 = vmatprep.subr.bf16.mxu1 %v6081_v13 }
 0x2cc   :  { %1214 = vmatpush1.bf16.msra.mxu0 %v4432_v48  ;;  %1255 = vmatpush1.bf16.msra.mxu1 %v4434_v50 }
 0x2cd   :  { %1215 = vmatprep.subr.bf16.mxu0 %v4438_v55  ;;  %1256 = vmatprep.subr.bf16.mxu1 %v4440_v53 }
 0x2d0   :  { %1216 = vmatpush1.bf16.msra.mxu0 %v4444_v56  ;;  %1257 = vmatpush1.bf16.msra.mxu1 %v4446_v61 }
 0x2d1   :  { %1317 = vmatprep.subr.bf16.mxu0 %v4599_v9  ;;  %1358 = vmatprep.subr.bf16.mxu1 %v4602_v6 }
 0x2d3   :  { %1234 = vmatmul.mubr.bf16.vlgmr.msra.gmra.mrb[20].mxu0 %v1002_v12  ;;  %1275 = vmatmul.mubr.bf16.vlgmr.msra.gmra.mrb[20].mxu1 %v1002_v12  ;;  %v4625_v12 = vld [vmem:[#allocation9 + $0x44] ss:$16 sps:$4 sm:$0xff]  }
 0x2d4   :  { %1318 = vmatpush1.bf16.msra.mxu0 %v4605_v5  ;;  %1359 = vmatpush1.bf16.msra.mxu1 %v4608_v49  ;;  %6087 = vst [vmem:[#allocation46_spill] sm:$0xff] %v4625_v12  ;;  %v4634_v49 = vld [vmem:[#allocation9 + $0x48] ss:$16 sps:$4 sm:$0xff]  }
 0x2d5   :  { %1319 = vmatprep.subr.bf16.mxu0 %v4611_v3  ;;  %1360 = vmatprep.subr.bf16.mxu1 %v4614_v19  ;;  %v4628_v3 = vld [vmem:[#allocation9 + $0x4c] ss:$16 sps:$4 sm:$0xff]   ;;  %v4631_v19 = vld [vmem:[#allocation9 + $0x40] ss:$16 sps:$4 sm:$0xff]   ;;  %6090 = vst [vmem:[#allocation49_spill] sm:$0xff] %v4634_v49 }
 0x2d6   :  { %1349 = vmatprep.mubr.bf16.mxu0 %v6027_v52  ;;  %1390 = vmatprep.mubr.bf16.mxu1 %v6027_v52  ;;  %6088 = vst [vmem:[#allocation47_spill] sm:$0xff] %v4628_v3  ;;  %6089 = vst [vmem:[#allocation48_spill] sm:$0xff] %v4631_v19 }
 0x2d8   :  { %1320 = vmatpush1.bf16.msra.mxu0 %v4619_v11  ;;  %1361 = vmatpush1.bf16.msra.mxu1 %v4622_v21  ;;  %v4637_v11 = vld [vmem:[#allocation9 + $0x64] ss:$16 sps:$4 sm:$0xff]   ;;  %v4640_v21 = vld [vmem:[#allocation9 + $0x6c] ss:$16 sps:$4 sm:$0xff]  }
 0x2d9   :  { %1321 = vmatprep.subr.bf16.mxu0 %v4625_v12  ;;  %1362 = vmatprep.subr.bf16.mxu1 %v4628_v3  ;;  %6091 = vst [vmem:[#allocation50_spill] sm:$0xff] %v4637_v11  ;;  %6092 = vst [vmem:[#allocation51_spill] sm:$0xff] %v4640_v21  ;;  %v4643_v12 = vld [vmem:[#allocation9 + $0x60] ss:$16 sps:$4 sm:$0xff]   ;;  %v4646_v3 = vld [vmem:[#allocation9 + $0x68] ss:$16 sps:$4 sm:$0xff]  }
 0x2da   :  { %6093 = vst [vmem:[#allocation52_spill] sm:$0xff] %v4646_v3 }
 0x2dc   :  { %1322 = vmatpush1.bf16.msra.mxu0 %v4631_v19  ;;  %1363 = vmatpush1.bf16.msra.mxu1 %v4634_v49  ;;  %v4649_v19 = vld [vmem:[#allocation9 + $0x84] ss:$16 sps:$4 sm:$0xff]   ;;  %v4652_v49 = vld [vmem:[#allocation9 + $0x8c] ss:$16 sps:$4 sm:$0xff]  }
 0x2dd   :  { %1323 = vmatprep.subr.bf16.mxu0 %v4637_v11  ;;  %1364 = vmatprep.subr.bf16.mxu1 %v4640_v21  ;;  %6094 = vst [vmem:[#allocation53_spill] sm:$0xff] %v4649_v19  ;;  %v4655_v11 = vld [vmem:[#allocation9 + $0x80] ss:$16 sps:$4 sm:$0xff]   ;;  %v4659_v21 = vld [vmem:[#allocation9 + $0xa4] ss:$16 sps:$4 sm:$0xff]  }
 0x2e0   :  { %1324 = vmatpush1.bf16.msra.mxu0 %v4643_v12  ;;  %1365 = vmatpush1.bf16.msra.mxu1 %v4646_v3  ;;  %v4663_v3 = vld [vmem:[#allocation9 + $0xa0] ss:$16 sps:$4 sm:$0xff]  }
 0x2e1   :  { %1325 = vmatprep.subr.bf16.mxu0 %v4649_v19  ;;  %1366 = vmatprep.subr.bf16.mxu1 %v4652_v49  ;;  %6095 = vst [vmem:[#allocation54_spill] sm:$0xff] %v4663_v3  ;;  %v4667_v19 = vld [vmem:[#allocation9 + $0xc4] ss:$16 sps:$4 sm:$0xff]  }
 0x2e2   :  { %6096 = vst [vmem:[#allocation58_spill] sm:$0xff] %v4667_v19 }
 0x2e4   :  { %1326 = vmatpush1.bf16.msra.mxu0 %v4655_v11  ;;  %1367 = vmatpush1.bf16.msra.mxu1 %v4214_v23  ;;  %v6097_v23 = vld [vmem:[#allocation17_spill] sm:$0xff] }
 0x2e5   :  { %1327 = vmatprep.subr.bf16.mxu0 %v4659_v21  ;;  %1368 = vmatprep.subr.bf16.mxu1 %v4219_v25  ;;  %v6099_v25 = vld [vmem:[#allocation19_spill] sm:$0xff] }
 0x2e8   :  { %1328 = vmatpush1.bf16.msra.mxu0 %v4663_v3  ;;  %1369 = vmatpush1.bf16.msra.mxu1 %v4223_v27  ;;  %v6101_v27 = vld [vmem:[#allocation21_spill] sm:$0xff]  ;;  %v6122_v3 = vld [vmem:[#allocation56_spill] sm:$0xff] }
 0x2e9   :  { %1329 = vmatprep.subr.bf16.mxu0 %v4667_v19  ;;  %1370 = vmatprep.subr.bf16.mxu1 %v4226_v28  ;;  %v6102_v28 = vld [vmem:[#allocation22_spill] sm:$0xff] }
 0x2ec   :  { %1330 = vmatpush1.bf16.msra.mxu0 %v4216_v24  ;;  %1371 = vmatpush1.bf16.msra.mxu1 %v4233_v30  ;;  %v6098_v24 = vld [vmem:[#allocation18_spill] sm:$0xff]  ;;  %v6104_v30 = vld [vmem:[#allocation24_spill] sm:$0xff] }
 0x2ed   :  { %1331 = vmatprep.subr.bf16.mxu0 %v4221_v26  ;;  %1372 = vmatprep.subr.bf16.mxu1 %v4236_v31  ;;  %v6100_v26 = vld [vmem:[#allocation20_spill] sm:$0xff]  ;;  %v6105_v31 = vld [vmem:[#allocation25_spill] sm:$0xff] }
 0x2f0   :  { %1332 = vmatpush1.bf16.msra.mxu0 %v4230_v29  ;;  %1373 = vmatpush1.bf16.msra.mxu1 %v4241_v32  ;;  %v6103_v29 = vld [vmem:[#allocation23_spill] sm:$0xff]  ;;  %v6106_v32 = vld [vmem:[#allocation26_spill] sm:$0xff] }
 0x2f1   :  { %1428 = vmatprep.subr.bf16.mxu0 %v4251_v34  ;;  %1469 = vmatprep.subr.bf16.mxu1 %v4253_v35  ;;  %v6107_v34 = vld [vmem:[#allocation27_spill] sm:$0xff]  ;;  %v6108_v35 = vld [vmem:[#allocation28_spill] sm:$0xff] }
 0x2f3   :  { %1350 = vmatmul.mubr.bf16.vlgmr.msra.gmra.mrb[24].mxu0 %v4562_v14  ;;  %1391 = vmatmul.mubr.bf16.vlgmr.msra.gmra.mrb[24].mxu1 %v4562_v14  ;;  %v6117_v14 = vld [vmem:[#allocation37_spill] sm:$0xff] }
 0x2f4   :  { %1429 = vmatpush1.bf16.msra.mxu0 %v4255_v36  ;;  %1470 = vmatpush1.bf16.msra.mxu1 %v4259_v37  ;;  %v6109_v36 = vld [vmem:[#allocation29_spill] sm:$0xff]  ;;  %v6110_v37 = vld [vmem:[#allocation30_spill] sm:$0xff] }
 0x2f5   :  { %1430 = vmatprep.subr.bf16.mxu0 %v4263_v38  ;;  %1471 = vmatprep.subr.bf16.mxu1 %v4265_v39  ;;  %v6111_v38 = vld [vmem:[#allocation31_spill] sm:$0xff]  ;;  %v6112_v39 = vld [vmem:[#allocation32_spill] sm:$0xff] }
 0x2f6   :  { %1460 = vmatprep.mubr.bf16.mxu0 %v6027_v52  ;;  %1501 = vmatprep.mubr.bf16.mxu1 %v6027_v52 }
 0x2f8   :  { %1431 = vmatpush1.bf16.msra.mxu0 %v4267_v40  ;;  %1472 = vmatpush1.bf16.msra.mxu1 %v4269_v41  ;;  %v6113_v40 = vld [vmem:[#allocation33_spill] sm:$0xff]  ;;  %v6114_v41 = vld [vmem:[#allocation34_spill] sm:$0xff] }
 0x2f9   :  { %1432 = vmatprep.subr.bf16.mxu0 %v4275_v42  ;;  %1473 = vmatprep.subr.bf16.mxu1 %v4277_v43  ;;  %v6115_v42 = vld [vmem:[#allocation35_spill] sm:$0xff]  ;;  %v6116_v43 = vld [vmem:[#allocation36_spill] sm:$0xff] }
 0x2fc   :  { %1433 = vmatpush1.bf16.msra.mxu0 %v6097_v23  ;;  %1474 = vmatpush1.bf16.msra.mxu1 %v6098_v24  ;;  %v6118_v23 = vld [vmem:[#allocation38_spill] sm:$0xff]  ;;  %v6119_v24 = vld [vmem:[#allocation39_spill] sm:$0xff] }
 0x2fd   :  { %1434 = vmatprep.subr.bf16.mxu0 %v6099_v25  ;;  %1475 = vmatprep.subr.bf16.mxu1 %v6100_v26  ;;  %v6120_v25 = vld [vmem:[#allocation40_spill] sm:$0xff] }
 0x300   :  { %1435 = vmatpush1.bf16.msra.mxu0 %v6101_v27  ;;  %1476 = vmatpush1.bf16.msra.mxu1 %v6102_v28 }
 0x301   :  { %1436 = vmatprep.subr.bf16.mxu0 %v6103_v29  ;;  %1477 = vmatprep.subr.bf16.mxu1 %v6104_v30 }
 0x304   :  { %1437 = vmatpush1.bf16.msra.mxu0 %v6105_v31  ;;  %1478 = vmatpush1.bf16.msra.mxu1 %v6106_v32 }
 0x305   :  { %1438 = vmatprep.subr.bf16.mxu0 %v6107_v34  ;;  %1479 = vmatprep.subr.bf16.mxu1 %v6108_v35 }
 0x308   :  { %1439 = vmatpush1.bf16.msra.mxu0 %v6109_v36  ;;  %1480 = vmatpush1.bf16.msra.mxu1 %v6110_v37 }
 0x309   :  { %1440 = vmatprep.subr.bf16.mxu0 %v6111_v38  ;;  %1481 = vmatprep.subr.bf16.mxu1 %v6112_v39 }
 0x30c   :  { %1441 = vmatpush1.bf16.msra.mxu0 %v6113_v40  ;;  %1482 = vmatpush1.bf16.msra.mxu1 %v6114_v41 }
 0x30d   :  { %1442 = vmatprep.subr.bf16.mxu0 %v6115_v42  ;;  %1483 = vmatprep.subr.bf16.mxu1 %v6116_v43 }
 0x310   :  { %1443 = vmatpush1.bf16.msra.mxu0 %v6117_v14  ;;  %1484 = vmatpush1.bf16.msra.mxu1 %v6118_v23  ;;  %v6121_v23 = vld [vmem:[#allocation55_spill] sm:$0xff] }
 0x311   :  { %1510 = vmatprep.subr.bf16.mxu0 %v6119_v24  ;;  %1551 = vmatprep.subr.bf16.mxu1 %v6120_v25 }
 0x386   :  { %v1153_v26 = vpop.f32.mrb[16].mxu0  ;;  %v1194_v27 = vpop.f32.mrb[16].mxu1 }
 0x387   :  { %v1155_v28 = vpop.f32.mrb[17].mxu0  ;;  %v1196_v29 = vpop.f32.mrb[17].mxu1 }
 0x388   :  { %v1157_v30 = vpop.f32.mrb[18].mxu0  ;;  %v1198_v31 = vpop.f32.mrb[18].mxu1 }
 0x389   :  { %v1158_v32 = vpop.f32.mrb[19].mxu0  ;;  %v1199_v34 = vpop.f32.mrb[19].mxu1 }
 0x38a   :  { %v6123_v34 = vld [vmem:[#allocation57_spill] sm:$0xff] }
 0x3a6   :  { %v1235_v35 = vpop.f32.mrb[20].mxu0  ;;  %v1276_v36 = vpop.f32.mrb[20].mxu1 }
 0x3a7   :  { %v1236_v37 = vadd.f32 %v1235_v35, %v1153_v26  ;;  %v1277_v38 = vadd.f32 %v1276_v36, %v1194_v27  ;;  %v1237_v39 = vpop.f32.mrb[21].mxu0  ;;  %v1278_v40 = vpop.f32.mrb[21].mxu1 }
 0x3a8   :  { %v1238_v41 = vadd.f32 %v1237_v39, %v1155_v28  ;;  %v4715_v42 = vadd.f32 %v1278_v40, %v1196_v29  ;;  %v1239_v43 = vpop.f32.mrb[22].mxu0  ;;  %v1280_v14 = vpop.f32.mrb[22].mxu1 }
 0x3a9   :  { %v1283_v24 = vadd.f32 %v1236_v37, %v6121_v23  ;;  %v1240_v25 = vpop.f32.mrb[23].mxu0  ;;  %v1281_v19 = vpop.f32.mrb[23].mxu1  ;;  %v1285_v26 = vadd.f32 %v1277_v38, %v6123_v34  ;;  %v1313_v37 = vld [vmem:[#allocation7 + $0x40] sm:$0xff]  ;;  %v1314_v43 = vld [vmem:[#allocation7 + $0x48] sm:$0xff] }
 0x3aa   :  { %v1284_v30 = vadd.f32 %v1238_v41, %v6122_v3  ;;  %v1316_v3 = vld [vmem:[#allocation7 + $0x58] sm:$0xff] }
 0x3ab   :  { %v3299_v31 = vmul.f32 -1.442695, %v1283_v24 }
 0x3ac   :  { %v3300_v32 = vmul.f32 -1.442695, %v1284_v30 }
 0x3ad   :  { %3541 = vpow2.f32 %v3299_v31 }
 0x3ae   :  { %3543 = vpow2.f32 %v3300_v32 }
 0x3af   :  { %3545 = vtanh.f32 %v1285_v26 }
 0x3b7   :  { %v3542_v27 = vpop.eup %3541 }
 0x3b8   :  { %v3544_v35 = vpop.eup %3543  ;;  %v1290_v36 = vadd.f32 1.0, %v3542_v27 }
 0x3b9   :  { %v1296_v28 = vadd.f32 1.0, %v3544_v35  ;;  %v3546_v29 = vpop.eup %3545 }
 0x3ba   :  { %3547 = vrcp.f32 %v1290_v36 }
 0x3bb   :  { %3549 = vrcp.f32 %v1296_v28 }
 0x3c4   :  { %v3548_v39 = vpop.eup %3547 }
 0x3c5   :  { %v3550_v40 = vpop.eup %3549  ;;  %v1307_v19 = vmul.f32 %v3548_v39, %v3546_v29  ;;  %v1315_v39 = vld [vmem:[#allocation7 + $0x50] sm:$0xff] }
 0x3c6   :  { %v1306_v41 = vmul.f32 %v3550_v40, %v4550_v10  ;;  %v1351_v14 = vpop.f32.mrb[24].mxu0  ;;  %v1392_v24 = vpop.f32.mrb[24].mxu1 }
 0x3c7   :  { %v1399_v25 = vadd.f32 %v1351_v14, %v1313_v37  ;;  %v1353_v30 = vpop.f32.mrb[25].mxu0  ;;  %v1394_v38 = vpop.f32.mrb[25].mxu1  ;;  %v1401_v40 = vadd.f32 %v1392_v24, %v1315_v39  ;;  %v4831_v39 = vld [vmem:[#allocation11 + $0x8] ss:$16 sps:$4 sm:$0xff]  }
 0x3c8   :  { %v4721_v31 = vadd.f32 %v1307_v19, %v1306_v41  ;;  %v1400_v32 = vadd.f32 %v1353_v30, %v1314_v43  ;;  %v1355_v26 = vpop.f32.mrb[26].mxu0  ;;  %v1396_v27 = vpop.f32.mrb[26].mxu1  ;;  %v1402_v29 = vadd.f32 %v1394_v38, %v1316_v3 }
 0x3c9   :  { %v3302_v35 = vmul.f32 -1.442695, %v1399_v25  ;;  %v1356_v36 = vpop.f32.mrb[27].mxu0  ;;  %v1397_v28 = vpop.f32.mrb[27].mxu1 }
 0x3ca   :  { %v3303_v34 = vmul.f32 -1.442695, %v1400_v32  ;;  %v3304_v10 = vmul.f32 -1.442695, %v1402_v29  ;;  %v4823_v28 = vld [vmem:[#allocation11 + $0xc] ss:$16 sps:$4 sm:$0xff]  }
 0x3cb   :  { %3551 = vpow2.f32 %v3302_v35  ;;  %v4828_v29 = vld [vmem:[#allocation11] ss:$16 sps:$4 sm:$0xff]  }
 0x3cc   :  { %3553 = vpow2.f32 %v3303_v34 }
 0x3cd   :  { %3555 = vpow2.f32 %v3304_v10  ;;  %v4834_v10 = vld [vmem:[#allocation11 + $0x24] ss:$16 sps:$4 sm:$0xff]  }
 0x3ce   :  { %3557 = vtanh.f32 %v1401_v40  ;;  %v4837_v40 = vld [vmem:[#allocation11 + $0x2c] ss:$16 sps:$4 sm:$0xff]  }
 0x3cf   :  { %6139 = vst [vmem:[#allocation17_spill] sm:$0xff] %v4837_v40 }
 0x3d5   :  { %v3552_v23 = vpop.eup %3551 }
 0x3d6   :  { %v3554_v37 = vpop.eup %3553  ;;  %v1406_v14 = vadd.f32 1.0, %v3552_v23  ;;  %v1286_v23 = vadd.f32 %v4715_v42, %v4558_v44  ;;  %v4820_v42 = vld [vmem:[#allocation11 + $0x4] ss:$16 sps:$4 sm:$0xff]  }
 0x3d7   :  { %v1412_v19 = vadd.f32 1.0, %v3554_v37  ;;  %v3556_v43 = vpop.eup %3555  ;;  %v4842_v37 = vld [vmem:[#allocation11 + $0x20] ss:$16 sps:$4 sm:$0xff]  }
 0x3d8   :  { %3559 = vrcp.f32 %v1406_v14  ;;  %v3558_v41 = vpop.eup %3557  ;;  %v1419_v26 = vadd.f32 1.0, %v3556_v43  ;;  %v3301_v38 = vmul.f32 -1.442695, %v1286_v23  ;;  %6140 = vst [vmem:[#allocation18_spill] sm:$0xff] %v4842_v37  ;;  %v4845_v14 = vld [vmem:[#allocation11 + $0x28] ss:$16 sps:$4 sm:$0xff]  }
 0x3d9   :  { %3561 = vrcp.f32 %v1412_v19  ;;  %6141 = vst [vmem:[#allocation19_spill] sm:$0xff] %v4845_v14  ;;  %v4848_v19 = vld [vmem:[#allocation11 + $0x44] ss:$16 sps:$4 sm:$0xff]   ;;  %v4851_v43 = vld [vmem:[#allocation11 + $0x4c] ss:$16 sps:$4 sm:$0xff]  }
 0x3da   :  { %3563 = vrcp.f32 %v1419_v26  ;;  %6142 = vst [vmem:[#allocation20_spill] sm:$0xff] %v4848_v19  ;;  %6143 = vst [vmem:[#allocation21_spill] sm:$0xff] %v4851_v43  ;;  %v4866_v26 = vld [vmem:[#allocation11 + $0x60] ss:$16 sps:$4 sm:$0xff]   ;;  %v4872_v23 = vld [vmem:[#allocation11 + $0x84] ss:$16 sps:$4 sm:$0xff]  }
 0x3db   :  { %6148 = vst [vmem:[#allocation26_spill] sm:$0xff] %v4866_v26  ;;  %6150 = vst [vmem:[#allocation28_spill] sm:$0xff] %v4872_v23 }
 0x3e2   :  { %v3560_v25 = vpop.eup %3559 }
 0x3e3   :  { %v3562_v30 = vpop.eup %3561  ;;  %v1423_v32 = vmul.f32 %v3560_v25, %v3558_v41  ;;  %v4854_v41 = vld [vmem:[#allocation11 + $0x40] ss:$16 sps:$4 sm:$0xff]   ;;  %v4857_v25 = vld [vmem:[#allocation11 + $0x48] ss:$16 sps:$4 sm:$0xff]  }
 0x3e4   :  { %v1422_v34 = vmul.f32 %v3562_v30, %v4554_v18  ;;  %v3564_v24 = vpop.eup %3563  ;;  %6144 = vst [vmem:[#allocation22_spill] sm:$0xff] %v4854_v41  ;;  %6145 = vst [vmem:[#allocation23_spill] sm:$0xff] %v4857_v25  ;;  %v4860_v30 = vld [vmem:[#allocation11 + $0x64] ss:$16 sps:$4 sm:$0xff]  }
 0x3e5   :  { %6146 = vst [vmem:[#allocation24_spill] sm:$0xff] %v4860_v30 }
 0x3e6   :  { %v4724_v3 = vadd.f32 %v1423_v32, %v1422_v34  ;;  %v4863_v32 = vld [vmem:[#allocation11 + $0x6c] ss:$16 sps:$4 sm:$0xff]   ;;  %v4869_v34 = vld [vmem:[#allocation11 + $0x68] ss:$16 sps:$4 sm:$0xff]  }
 0x3e7   :  { %6147 = vst [vmem:[#allocation25_spill] sm:$0xff] %v4863_v32  ;;  %6149 = vst [vmem:[#allocation27_spill] sm:$0xff] %v4869_v34 }
 0x3e8   :  { %3565 = vtanh.f32 %v4724_v3 }
 0x3e9   :  { %3567 = vpow2.f32 %v3301_v38  ;;  %v4878_v38 = vld [vmem:[#allocation11 + $0x80] ss:$16 sps:$4 sm:$0xff]  }
 0x3ea   :  { %3569 = vtanh.f32 %v4721_v31  ;;  %6152 = vst [vmem:[#allocation30_spill] sm:$0xff] %v4878_v38 }
 0x3f2   :  { %v3566_v27 = vpop.eup %3565 }
 0x3f3   :  { %v1426_v35 = vmul.f32 %v3566_v27, %v3564_v24  ;;  %v3568_v18 = vpop.eup %3567  ;;  %v4875_v24 = vld [vmem:[#allocation11 + $0x8c] ss:$16 sps:$4 sm:$0xff]   ;;  %v4881_v27 = vld [vmem:[#allocation11 + $0x88] ss:$16 sps:$4 sm:$0xff]  }
 0x3f4   :  { %6151 = vst [vmem:[#allocation29_spill] sm:$0xff] %v4875_v24  ;;  %6153 = vst [vmem:[#allocation31_spill] sm:$0xff] %v4881_v27 }
 0x3f5   :  { %v4729_v36 = vpack.c.bf16 %v1426_v35, %v1426_v35  ;;  %v4884_v35 = vld [vmem:[#allocation11 + $0xa4] ss:$16 sps:$4 sm:$0xff]  }
 0x3f6   :  { %6154 = vst [vmem:[#allocation32_spill] sm:$0xff] %v4884_v35 }
 0x3f7   :  { %1461 = vmatmul.mubr.bf16.vlgmr.msra.gmra.mrb[28].mxu0 %v4729_v36  ;;  %1502 = vmatmul.mubr.bf16.vlgmr.msra.gmra.mrb[28].mxu1 %v4729_v36 }
 0x3f8   :  { %1511 = vmatpush1.bf16.msra.mxu0 %v4356_v46  ;;  %1552 = vmatpush1.bf16.msra.mxu1 %v4358_v47  ;;  %v1303_v46 = vadd.f32 1.0, %v3568_v18  ;;  %v3570_v47 = vpop.eup %3569  ;;  %v4890_v18 = vld [vmem:[#allocation11 + $0xa0] ss:$16 sps:$4 sm:$0xff]  }
 0x3f9   :  { %1512 = vmatprep.subr.bf16.mxu0 %v4362_v57  ;;  %1553 = vmatprep.subr.bf16.mxu1 %v4364_v58  ;;  %6156 = vst [vmem:[#allocation34_spill] sm:$0xff] %v4890_v18 }
 0x3fa   :  { %1542 = vmatprep.mubr.bf16.mxu0 %v6027_v52  ;;  %1583 = vmatprep.mubr.bf16.mxu1 %v6027_v52  ;;  %3571 = vrcp.f32 %v1303_v46  ;;  %v4893_v46 = vld [vmem:[#allocation11 + $0xa8] ss:$16 sps:$4 sm:$0xff]  }
 0x3fb   :  { %6157 = vst [vmem:[#allocation35_spill] sm:$0xff] %v4893_v46 }
 0x3fc   :  { %1513 = vmatpush1.bf16.msra.mxu0 %v4370_v63  ;;  %1554 = vmatpush1.bf16.msra.mxu1 %v4372_v59  ;;  %v6124_v59 = vld [vmem:[#allocation41_spill] sm:$0xff] }
 0x3fd   :  { %1514 = vmatprep.subr.bf16.mxu0 %v4376_v60  ;;  %1555 = vmatprep.subr.bf16.mxu1 %v4378_v54  ;;  %v6125_v60 = vld [vmem:[#allocation42_spill] sm:$0xff]  ;;  %v6126_v54 = vld [vmem:[#allocation43_spill] sm:$0xff] }
 0x400   :  { %1515 = vmatpush1.bf16.msra.mxu0 %v6068_v7  ;;  %1556 = vmatpush1.bf16.msra.mxu1 %v6069_v17  ;;  %v6135_v7 = vld [vmem:[#allocation52_spill] sm:$0xff]  ;;  %v6136_v17 = vld [vmem:[#allocation53_spill] sm:$0xff] }
 0x401   :  { %1516 = vmatprep.subr.bf16.mxu0 %v6070_v20  ;;  %1557 = vmatprep.subr.bf16.mxu1 %v6071_v2  ;;  %v4787_v20 = vld [vmem:[#allocation9 + $0x88] ss:$16 sps:$4 sm:$0xff]   ;;  %v4791_v2 = vld [vmem:[#allocation9 + $0xac] ss:$16 sps:$4 sm:$0xff]  }
 0x404   :  { %1517 = vmatpush1.bf16.msra.mxu0 %v6072_v8  ;;  %1558 = vmatpush1.bf16.msra.mxu1 %v6073_v4  ;;  %v3572_v57 = vpop.eup %3571  ;;  %v6137_v8 = vld [vmem:[#allocation54_spill] sm:$0xff] }
 0x405   :  { %1518 = vmatprep.subr.bf16.mxu0 %v6074_v45  ;;  %1559 = vmatprep.subr.bf16.mxu1 %v6075_v1  ;;  %v1310_v58 = vmul.f32 %v3572_v57, %v3570_v47  ;;  %v4795_v4 = vld [vmem:[#allocation9 + $0xa8] ss:$16 sps:$4 sm:$0xff]   ;;  %v4799_v1 = vld [vmem:[#allocation9 + $0xcc] ss:$16 sps:$4 sm:$0xff]   ;;  %v4896_v47 = vld [vmem:[#allocation11 + $0xc4] ss:$16 sps:$4 sm:$0xff]  }
 0x406   :  { %v6138_v45 = vld [vmem:[#allocation58_spill] sm:$0xff]  ;;  %6158 = vst [vmem:[#allocation36_spill] sm:$0xff] %v4896_v47 }
 0x407   :  { %v1311_v63 = vpack.c.bf16 %v1310_v58, %v1310_v58  ;;  %v4899_v57 = vld [vmem:[#allocation11 + $0xcc] ss:$16 sps:$4 sm:$0xff]   ;;  %v4902_v58 = vld [vmem:[#allocation11 + $0xc0] ss:$16 sps:$4 sm:$0xff]  }
 0x408   :  { %1519 = vmatpush1.bf16.msra.mxu0 %v6076_v51  ;;  %1560 = vmatpush1.bf16.msra.mxu1 %v6077_v0  ;;  %v4802_v51 = vld [vmem:[#allocation9 + $0xc0] ss:$16 sps:$4 sm:$0xff]   ;;  %v4805_v0 = vld [vmem:[#allocation9 + $0xc8] ss:$16 sps:$4 sm:$0xff]   ;;  %6159 = vst [vmem:[#allocation37_spill] sm:$0xff] %v4899_v57  ;;  %6160 = vst [vmem:[#allocation38_spill] sm:$0xff] %v4902_v58 }
 0x409   :  { %1520 = vmatprep.subr.bf16.mxu0 %v6078_v15  ;;  %1561 = vmatprep.subr.bf16.mxu1 %v6079_v16  ;;  %v4808_v15 = vld [vmem:[#allocation9 + $0xe4] ss:$16 sps:$4 sm:$0xff]   ;;  %v4811_v16 = vld [vmem:[#allocation9 + $0xec] ss:$16 sps:$4 sm:$0xff]  }
 0x40c   :  { %1521 = vmatpush1.bf16.msra.mxu0 %v6080_v22  ;;  %1562 = vmatpush1.bf16.msra.mxu1 %v4422_v62  ;;  %v6131_v62 = vld [vmem:[#allocation48_spill] sm:$0xff]  ;;  %v4814_v22 = vld [vmem:[#allocation9 + $0xe0] ss:$16 sps:$4 sm:$0xff]  }
 0x40d   :  { %1522 = vmatprep.subr.bf16.mxu0 %v4426_v33  ;;  %1563 = vmatprep.subr.bf16.mxu1 %v6081_v13  ;;  %v6132_v33 = vld [vmem:[#allocation49_spill] sm:$0xff]  ;;  %v4817_v13 = vld [vmem:[#allocation9 + $0xe8] ss:$16 sps:$4 sm:$0xff]  }
 0x410   :  { %1523 = vmatpush1.bf16.msra.mxu0 %v4432_v48  ;;  %1564 = vmatpush1.bf16.msra.mxu1 %v4434_v50  ;;  %v6133_v48 = vld [vmem:[#allocation50_spill] sm:$0xff]  ;;  %v6134_v50 = vld [vmem:[#allocation51_spill] sm:$0xff] }
 0x411   :  { %1524 = vmatprep.subr.bf16.mxu0 %v4438_v55  ;;  %1565 = vmatprep.subr.bf16.mxu1 %v4440_v53  ;;  %v6127_v55 = vld [vmem:[#allocation44_spill] sm:$0xff]  ;;  %v6128_v53 = vld [vmem:[#allocation45_spill] sm:$0xff] }
 0x414   :  { %1525 = vmatpush1.bf16.msra.mxu0 %v4444_v56  ;;  %1566 = vmatpush1.bf16.msra.mxu1 %v4446_v61  ;;  %v6129_v56 = vld [vmem:[#allocation46_spill] sm:$0xff]  ;;  %v6130_v61 = vld [vmem:[#allocation47_spill] sm:$0xff] }
 0x415   :  { %1626 = vmatprep.subr.bf16.mxu0 %v4599_v9  ;;  %1667 = vmatprep.subr.bf16.mxu1 %v4602_v6 }
 0x417   :  { %1543 = vmatmul.mubr.bf16.vlgmr.msra.gmra.mrb[32].mxu0 %v1311_v63  ;;  %1584 = vmatmul.mubr.bf16.vlgmr.msra.gmra.mrb[32].mxu1 %v1311_v63  ;;  %v4905_v63 = vld [vmem:[#allocation11 + $0xc8] ss:$16 sps:$4 sm:$0xff]  }
 0x418   :  { %1627 = vmatpush1.bf16.msra.mxu0 %v4605_v5  ;;  %1668 = vmatpush1.bf16.msra.mxu1 %v6124_v59  ;;  %6161 = vst [vmem:[#allocation39_spill] sm:$0xff] %v4905_v63 }
 0x419   :  { %1628 = vmatprep.subr.bf16.mxu0 %v6125_v60  ;;  %1669 = vmatprep.subr.bf16.mxu1 %v6126_v54 }
 0x41a   :  { %1658 = vmatprep.mubr.bf16.mxu0 %v6027_v52  ;;  %1699 = vmatprep.mubr.bf16.mxu1 %v6027_v52 }
 0x41c   :  { %1629 = vmatpush1.bf16.msra.mxu0 %v6127_v55  ;;  %1670 = vmatpush1.bf16.msra.mxu1 %v6128_v53 }
 0x41d   :  { %1630 = vmatprep.subr.bf16.mxu0 %v6129_v56  ;;  %1671 = vmatprep.subr.bf16.mxu1 %v6130_v61 }
 0x420   :  { %1631 = vmatpush1.bf16.msra.mxu0 %v6131_v62  ;;  %1672 = vmatpush1.bf16.msra.mxu1 %v6132_v33 }
 0x421   :  { %1632 = vmatprep.subr.bf16.mxu0 %v6133_v48  ;;  %1673 = vmatprep.subr.bf16.mxu1 %v6134_v50 }
 0x424   :  { %1633 = vmatpush1.bf16.msra.mxu0 %v4643_v12  ;;  %1674 = vmatpush1.bf16.msra.mxu1 %v6135_v7 }
 0x425   :  { %1634 = vmatprep.subr.bf16.mxu0 %v6136_v17  ;;  %1675 = vmatprep.subr.bf16.mxu1 %v4652_v49 }
 0x428   :  { %1635 = vmatpush1.bf16.msra.mxu0 %v4655_v11  ;;  %1676 = vmatpush1.bf16.msra.mxu1 %v4787_v20 }
 0x429   :  { %1636 = vmatprep.subr.bf16.mxu0 %v4659_v21  ;;  %1677 = vmatprep.subr.bf16.mxu1 %v4791_v2 }
 0x42c   :  { %1637 = vmatpush1.bf16.msra.mxu0 %v6137_v8  ;;  %1678 = vmatpush1.bf16.msra.mxu1 %v4795_v4 }
 0x42d   :  { %1638 = vmatprep.subr.bf16.mxu0 %v6138_v45  ;;  %1679 = vmatprep.subr.bf16.mxu1 %v4799_v1 }
 0x430   :  { %1639 = vmatpush1.bf16.msra.mxu0 %v4802_v51  ;;  %1680 = vmatpush1.bf16.msra.mxu1 %v4805_v0 }
 0x431   :  { %1640 = vmatprep.subr.bf16.mxu0 %v4808_v15  ;;  %1681 = vmatprep.subr.bf16.mxu1 %v4811_v16 }
 0x434   :  { %1641 = vmatpush1.bf16.msra.mxu0 %v4814_v22  ;;  %1682 = vmatpush1.bf16.msra.mxu1 %v4817_v13 }
 0x435   :  { %1737 = vmatprep.subr.bf16.mxu0 %v4820_v42  ;;  %1778 = vmatprep.subr.bf16.mxu1 %v4823_v28 }
 0x437   :  { %1659 = vmatmul.mubr.bf16.vlgmr.msra.gmra.mrb[36].mxu0 %v4729_v36  ;;  %1700 = vmatmul.mubr.bf16.vlgmr.msra.gmra.mrb[36].mxu1 %v4729_v36  ;;  %v4887_v36 = vld [vmem:[#allocation11 + $0xac] ss:$16 sps:$4 sm:$0xff]  }
 0x438   :  { %1738 = vmatpush1.bf16.msra.mxu0 %v4828_v29  ;;  %1779 = vmatpush1.bf16.msra.mxu1 %v4831_v39  ;;  %6155 = vst [vmem:[#allocation33_spill] sm:$0xff] %v4887_v36 }
 0x439   :  { %1739 = vmatprep.subr.bf16.mxu0 %v4834_v10  ;;  %1780 = vmatprep.subr.bf16.mxu1 %v4837_v40  ;;  %v6169_v40 = vld [vmem:[#allocation56_spill] sm:$0xff] }
 0x43a   :  { %1769 = vmatprep.mubr.bf16.mxu0 %v6027_v52  ;;  %1810 = vmatprep.mubr.bf16.mxu1 %v6027_v52 }
 0x43c   :  { %1740 = vmatpush1.bf16.msra.mxu0 %v4842_v37  ;;  %1781 = vmatpush1.bf16.msra.mxu1 %v4845_v14 }
 0x43d   :  { %1741 = vmatprep.subr.bf16.mxu0 %v4848_v19  ;;  %1782 = vmatprep.subr.bf16.mxu1 %v4851_v43 }
 0x440   :  { %1742 = vmatpush1.bf16.msra.mxu0 %v4854_v41  ;;  %1783 = vmatpush1.bf16.msra.mxu1 %v4857_v25 }
 0x441   :  { %1743 = vmatprep.subr.bf16.mxu0 %v4860_v30  ;;  %1784 = vmatprep.subr.bf16.mxu1 %v4863_v32 }
 0x444   :  { %1744 = vmatpush1.bf16.msra.mxu0 %v4866_v26  ;;  %1785 = vmatpush1.bf16.msra.mxu1 %v4869_v34 }
 0x445   :  { %1745 = vmatprep.subr.bf16.mxu0 %v4872_v23  ;;  %1786 = vmatprep.subr.bf16.mxu1 %v4875_v24 }
 0x448   :  { %1746 = vmatpush1.bf16.msra.mxu0 %v4878_v38  ;;  %1787 = vmatpush1.bf16.msra.mxu1 %v4881_v27 }
 0x449   :  { %1747 = vmatprep.subr.bf16.mxu0 %v4884_v35  ;;  %1788 = vmatprep.subr.bf16.mxu1 %v4887_v36 }
 0x44c   :  { %1748 = vmatpush1.bf16.msra.mxu0 %v4890_v18  ;;  %1789 = vmatpush1.bf16.msra.mxu1 %v4893_v46  ;;  %v4908_v18 = vld [vmem:[#allocation11 + $0xe4] ss:$16 sps:$4 sm:$0xff]   ;;  %v4911_v46 = vld [vmem:[#allocation11 + $0xec] ss:$16 sps:$4 sm:$0xff]  }
 0x44d   :  { %1749 = vmatprep.subr.bf16.mxu0 %v4896_v47  ;;  %1790 = vmatprep.subr.bf16.mxu1 %v4899_v57  ;;  %6162 = vst [vmem:[#allocation40_spill] sm:$0xff] %v4908_v18  ;;  %6163 = vst [vmem:[#allocation41_spill] sm:$0xff] %v4911_v46  ;;  %v4914_v47 = vld [vmem:[#allocation11 + $0xe0] ss:$16 sps:$4 sm:$0xff]   ;;  %v4917_v57 = vld [vmem:[#allocation11 + $0xe8] ss:$16 sps:$4 sm:$0xff]  }
 0x44e   :  { %6164 = vst [vmem:[#allocation42_spill] sm:$0xff] %v4914_v47  ;;  %6165 = vst [vmem:[#allocation43_spill] sm:$0xff] %v4917_v57 }
 0x450   :  { %1750 = vmatpush1.bf16.msra.mxu0 %v4902_v58  ;;  %1791 = vmatpush1.bf16.msra.mxu1 %v4905_v63  ;;  %v4920_v58 = vld [vmem:[#allocation12 + $0x4] ss:$16 sps:$4 sm:$0xff]   ;;  %v4923_v63 = vld [vmem:[#allocation12 + $0xc] ss:$16 sps:$4 sm:$0xff]  }
 0x451   :  { %1751 = vmatprep.subr.bf16.mxu0 %v4908_v18  ;;  %1792 = vmatprep.subr.bf16.mxu1 %v4911_v46  ;;  %6166 = vst [vmem:[#allocation44_spill] sm:$0xff] %v4920_v58  ;;  %6167 = vst [vmem:[#allocation45_spill] sm:$0xff] %v4923_v63 }
 0x454   :  { %1752 = vmatpush1.bf16.msra.mxu0 %v4914_v47  ;;  %1793 = vmatpush1.bf16.msra.mxu1 %v4917_v57 }
 0x455   :  { %1819 = vmatprep.subr.bf16.mxu0 %v4920_v58  ;;  %1860 = vmatprep.subr.bf16.mxu1 %v4923_v63  ;;  %v6168_v63 = vld [vmem:[#allocation55_spill] sm:$0xff] }
 0x4ca   :  { %v1462_v18 = vpop.f32.mrb[28].mxu0  ;;  %v1503_v36 = vpop.f32.mrb[28].mxu1 }
 0x4cb   :  { %v1464_v35 = vpop.f32.mrb[29].mxu0  ;;  %v1505_v46 = vpop.f32.mrb[29].mxu1 }
 0x4cc   :  { %v1466_v27 = vpop.f32.mrb[30].mxu0  ;;  %v1507_v38 = vpop.f32.mrb[30].mxu1 }
 0x4cd   :  { %v1467_v24 = vpop.f32.mrb[31].mxu0  ;;  %v1508_v47 = vpop.f32.mrb[31].mxu1 }
 0x4ce   :  { %v6170_v47 = vld [vmem:[#allocation57_spill] sm:$0xff] }
 0x4ea   :  { %v1544_v23 = vpop.f32.mrb[32].mxu0  ;;  %v1585_v34 = vpop.f32.mrb[32].mxu1 }
 0x4eb   :  { %v1545_v26 = vadd.f32 %v1544_v23, %v1462_v18  ;;  %v1586_v57 = vadd.f32 %v1585_v34, %v1503_v36  ;;  %v1546_v32 = vpop.f32.mrb[33].mxu0  ;;  %v1587_v30 = vpop.f32.mrb[33].mxu1 }
 0x4ec   :  { %v1547_v25 = vadd.f32 %v1546_v32, %v1464_v35  ;;  %v4926_v58 = vadd.f32 %v1587_v30, %v1505_v46  ;;  %v1548_v41 = vpop.f32.mrb[34].mxu0  ;;  %v1589_v43 = vpop.f32.mrb[34].mxu1  ;;  %v1622_v32 = vld [vmem:[#allocation7 + $0x60] sm:$0xff] }
 0x4ed   :  { %v1592_v19 = vadd.f32 %v1545_v26, %v6168_v63  ;;  %v1549_v14 = vpop.f32.mrb[35].mxu0  ;;  %v1590_v37 = vpop.f32.mrb[35].mxu1  ;;  %v1594_v23 = vadd.f32 %v1586_v57, %v6170_v47  ;;  %v1623_v26 = vld [vmem:[#allocation7 + $0x68] sm:$0xff] }
 0x4ee   :  { %v1593_v27 = vadd.f32 %v1547_v25, %v6169_v40  ;;  %v1625_v40 = vld [vmem:[#allocation7 + $0x78] sm:$0xff] }
 0x4ef   :  { %v3305_v38 = vmul.f32 -1.442695, %v1592_v19 }
 0x4f0   :  { %v3306_v24 = vmul.f32 -1.442695, %v1593_v27 }
 0x4f1   :  { %3573 = vpow2.f32 %v3305_v38 }
 0x4f2   :  { %3575 = vpow2.f32 %v3306_v24 }
 0x4f3   :  { %3577 = vtanh.f32 %v1594_v23 }
 0x4fb   :  { %v3574_v34 = vpop.eup %3573 }
 0x4fc   :  { %v3576_v36 = vpop.eup %3575  ;;  %v1599_v18 = vadd.f32 1.0, %v3574_v34 }
 0x4fd   :  { %v1605_v30 = vadd.f32 1.0, %v3576_v36  ;;  %v3578_v43 = vpop.eup %3577 }
 0x4fe   :  { %3579 = vrcp.f32 %v1599_v18 }
 0x4ff   :  { %3581 = vrcp.f32 %v1605_v30 }
 0x508   :  { %v3580_v41 = vpop.eup %3579 }
 0x509   :  { %v3582_v14 = vpop.eup %3581  ;;  %v1616_v37 = vmul.f32 %v3580_v41, %v3578_v43  ;;  %v1624_v41 = vld [vmem:[#allocation7 + $0x70] sm:$0xff] }
 0x50a   :  { %v1615_v19 = vmul.f32 %v3582_v14, %v4721_v31  ;;  %v1660_v25 = vpop.f32.mrb[36].mxu0  ;;  %v1701_v35 = vpop.f32.mrb[36].mxu1 }
 0x50b   :  { %v1708_v46 = vadd.f32 %v1660_v25, %v1622_v32  ;;  %v1662_v27 = vpop.f32.mrb[37].mxu0  ;;  %v1703_v57 = vpop.f32.mrb[37].mxu1  ;;  %v1710_v14 = vadd.f32 %v1701_v35, %v1624_v41  ;;  %v4958_v41 = vld [vmem:[#allocation12 + $0x20] ss:$16 sps:$4 sm:$0xff]  }
 0x50c   :  { %v4932_v38 = vadd.f32 %v1616_v37, %v1615_v19  ;;  %v1709_v24 = vadd.f32 %v1662_v27, %v1623_v26  ;;  %v1664_v23 = vpop.f32.mrb[38].mxu0  ;;  %v1705_v34 = vpop.f32.mrb[38].mxu1  ;;  %v1711_v43 = vadd.f32 %v1703_v57, %v1625_v40 }
 0x50d   :  { %v3308_v36 = vmul.f32 -1.442695, %v1708_v46  ;;  %v1665_v18 = vpop.f32.mrb[39].mxu0  ;;  %v1706_v30 = vpop.f32.mrb[39].mxu1 }
 0x50e   :  { %v3309_v47 = vmul.f32 -1.442695, %v1709_v24  ;;  %v3310_v31 = vmul.f32 -1.442695, %v1711_v43  ;;  %v4947_v30 = vld [vmem:[#allocation12 + $0x8] ss:$16 sps:$4 sm:$0xff]  }
 0x50f   :  { %3583 = vpow2.f32 %v3308_v36  ;;  %v4953_v43 = vld [vmem:[#allocation12 + $0x2c] ss:$16 sps:$4 sm:$0xff]  }
 0x510   :  { %3585 = vpow2.f32 %v3309_v47 }
 0x511   :  { %3587 = vpow2.f32 %v3310_v31  ;;  %v4961_v31 = vld [vmem:[#allocation12 + $0x28] ss:$16 sps:$4 sm:$0xff]  }
 0x512   :  { %3589 = vtanh.f32 %v1710_v14  ;;  %v4964_v14 = vld [vmem:[#allocation12 + $0x44] ss:$16 sps:$4 sm:$0xff]  }
 0x519   :  { %v3584_v63 = vpop.eup %3583 }
 0x51a   :  { %v3586_v32 = vpop.eup %3585  ;;  %v1715_v25 = vadd.f32 1.0, %v3584_v63  ;;  %v1595_v63 = vadd.f32 %v4926_v58, %v4558_v44  ;;  %v4950_v58 = vld [vmem:[#allocation12 + $0x24] ss:$16 sps:$4 sm:$0xff]  }
 0x51b   :  { %v1721_v37 = vadd.f32 1.0, %v3586_v32  ;;  %v3588_v26 = vpop.eup %3587  ;;  %v4967_v32 = vld [vmem:[#allocation12 + $0x4c] ss:$16 sps:$4 sm:$0xff]  }
 0x51c   :  { %3591 = vrcp.f32 %v1715_v25  ;;  %v3590_v19 = vpop.eup %3589  ;;  %v1728_v23 = vadd.f32 1.0, %v3588_v26  ;;  %v3307_v57 = vmul.f32 -1.442695, %v1595_v63  ;;  %v4973_v26 = vld [vmem:[#allocation12 + $0x48] ss:$16 sps:$4 sm:$0xff]  }
 0x51d   :  { %3593 = vrcp.f32 %v1721_v37  ;;  %v4970_v37 = vld [vmem:[#allocation12 + $0x40] ss:$16 sps:$4 sm:$0xff]   ;;  %v4992_v63 = vld [vmem:[#allocation12 + $0x8c] ss:$16 sps:$4 sm:$0xff]  }
 0x51e   :  { %3595 = vrcp.f32 %v1728_v23  ;;  %v4985_v23 = vld [vmem:[#allocation12 + $0x68] ss:$16 sps:$4 sm:$0xff]   ;;  %6173 = vst [vmem:[#allocation48_spill] sm:$0xff] %v4992_v63 }
 0x51f   :  { %6171 = vst [vmem:[#allocation46_spill] sm:$0xff] %v4985_v23 }
 0x526   :  { %v3592_v46 = vpop.eup %3591 }
 0x527   :  { %v3594_v27 = vpop.eup %3593  ;;  %v1732_v24 = vmul.f32 %v3592_v46, %v3590_v19  ;;  %v4976_v19 = vld [vmem:[#allocation12 + $0x64] ss:$16 sps:$4 sm:$0xff]   ;;  %v4979_v46 = vld [vmem:[#allocation12 + $0x6c] ss:$16 sps:$4 sm:$0xff]  }
 0x528   :  { %v1731_v47 = vmul.f32 %v3594_v27, %v4724_v3  ;;  %v3596_v35 = vpop.eup %3595  ;;  %v4944_v3 = vld [vmem:[#allocation12] ss:$16 sps:$4 sm:$0xff]  }
 0x52a   :  { %v4935_v40 = vadd.f32 %v1732_v24, %v1731_v47  ;;  %v4982_v24 = vld [vmem:[#allocation12 + $0x60] ss:$16 sps:$4 sm:$0xff]   ;;  %v4989_v47 = vld [vmem:[#allocation12 + $0x84] ss:$16 sps:$4 sm:$0xff]  }
 0x52b   :  { %6172 = vst [vmem:[#allocation47_spill] sm:$0xff] %v4989_v47 }
 0x52c   :  { %3597 = vtanh.f32 %v4935_v40 }
 0x52d   :  { %3599 = vpow2.f32 %v3307_v57  ;;  %v4998_v57 = vld [vmem:[#allocation12 + $0x88] ss:$16 sps:$4 sm:$0xff]  }
 0x52e   :  { %3601 = vtanh.f32 %v4932_v38  ;;  %6175 = vst [vmem:[#allocation50_spill] sm:$0xff] %v4998_v57 }
 0x536   :  { %v3598_v34 = vpop.eup %3597 }
 0x537   :  { %v1735_v36 = vmul.f32 %v3598_v34, %v3596_v35  ;;  %v3600_v25 = vpop.eup %3599  ;;  %v4995_v35 = vld [vmem:[#allocation12 + $0x80] ss:$16 sps:$4 sm:$0xff]   ;;  %v5001_v34 = vld [vmem:[#allocation12 + $0xa4] ss:$16 sps:$4 sm:$0xff]  }
 0x538   :  { %v1612_v27 = vadd.f32 1.0, %v3600_v25  ;;  %6174 = vst [vmem:[#allocation49_spill] sm:$0xff] %v4995_v35  ;;  %6176 = vst [vmem:[#allocation51_spill] sm:$0xff] %v5001_v34  ;;  %v5007_v25 = vld [vmem:[#allocation12 + $0xa0] ss:$16 sps:$4 sm:$0xff]  }
 0x539   :  { %v4940_v18 = vpack.c.bf16 %v1735_v36, %v1735_v36  ;;  %v5004_v36 = vld [vmem:[#allocation12 + $0xac] ss:$16 sps:$4 sm:$0xff]   ;;  %6178 = vst [vmem:[#allocation53_spill] sm:$0xff] %v5007_v25 }
 0x53a   :  { %3603 = vrcp.f32 %v1612_v27  ;;  %6177 = vst [vmem:[#allocation52_spill] sm:$0xff] %v5004_v36  ;;  %v5010_v27 = vld [vmem:[#allocation12 + $0xa8] ss:$16 sps:$4 sm:$0xff]  }
 0x53b   :  { %1770 = vmatmul.mubr.bf16.vlgmr.msra.gmra.mrb[40].mxu0 %v4940_v18  ;;  %1811 = vmatmul.mubr.bf16.vlgmr.msra.gmra.mrb[40].mxu1 %v4940_v18  ;;  %6179 = vst [vmem:[#allocation54_spill] sm:$0xff] %v5010_v27 }
 0x53c   :  { %1820 = vmatpush1.bf16.msra.mxu0 %v4944_v3  ;;  %1861 = vmatpush1.bf16.msra.mxu1 %v4947_v30 }
 0x53d   :  { %1821 = vmatprep.subr.bf16.mxu0 %v4950_v58  ;;  %1862 = vmatprep.subr.bf16.mxu1 %v4953_v43 }
 0x53e   :  { %1851 = vmatprep.mubr.bf16.mxu0 %v6027_v52  ;;  %1892 = vmatprep.mubr.bf16.mxu1 %v6027_v52 }
 0x540   :  { %1822 = vmatpush1.bf16.msra.mxu0 %v4958_v41  ;;  %1863 = vmatpush1.bf16.msra.mxu1 %v4961_v31 }
 0x541   :  { %1823 = vmatprep.subr.bf16.mxu0 %v4964_v14  ;;  %1864 = vmatprep.subr.bf16.mxu1 %v4967_v32 }
 0x544   :  { %1824 = vmatpush1.bf16.msra.mxu0 %v4970_v37  ;;  %1865 = vmatpush1.bf16.msra.mxu1 %v4973_v26 }
 0x545   :  { %1825 = vmatprep.subr.bf16.mxu0 %v4976_v19  ;;  %1866 = vmatprep.subr.bf16.mxu1 %v4979_v46 }
 0x548   :  { %1826 = vmatpush1.bf16.msra.mxu0 %v4982_v24  ;;  %1867 = vmatpush1.bf16.msra.mxu1 %v4985_v23  ;;  %v5034_v23 = vld [vmem:[#allocation12 + $0xe8] ss:$16 sps:$4 sm:$0xff]  }
 0x549   :  { %1827 = vmatprep.subr.bf16.mxu0 %v4989_v47  ;;  %1868 = vmatprep.subr.bf16.mxu1 %v4992_v63  ;;  %v5019_v47 = vld [vmem:[#allocation12 + $0xc0] ss:$16 sps:$4 sm:$0xff]  }
 0x54a   :  { %6182 = vst [vmem:[#allocation60_spill] sm:$0xff] %v5019_v47 }
 0x54c   :  { %1828 = vmatpush1.bf16.msra.mxu0 %v4995_v35  ;;  %1869 = vmatpush1.bf16.msra.mxu1 %v4998_v57  ;;  %v5013_v35 = vld [vmem:[#allocation12 + $0xc4] ss:$16 sps:$4 sm:$0xff]   ;;  %v5016_v57 = vld [vmem:[#allocation12 + $0xcc] ss:$16 sps:$4 sm:$0xff]  }
 0x54d   :  { %1829 = vmatprep.subr.bf16.mxu0 %v5001_v34  ;;  %1870 = vmatprep.subr.bf16.mxu1 %v5004_v36  ;;  %6180 = vst [vmem:[#allocation58_spill] sm:$0xff] %v5013_v35  ;;  %6181 = vst [vmem:[#allocation59_spill] sm:$0xff] %v5016_v57  ;;  %v3602_v34 = vpop.eup %3601  ;;  %v5022_v36 = vld [vmem:[#allocation12 + $0xc8] ss:$16 sps:$4 sm:$0xff]  }
 0x54e   :  { %v3604_v63 = vpop.eup %3603 }
 0x550   :  { %1830 = vmatpush1.bf16.msra.mxu0 %v5007_v25  ;;  %1871 = vmatpush1.bf16.msra.mxu1 %v5010_v27  ;;  %v5025_v25 = vld [vmem:[#allocation12 + $0xe4] ss:$16 sps:$4 sm:$0xff]   ;;  %v5028_v27 = vld [vmem:[#allocation12 + $0xec] ss:$16 sps:$4 sm:$0xff]  }
 0x551   :  { %1831 = vmatprep.subr.bf16.mxu0 %v5013_v35  ;;  %1872 = vmatprep.subr.bf16.mxu1 %v5016_v57  ;;  %v1619_v35 = vmul.f32 %v3604_v63, %v3602_v34  ;;  %v5031_v57 = vld [vmem:[#allocation12 + $0xe0] ss:$16 sps:$4 sm:$0xff]  }
 0x552   :  { %v6207_v63 = vld [vmem:[#allocation41_spill] sm:$0xff]  ;;  %v6209_v34 = vld [vmem:[#allocation43_spill] sm:$0xff] }
 0x554   :  { %1832 = vmatpush1.bf16.msra.mxu0 %v5019_v47  ;;  %1873 = vmatpush1.bf16.msra.mxu1 %v5022_v36  ;;  %v1620_v47 = vpack.c.bf16 %v1619_v35, %v1619_v35  ;;  %v6208_v35 = vld [vmem:[#allocation42_spill] sm:$0xff] }
 0x555   :  { %1833 = vmatprep.subr.bf16.mxu0 %v5025_v25  ;;  %1874 = vmatprep.subr.bf16.mxu1 %v5028_v27 }
 0x558   :  { %1834 = vmatpush1.bf16.msra.mxu0 %v5031_v57  ;;  %1875 = vmatpush1.bf16.msra.mxu1 %v5034_v23 }
 0x559   :  { %1935 = vmatprep.subr.bf16.mxu0 %v4599_v9  ;;  %1976 = vmatprep.subr.bf16.mxu1 %v4602_v6  ;;  %v6183_v9 = vld [vmem:[#allocation17_spill] sm:$0xff]  ;;  %v6184_v6 = vld [vmem:[#allocation18_spill] sm:$0xff] }
 0x55b   :  { %1852 = vmatmul.mubr.bf16.vlgmr.msra.gmra.mrb[44].mxu0 %v1620_v47  ;;  %1893 = vmatmul.mubr.bf16.vlgmr.msra.gmra.mrb[44].mxu1 %v1620_v47  ;;  %v6206_v47 = vld [vmem:[#allocation40_spill] sm:$0xff] }
 0x55c   :  { %1936 = vmatpush1.bf16.msra.mxu0 %v4605_v5  ;;  %1977 = vmatpush1.bf16.msra.mxu1 %v6124_v59  ;;  %v6185_v5 = vld [vmem:[#allocation19_spill] sm:$0xff]  ;;  %v6190_v59 = vld [vmem:[#allocation24_spill] sm:$0xff] }
 0x55d   :  { %1937 = vmatprep.subr.bf16.mxu0 %v6125_v60  ;;  %1978 = vmatprep.subr.bf16.mxu1 %v6126_v54  ;;  %v6191_v60 = vld [vmem:[#allocation25_spill] sm:$0xff]  ;;  %v6192_v54 = vld [vmem:[#allocation26_spill] sm:$0xff] }
 0x55e   :  { %1967 = vmatprep.mubr.bf16.mxu0 %v6027_v52  ;;  %2008 = vmatprep.mubr.bf16.mxu1 %v6027_v52 }
 0x560   :  { %1938 = vmatpush1.bf16.msra.mxu0 %v6127_v55  ;;  %1979 = vmatpush1.bf16.msra.mxu1 %v6128_v53  ;;  %v6193_v55 = vld [vmem:[#allocation27_spill] sm:$0xff]  ;;  %v6194_v53 = vld [vmem:[#allocation28_spill] sm:$0xff] }
 0x561   :  { %1939 = vmatprep.subr.bf16.mxu0 %v6129_v56  ;;  %1980 = vmatprep.subr.bf16.mxu1 %v6130_v61  ;;  %v6195_v56 = vld [vmem:[#allocation29_spill] sm:$0xff]  ;;  %v6196_v61 = vld [vmem:[#allocation30_spill] sm:$0xff] }
 0x564   :  { %1940 = vmatpush1.bf16.msra.mxu0 %v6131_v62  ;;  %1981 = vmatpush1.bf16.msra.mxu1 %v6132_v33  ;;  %v6197_v62 = vld [vmem:[#allocation31_spill] sm:$0xff]  ;;  %v6198_v33 = vld [vmem:[#allocation32_spill] sm:$0xff] }
 0x565   :  { %1941 = vmatprep.subr.bf16.mxu0 %v6133_v48  ;;  %1982 = vmatprep.subr.bf16.mxu1 %v6134_v50  ;;  %v6199_v48 = vld [vmem:[#allocation33_spill] sm:$0xff]  ;;  %v6200_v50 = vld [vmem:[#allocation34_spill] sm:$0xff] }
 0x568   :  { %1942 = vmatpush1.bf16.msra.mxu0 %v4643_v12  ;;  %1983 = vmatpush1.bf16.msra.mxu1 %v6135_v7  ;;  %v6189_v12 = vld [vmem:[#allocation23_spill] sm:$0xff] }
 0x569   :  { %1943 = vmatprep.subr.bf16.mxu0 %v6136_v17  ;;  %1984 = vmatprep.subr.bf16.mxu1 %v4652_v49  ;;  %v6186_v49 = vld [vmem:[#allocation20_spill] sm:$0xff]  ;;  %v6201_v7 = vld [vmem:[#allocation35_spill] sm:$0xff] }
 0x56a   :  { %v6202_v17 = vld [vmem:[#allocation36_spill] sm:$0xff] }
 0x56c   :  { %1944 = vmatpush1.bf16.msra.mxu0 %v4655_v11  ;;  %1985 = vmatpush1.bf16.msra.mxu1 %v4787_v20  ;;  %v6187_v11 = vld [vmem:[#allocation21_spill] sm:$0xff] }
 0x56d   :  { %1945 = vmatprep.subr.bf16.mxu0 %v4659_v21  ;;  %1986 = vmatprep.subr.bf16.mxu1 %v4791_v2  ;;  %v6188_v21 = vld [vmem:[#allocation22_spill] sm:$0xff] }
 0x570   :  { %1946 = vmatpush1.bf16.msra.mxu0 %v6137_v8  ;;  %1987 = vmatpush1.bf16.msra.mxu1 %v4795_v4  ;;  %v6203_v8 = vld [vmem:[#allocation37_spill] sm:$0xff] }
 0x571   :  { %1947 = vmatprep.subr.bf16.mxu0 %v6138_v45  ;;  %1988 = vmatprep.subr.bf16.mxu1 %v4799_v1  ;;  %v6204_v45 = vld [vmem:[#allocation38_spill] sm:$0xff] }
 0x574   :  { %1948 = vmatpush1.bf16.msra.mxu0 %v4802_v51  ;;  %1989 = vmatpush1.bf16.msra.mxu1 %v4805_v0 }
 0x575   :  { %1949 = vmatprep.subr.bf16.mxu0 %v4808_v15  ;;  %1990 = vmatprep.subr.bf16.mxu1 %v4811_v16 }
 0x578   :  { %1950 = vmatpush1.bf16.msra.mxu0 %v4814_v22  ;;  %1991 = vmatpush1.bf16.msra.mxu1 %v4817_v13 }
 0x579   :  { %2046 = vmatprep.subr.bf16.mxu0 %v4820_v42  ;;  %2087 = vmatprep.subr.bf16.mxu1 %v4823_v28 }
 0x57b   :  { %1968 = vmatmul.mubr.bf16.vlgmr.msra.gmra.mrb[48].mxu0 %v4940_v18  ;;  %2009 = vmatmul.mubr.bf16.vlgmr.msra.gmra.mrb[48].mxu1 %v4940_v18  ;;  %v6205_v18 = vld [vmem:[#allocation39_spill] sm:$0xff] }
 0x57c   :  { %2047 = vmatpush1.bf16.msra.mxu0 %v4828_v29  ;;  %2088 = vmatpush1.bf16.msra.mxu1 %v4831_v39 }
 0x57d   :  { %2048 = vmatprep.subr.bf16.mxu0 %v4834_v10  ;;  %2089 = vmatprep.subr.bf16.mxu1 %v6183_v9 }
 0x57e   :  { %2078 = vmatprep.mubr.bf16.mxu0 %v6027_v52  ;;  %2119 = vmatprep.mubr.bf16.mxu1 %v6027_v52 }
 0x580   :  { %2049 = vmatpush1.bf16.msra.mxu0 %v6184_v6  ;;  %2090 = vmatpush1.bf16.msra.mxu1 %v6185_v5 }
 0x581   :  { %2050 = vmatprep.subr.bf16.mxu0 %v6186_v49  ;;  %2091 = vmatprep.subr.bf16.mxu1 %v6187_v11  ;;  %v6213_v11 = vld [vmem:[#allocation56_spill] sm:$0xff] }
 0x584   :  { %2051 = vmatpush1.bf16.msra.mxu0 %v6188_v21  ;;  %2092 = vmatpush1.bf16.msra.mxu1 %v6189_v12 }
 0x585   :  { %2052 = vmatprep.subr.bf16.mxu0 %v6190_v59  ;;  %2093 = vmatprep.subr.bf16.mxu1 %v6191_v60 }
 0x588   :  { %2053 = vmatpush1.bf16.msra.mxu0 %v6192_v54  ;;  %2094 = vmatpush1.bf16.msra.mxu1 %v6193_v55 }
 0x589   :  { %2054 = vmatprep.subr.bf16.mxu0 %v6194_v53  ;;  %2095 = vmatprep.subr.bf16.mxu1 %v6195_v56 }
 0x58c   :  { %2055 = vmatpush1.bf16.msra.mxu0 %v6196_v61  ;;  %2096 = vmatpush1.bf16.msra.mxu1 %v6197_v62 }
 0x58d   :  { %2056 = vmatprep.subr.bf16.mxu0 %v6198_v33  ;;  %2097 = vmatprep.subr.bf16.mxu1 %v6199_v48  ;;  %v6210_v48 = vld [vmem:[#allocation44_spill] sm:$0xff] }
 0x590   :  { %2057 = vmatpush1.bf16.msra.mxu0 %v6200_v50  ;;  %2098 = vmatpush1.bf16.msra.mxu1 %v6201_v7  ;;  %v6211_v50 = vld [vmem:[#allocation45_spill] sm:$0xff] }
 0x591   :  { %2058 = vmatprep.subr.bf16.mxu0 %v6202_v17  ;;  %2099 = vmatprep.subr.bf16.mxu1 %v6203_v8 }
 0x594   :  { %2059 = vmatpush1.bf16.msra.mxu0 %v6204_v45  ;;  %2100 = vmatpush1.bf16.msra.mxu1 %v6205_v18 }
 0x595   :  { %2060 = vmatprep.subr.bf16.mxu0 %v6206_v47  ;;  %2101 = vmatprep.subr.bf16.mxu1 %v6207_v63 }
 0x598   :  { %2061 = vmatpush1.bf16.msra.mxu0 %v6208_v35  ;;  %2102 = vmatpush1.bf16.msra.mxu1 %v6209_v34 }
 0x599   :  { %2128 = vmatprep.subr.bf16.mxu0 %v6210_v48  ;;  %2169 = vmatprep.subr.bf16.mxu1 %v6211_v50  ;;  %v6212_v50 = vld [vmem:[#allocation55_spill] sm:$0xff] }
 0x60e   :  { %v1771_v7 = vpop.f32.mrb[40].mxu0  ;;  %v1812_v17 = vpop.f32.mrb[40].mxu1 }
 0x60f   :  { %v1773_v33 = vpop.f32.mrb[41].mxu0  ;;  %v1814_v8 = vpop.f32.mrb[41].mxu1 }
 0x610   :  { %v1775_v62 = vpop.f32.mrb[42].mxu0  ;;  %v1816_v45 = vpop.f32.mrb[42].mxu1 }
 0x611   :  { %v1776_v61 = vpop.f32.mrb[43].mxu0  ;;  %v1817_v18 = vpop.f32.mrb[43].mxu1 }
 0x612   :  { %v6214_v18 = vld [vmem:[#allocation57_spill] sm:$0xff] }
 0x62e   :  { %v1853_v56 = vpop.f32.mrb[44].mxu0  ;;  %v1894_v47 = vpop.f32.mrb[44].mxu1 }
 0x62f   :  { %v1854_v53 = vadd.f32 %v1853_v56, %v1771_v7  ;;  %v1895_v63 = vadd.f32 %v1894_v47, %v1812_v17  ;;  %v1855_v55 = vpop.f32.mrb[45].mxu0  ;;  %v1896_v35 = vpop.f32.mrb[45].mxu1 }
 0x630   :  { %v1856_v54 = vadd.f32 %v1855_v55, %v1773_v33  ;;  %v5109_v34 = vadd.f32 %v1896_v35, %v1814_v8  ;;  %v1857_v48 = vpop.f32.mrb[46].mxu0  ;;  %v1898_v60 = vpop.f32.mrb[46].mxu1 }
 0x631   :  { %v1901_v59 = vadd.f32 %v1854_v53, %v6212_v50  ;;  %v1858_v12 = vpop.f32.mrb[47].mxu0  ;;  %v1899_v21 = vpop.f32.mrb[47].mxu1  ;;  %v1903_v56 = vadd.f32 %v1895_v63, %v6214_v18  ;;  %v1931_v53 = vld [vmem:[#allocation7 + $0x80] sm:$0xff]  ;;  %v1932_v48 = vld [vmem:[#allocation7 + $0x88] sm:$0xff] }
 0x632   :  { %v1902_v62 = vadd.f32 %v1856_v54, %v6213_v11  ;;  %v1934_v11 = vld [vmem:[#allocation7 + $0x98] sm:$0xff] }
 0x633   :  { %v3311_v45 = vmul.f32 -1.442695, %v1901_v59 }
 0x634   :  { %v3312_v61 = vmul.f32 -1.442695, %v1902_v62 }
 0x635   :  { %3605 = vpow2.f32 %v3311_v45 }
 0x636   :  { %3607 = vpow2.f32 %v3312_v61 }
 0x637   :  { %3609 = vtanh.f32 %v1903_v56 }
 0x63f   :  { %v3606_v7 = vpop.eup %3605 }
 0x640   :  { %v3608_v17 = vpop.eup %3607  ;;  %v1908_v47 = vadd.f32 1.0, %v3606_v7 }
 0x641   :  { %v1914_v55 = vadd.f32 1.0, %v3608_v17  ;;  %v3610_v60 = vpop.eup %3609 }
 0x642   :  { %3611 = vrcp.f32 %v1908_v47 }
 0x643   :  { %3613 = vrcp.f32 %v1914_v55 }
 0x64c   :  { %v3612_v33 = vpop.eup %3611 }
 0x64d   :  { %v3614_v12 = vpop.eup %3613  ;;  %v1925_v21 = vmul.f32 %v3612_v33, %v3610_v60  ;;  %v1933_v33 = vld [vmem:[#allocation7 + $0x90] sm:$0xff] }
 0x64e   :  { %v1924_v59 = vmul.f32 %v3614_v12, %v4932_v38  ;;  %v1969_v54 = vpop.f32.mrb[48].mxu0  ;;  %v2010_v8 = vpop.f32.mrb[48].mxu1 }
 0x64f   :  { %v2017_v35 = vadd.f32 %v1969_v54, %v1931_v53  ;;  %v1971_v62 = vpop.f32.mrb[49].mxu0  ;;  %v2012_v63 = vpop.f32.mrb[49].mxu1  ;;  %v2019_v12 = vadd.f32 %v2010_v8, %v1933_v33  ;;  %v6217_v33 = vld [vmem:[#allocation48_spill] sm:$0xff] }
 0x650   :  { %v5115_v45 = vadd.f32 %v1925_v21, %v1924_v59  ;;  %v2018_v61 = vadd.f32 %v1971_v62, %v1932_v48  ;;  %v1973_v56 = vpop.f32.mrb[50].mxu0  ;;  %v2014_v7 = vpop.f32.mrb[50].mxu1  ;;  %v2020_v60 = vadd.f32 %v2012_v63, %v1934_v11 }
 0x651   :  { %v3314_v17 = vmul.f32 -1.442695, %v2017_v35  ;;  %v1974_v47 = vpop.f32.mrb[51].mxu0  ;;  %v2015_v55 = vpop.f32.mrb[51].mxu1 }
 0x652   :  { %v3315_v18 = vmul.f32 -1.442695, %v2018_v61  ;;  %v3316_v38 = vmul.f32 -1.442695, %v2020_v60  ;;  %v6215_v55 = vld [vmem:[#allocation46_spill] sm:$0xff]  ;;  %v6216_v60 = vld [vmem:[#allocation47_spill] sm:$0xff] }
 0x653   :  { %3615 = vpow2.f32 %v3314_v17 }
 0x654   :  { %3617 = vpow2.f32 %v3315_v18 }
 0x655   :  { %3619 = vpow2.f32 %v3316_v38  ;;  %v6218_v38 = vld [vmem:[#allocation49_spill] sm:$0xff] }
 0x656   :  { %3621 = vtanh.f32 %v2019_v12  ;;  %v6219_v12 = vld [vmem:[#allocation50_spill] sm:$0xff] }
 0x65d   :  { %v3616_v50 = vpop.eup %3615 }
 0x65e   :  { %v3618_v53 = vpop.eup %3617  ;;  %v2024_v54 = vadd.f32 1.0, %v3616_v50  ;;  %v1904_v50 = vadd.f32 %v5109_v34, %v4558_v44 }
 0x65f   :  { %v2030_v21 = vadd.f32 1.0, %v3618_v53  ;;  %v3620_v48 = vpop.eup %3619  ;;  %v6220_v53 = vld [vmem:[#allocation51_spill] sm:$0xff] }
 0x660   :  { %3623 = vrcp.f32 %v2024_v54  ;;  %v3622_v59 = vpop.eup %3621  ;;  %v2037_v56 = vadd.f32 1.0, %v3620_v48  ;;  %v3313_v63 = vmul.f32 -1.442695, %v1904_v50  ;;  %v6221_v54 = vld [vmem:[#allocation52_spill] sm:$0xff]  ;;  %v6223_v48 = vld [vmem:[#allocation54_spill] sm:$0xff] }
 0x661   :  { %3625 = vrcp.f32 %v2030_v21  ;;  %v6222_v21 = vld [vmem:[#allocation53_spill] sm:$0xff] }
 0x662   :  { %3627 = vrcp.f32 %v2037_v56  ;;  %v6226_v56 = vld [vmem:[#allocation60_spill] sm:$0xff] }
 0x66a   :  { %v3624_v35 = vpop.eup %3623 }
 0x66b   :  { %v3626_v62 = vpop.eup %3625  ;;  %v2041_v61 = vmul.f32 %v3624_v35, %v3622_v59  ;;  %v6224_v59 = vld [vmem:[#allocation58_spill] sm:$0xff]  ;;  %v6225_v35 = vld [vmem:[#allocation59_spill] sm:$0xff] }
 0x66c   :  { %v2040_v18 = vmul.f32 %v3626_v62, %v4935_v40  ;;  %v3628_v8 = vpop.eup %3627 }
 0x66e   :  { %v5118_v11 = vadd.f32 %v2041_v61, %v2040_v18 }
 0x670   :  { %3629 = vtanh.f32 %v5118_v11 }
 0x671   :  { %3631 = vpow2.f32 %v3313_v63  ;;  %v5163_v63 = vld [vmem:[#allocation9 + $0xc] ss:$16 sps:$4 sm:$0xff]  }
 0x672   :  { %3633 = vtanh.f32 %v5115_v45 }
 0x67a   :  { %v3630_v7 = vpop.eup %3629 }
 0x67b   :  { %v2044_v17 = vmul.f32 %v3630_v7, %v3628_v8  ;;  %v3632_v40 = vpop.eup %3631  ;;  %v5160_v8 = vld [vmem:[#allocation9 + $0x4] ss:$16 sps:$4 sm:$0xff]   ;;  %v5166_v7 = vld [vmem:[#allocation9] ss:$16 sps:$4 sm:$0xff]  }
 0x67c   :  { %v1921_v34 = vadd.f32 1.0, %v3632_v40  ;;  %v3634_v62 = vpop.eup %3633  ;;  %v5172_v40 = vld [vmem:[#allocation9 + $0x24] ss:$16 sps:$4 sm:$0xff]  }
 0x67d   :  { %v5123_v47 = vpack.c.bf16 %v2044_v17, %v2044_v17  ;;  %v5169_v17 = vld [vmem:[#allocation9 + $0x8] ss:$16 sps:$4 sm:$0xff]   ;;  %6227 = vst [vmem:[#allocation17_spill] sm:$0xff] %v5172_v40 }
 0x67e   :  { %3635 = vrcp.f32 %v1921_v34  ;;  %v5175_v34 = vld [vmem:[#allocation9 + $0x2c] ss:$16 sps:$4 sm:$0xff]  }
 0x67f   :  { %2079 = vmatmul.mubr.bf16.vlgmr.msra.gmra.mrb[52].mxu0 %v5123_v47  ;;  %2120 = vmatmul.mubr.bf16.vlgmr.msra.gmra.mrb[52].mxu1 %v5123_v47  ;;  %6228 = vst [vmem:[#allocation18_spill] sm:$0xff] %v5175_v34 }
 0x680   :  { %2129 = vmatpush1.bf16.msra.mxu0 %v4944_v3  ;;  %2170 = vmatpush1.bf16.msra.mxu1 %v4947_v30 }
 0x681   :  { %2130 = vmatprep.subr.bf16.mxu0 %v4950_v58  ;;  %2171 = vmatprep.subr.bf16.mxu1 %v4953_v43 }
 0x682   :  { %2160 = vmatprep.mubr.bf16.mxu0 %v6027_v52  ;;  %2201 = vmatprep.mubr.bf16.mxu1 %v6027_v52 }
 0x684   :  { %2131 = vmatpush1.bf16.msra.mxu0 %v4958_v41  ;;  %2172 = vmatpush1.bf16.msra.mxu1 %v4961_v31 }
 0x685   :  { %2132 = vmatprep.subr.bf16.mxu0 %v4964_v14  ;;  %2173 = vmatprep.subr.bf16.mxu1 %v4967_v32 }
 0x688   :  { %2133 = vmatpush1.bf16.msra.mxu0 %v4970_v37  ;;  %2174 = vmatpush1.bf16.msra.mxu1 %v4973_v26  ;;  %v3636_v61 = vpop.eup %3635 }
 0x689   :  { %2134 = vmatprep.subr.bf16.mxu0 %v4976_v19  ;;  %2175 = vmatprep.subr.bf16.mxu1 %v4979_v46  ;;  %v1928_v18 = vmul.f32 %v3636_v61, %v3634_v62  ;;  %v5180_v62 = vld [vmem:[#allocation9 + $0x20] ss:$16 sps:$4 sm:$0xff]   ;;  %v5183_v61 = vld [vmem:[#allocation9 + $0x28] ss:$16 sps:$4 sm:$0xff]  }
 0x68a   :  { %6229 = vst [vmem:[#allocation19_spill] sm:$0xff] %v5180_v62  ;;  %6230 = vst [vmem:[#allocation20_spill] sm:$0xff] %v5183_v61 }
 0x68b   :  { %v1929_v50 = vpack.c.bf16 %v1928_v18, %v1928_v18  ;;  %v5186_v18 = vld [vmem:[#allocation9 + $0x44] ss:$16 sps:$4 sm:$0xff]  }
 0x68c   :  { %2135 = vmatpush1.bf16.msra.mxu0 %v4982_v24  ;;  %2176 = vmatpush1.bf16.msra.mxu1 %v6215_v55  ;;  %6231 = vst [vmem:[#allocation46_spill] sm:$0xff] %v5186_v18 }
 0x68d   :  { %2136 = vmatprep.subr.bf16.mxu0 %v6216_v60  ;;  %2177 = vmatprep.subr.bf16.mxu1 %v6217_v33 }
 0x690   :  { %2137 = vmatpush1.bf16.msra.mxu0 %v6218_v38  ;;  %2178 = vmatpush1.bf16.msra.mxu1 %v6219_v12 }
 0x691   :  { %2138 = vmatprep.subr.bf16.mxu0 %v6220_v53  ;;  %2179 = vmatprep.subr.bf16.mxu1 %v6221_v54 }
 0x694   :  { %2139 = vmatpush1.bf16.msra.mxu0 %v6222_v21  ;;  %2180 = vmatpush1.bf16.msra.mxu1 %v6223_v48 }
 0x695   :  { %2140 = vmatprep.subr.bf16.mxu0 %v6224_v59  ;;  %2181 = vmatprep.subr.bf16.mxu1 %v6225_v35 }
 0x698   :  { %2141 = vmatpush1.bf16.msra.mxu0 %v6226_v56  ;;  %2182 = vmatpush1.bf16.msra.mxu1 %v5022_v36 }
 0x699   :  { %2142 = vmatprep.subr.bf16.mxu0 %v5025_v25  ;;  %2183 = vmatprep.subr.bf16.mxu1 %v5028_v27 }
 0x69c   :  { %2143 = vmatpush1.bf16.msra.mxu0 %v5031_v57  ;;  %2184 = vmatpush1.bf16.msra.mxu1 %v5034_v23 }
 0x69d   :  { %2244 = vmatprep.subr.bf16.mxu0 %v5160_v8  ;;  %2285 = vmatprep.subr.bf16.mxu1 %v5163_v63 }
 0x69f   :  { %2161 = vmatmul.mubr.bf16.vlgmr.msra.gmra.mrb[56].mxu0 %v1929_v50  ;;  %2202 = vmatmul.mubr.bf16.vlgmr.msra.gmra.mrb[56].mxu1 %v1929_v50  ;;  %v5189_v50 = vld [vmem:[#allocation9 + $0x4c] ss:$16 sps:$4 sm:$0xff]  }
 0x6a0   :  { %2245 = vmatpush1.bf16.msra.mxu0 %v5166_v7  ;;  %2286 = vmatpush1.bf16.msra.mxu1 %v5169_v17  ;;  %6232 = vst [vmem:[#allocation47_spill] sm:$0xff] %v5189_v50 }
 0x6a1   :  { %2246 = vmatprep.subr.bf16.mxu0 %v5172_v40  ;;  %2287 = vmatprep.subr.bf16.mxu1 %v5175_v34  ;;  %v5192_v34 = vld [vmem:[#allocation9 + $0x40] ss:$16 sps:$4 sm:$0xff]   ;;  %v5195_v40 = vld [vmem:[#allocation9 + $0x48] ss:$16 sps:$4 sm:$0xff]  }
 0x6a2   :  { %2276 = vmatprep.mubr.bf16.mxu0 %v6027_v52  ;;  %2317 = vmatprep.mubr.bf16.mxu1 %v6027_v52  ;;  %6233 = vst [vmem:[#allocation48_spill] sm:$0xff] %v5192_v34  ;;  %6234 = vst [vmem:[#allocation49_spill] sm:$0xff] %v5195_v40 }
 0x6a4   :  { %2247 = vmatpush1.bf16.msra.mxu0 %v5180_v62  ;;  %2288 = vmatpush1.bf16.msra.mxu1 %v5183_v61  ;;  %v5198_v62 = vld [vmem:[#allocation9 + $0x64] ss:$16 sps:$4 sm:$0xff]   ;;  %v5201_v61 = vld [vmem:[#allocation9 + $0x6c] ss:$16 sps:$4 sm:$0xff]  }
 0x6a5   :  { %2248 = vmatprep.subr.bf16.mxu0 %v5186_v18  ;;  %2289 = vmatprep.subr.bf16.mxu1 %v5189_v50  ;;  %6235 = vst [vmem:[#allocation50_spill] sm:$0xff] %v5198_v62  ;;  %6236 = vst [vmem:[#allocation51_spill] sm:$0xff] %v5201_v61  ;;  %v5204_v18 = vld [vmem:[#allocation9 + $0x60] ss:$16 sps:$4 sm:$0xff]   ;;  %v5207_v50 = vld [vmem:[#allocation9 + $0x68] ss:$16 sps:$4 sm:$0xff]  }
 0x6a6   :  { %6237 = vst [vmem:[#allocation52_spill] sm:$0xff] %v5207_v50 }
 0x6a8   :  { %2249 = vmatpush1.bf16.msra.mxu0 %v5192_v34  ;;  %2290 = vmatpush1.bf16.msra.mxu1 %v5195_v40  ;;  %v5210_v34 = vld [vmem:[#allocation9 + $0x84] ss:$16 sps:$4 sm:$0xff]   ;;  %v5213_v40 = vld [vmem:[#allocation9 + $0x8c] ss:$16 sps:$4 sm:$0xff]  }
 0x6a9   :  { %2250 = vmatprep.subr.bf16.mxu0 %v5198_v62  ;;  %2291 = vmatprep.subr.bf16.mxu1 %v5201_v61  ;;  %6238 = vst [vmem:[#allocation53_spill] sm:$0xff] %v5210_v34  ;;  %v5216_v62 = vld [vmem:[#allocation9 + $0x80] ss:$16 sps:$4 sm:$0xff]   ;;  %v5220_v61 = vld [vmem:[#allocation9 + $0xa4] ss:$16 sps:$4 sm:$0xff]  }
 0x6aa   :  { %6239 = vst [vmem:[#allocation54_spill] sm:$0xff] %v5220_v61 }
 0x6ac   :  { %2251 = vmatpush1.bf16.msra.mxu0 %v5204_v18  ;;  %2292 = vmatpush1.bf16.msra.mxu1 %v5207_v50  ;;  %v5224_v50 = vld [vmem:[#allocation9 + $0xa0] ss:$16 sps:$4 sm:$0xff]  }
 0x6ad   :  { %2252 = vmatprep.subr.bf16.mxu0 %v5210_v34  ;;  %2293 = vmatprep.subr.bf16.mxu1 %v5213_v40  ;;  %6240 = vst [vmem:[#allocation58_spill] sm:$0xff] %v5224_v50  ;;  %v5228_v34 = vld [vmem:[#allocation9 + $0xc4] ss:$16 sps:$4 sm:$0xff]  }
 0x6ae   :  { %6241 = vst [vmem:[#allocation59_spill] sm:$0xff] %v5228_v34 }
 0x6b0   :  { %2253 = vmatpush1.bf16.msra.mxu0 %v5216_v62  ;;  %2294 = vmatpush1.bf16.msra.mxu1 %v4787_v20  ;;  %v6242_v20 = vld [vmem:[#allocation21_spill] sm:$0xff] }
 0x6b1   :  { %2254 = vmatprep.subr.bf16.mxu0 %v5220_v61  ;;  %2295 = vmatprep.subr.bf16.mxu1 %v4791_v2  ;;  %v6243_v2 = vld [vmem:[#allocation22_spill] sm:$0xff]  ;;  %v6268_v61 = vld [vmem:[#allocation56_spill] sm:$0xff] }
 0x6b4   :  { %2255 = vmatpush1.bf16.msra.mxu0 %v5224_v50  ;;  %2296 = vmatpush1.bf16.msra.mxu1 %v4795_v4  ;;  %v6244_v4 = vld [vmem:[#allocation23_spill] sm:$0xff] }
 0x6b5   :  { %2256 = vmatprep.subr.bf16.mxu0 %v5228_v34  ;;  %2297 = vmatprep.subr.bf16.mxu1 %v4799_v1  ;;  %v6245_v1 = vld [vmem:[#allocation24_spill] sm:$0xff] }
 0x6b8   :  { %2257 = vmatpush1.bf16.msra.mxu0 %v4802_v51  ;;  %2298 = vmatpush1.bf16.msra.mxu1 %v4805_v0  ;;  %v6246_v51 = vld [vmem:[#allocation25_spill] sm:$0xff]  ;;  %v6247_v0 = vld [vmem:[#allocation26_spill] sm:$0xff] }
 0x6b9   :  { %2258 = vmatprep.subr.bf16.mxu0 %v4808_v15  ;;  %2299 = vmatprep.subr.bf16.mxu1 %v4811_v16  ;;  %v6248_v15 = vld [vmem:[#allocation27_spill] sm:$0xff]  ;;  %v6249_v16 = vld [vmem:[#allocation28_spill] sm:$0xff] }
 0x6bc   :  { %2259 = vmatpush1.bf16.msra.mxu0 %v4814_v22  ;;  %2300 = vmatpush1.bf16.msra.mxu1 %v4817_v13  ;;  %v6250_v22 = vld [vmem:[#allocation29_spill] sm:$0xff]  ;;  %v6251_v13 = vld [vmem:[#allocation30_spill] sm:$0xff] }
 0x6bd   :  { %2355 = vmatprep.subr.bf16.mxu0 %v4820_v42  ;;  %2396 = vmatprep.subr.bf16.mxu1 %v4823_v28  ;;  %v6252_v42 = vld [vmem:[#allocation31_spill] sm:$0xff]  ;;  %v6253_v28 = vld [vmem:[#allocation32_spill] sm:$0xff] }
 0x6bf   :  { %2277 = vmatmul.mubr.bf16.vlgmr.msra.gmra.mrb[60].mxu0 %v5123_v47  ;;  %2318 = vmatmul.mubr.bf16.vlgmr.msra.gmra.mrb[60].mxu1 %v5123_v47  ;;  %v6261_v47 = vld [vmem:[#allocation40_spill] sm:$0xff] }
 0x6c0   :  { %2356 = vmatpush1.bf16.msra.mxu0 %v4828_v29  ;;  %2397 = vmatpush1.bf16.msra.mxu1 %v4831_v39  ;;  %v6254_v29 = vld [vmem:[#allocation33_spill] sm:$0xff]  ;;  %v6255_v39 = vld [vmem:[#allocation34_spill] sm:$0xff] }
 0x6c1   :  { %2357 = vmatprep.subr.bf16.mxu0 %v4834_v10  ;;  %2398 = vmatprep.subr.bf16.mxu1 %v6183_v9  ;;  %v6256_v10 = vld [vmem:[#allocation35_spill] sm:$0xff]  ;;  %v6257_v9 = vld [vmem:[#allocation36_spill] sm:$0xff] }
 0x6c2   :  { %2387 = vmatprep.mubr.bf16.mxu0 %v6027_v52  ;;  %2428 = vmatprep.mubr.bf16.mxu1 %v6027_v52 }
 0x6c4   :  { %2358 = vmatpush1.bf16.msra.mxu0 %v6184_v6  ;;  %2399 = vmatpush1.bf16.msra.mxu1 %v6185_v5  ;;  %v6258_v6 = vld [vmem:[#allocation37_spill] sm:$0xff]  ;;  %v6259_v5 = vld [vmem:[#allocation38_spill] sm:$0xff] }
 0x6c5   :  { %2359 = vmatprep.subr.bf16.mxu0 %v6186_v49  ;;  %2400 = vmatprep.subr.bf16.mxu1 %v6242_v20  ;;  %v6260_v49 = vld [vmem:[#allocation39_spill] sm:$0xff]  ;;  %v6262_v20 = vld [vmem:[#allocation41_spill] sm:$0xff] }
 0x6c8   :  { %2360 = vmatpush1.bf16.msra.mxu0 %v6243_v2  ;;  %2401 = vmatpush1.bf16.msra.mxu1 %v6244_v4  ;;  %v6263_v2 = vld [vmem:[#allocation42_spill] sm:$0xff]  ;;  %v6264_v4 = vld [vmem:[#allocation43_spill] sm:$0xff] }
 0x6c9   :  { %2361 = vmatprep.subr.bf16.mxu0 %v6245_v1  ;;  %2402 = vmatprep.subr.bf16.mxu1 %v6246_v51  ;;  %v6265_v1 = vld [vmem:[#allocation44_spill] sm:$0xff]  ;;  %v6266_v51 = vld [vmem:[#allocation45_spill] sm:$0xff] }
 0x6cc   :  { %2362 = vmatpush1.bf16.msra.mxu0 %v6247_v0  ;;  %2403 = vmatpush1.bf16.msra.mxu1 %v6248_v15 }
 0x6cd   :  { %2363 = vmatprep.subr.bf16.mxu0 %v6249_v16  ;;  %2404 = vmatprep.subr.bf16.mxu1 %v6250_v22 }
 0x6d0   :  { %2364 = vmatpush1.bf16.msra.mxu0 %v6251_v13  ;;  %2405 = vmatpush1.bf16.msra.mxu1 %v6252_v42 }
 0x6d1   :  { %2365 = vmatprep.subr.bf16.mxu0 %v6253_v28  ;;  %2406 = vmatprep.subr.bf16.mxu1 %v6254_v29 }
 0x6d4   :  { %2366 = vmatpush1.bf16.msra.mxu0 %v6255_v39  ;;  %2407 = vmatpush1.bf16.msra.mxu1 %v6256_v10 }
 0x6d5   :  { %2367 = vmatprep.subr.bf16.mxu0 %v6257_v9  ;;  %2408 = vmatprep.subr.bf16.mxu1 %v6258_v6 }
 0x6d8   :  { %2368 = vmatpush1.bf16.msra.mxu0 %v6259_v5  ;;  %2409 = vmatpush1.bf16.msra.mxu1 %v6260_v49 }
 0x6d9   :  { %2369 = vmatprep.subr.bf16.mxu0 %v6261_v47  ;;  %2410 = vmatprep.subr.bf16.mxu1 %v6262_v20 }
 0x6dc   :  { %2370 = vmatpush1.bf16.msra.mxu0 %v6263_v2  ;;  %2411 = vmatpush1.bf16.msra.mxu1 %v6264_v4 }
 0x6dd   :  { %2437 = vmatprep.subr.bf16.mxu0 %v6265_v1  ;;  %2478 = vmatprep.subr.bf16.mxu1 %v6266_v51  ;;  %v6267_v1 = vld [vmem:[#allocation55_spill] sm:$0xff] }
 0x752   :  { %v2080_v0 = vpop.f32.mrb[52].mxu0  ;;  %v2121_v15 = vpop.f32.mrb[52].mxu1 }
 0x753   :  { %v2082_v16 = vpop.f32.mrb[53].mxu0  ;;  %v2123_v22 = vpop.f32.mrb[53].mxu1 }
 0x754   :  { %v2084_v13 = vpop.f32.mrb[54].mxu0  ;;  %v2125_v42 = vpop.f32.mrb[54].mxu1 }
 0x755   :  { %v2085_v28 = vpop.f32.mrb[55].mxu0  ;;  %v2126_v29 = vpop.f32.mrb[55].mxu1 }
 0x756   :  { %v6269_v29 = vld [vmem:[#allocation57_spill] sm:$0xff] }
 0x772   :  { %v2162_v39 = vpop.f32.mrb[56].mxu0  ;;  %v2203_v10 = vpop.f32.mrb[56].mxu1 }
 0x773   :  { %v2163_v9 = vadd.f32 %v2162_v39, %v2080_v0  ;;  %v2204_v6 = vadd.f32 %v2203_v10, %v2121_v15  ;;  %v2164_v5 = vpop.f32.mrb[57].mxu0  ;;  %v2205_v49 = vpop.f32.mrb[57].mxu1 }
 0x774   :  { %v2165_v47 = vadd.f32 %v2164_v5, %v2082_v16  ;;  %v5276_v20 = vadd.f32 %v2205_v49, %v2123_v22  ;;  %v2166_v2 = vpop.f32.mrb[58].mxu0  ;;  %v2207_v4 = vpop.f32.mrb[58].mxu1  ;;  %v2241_v49 = vld [vmem:[#allocation7 + $0xa8] sm:$0xff] }
 0x775   :  { %v2210_v51 = vadd.f32 %v2163_v9, %v6267_v1  ;;  %v2167_v34 = vpop.f32.mrb[59].mxu0  ;;  %v2208_v50 = vpop.f32.mrb[59].mxu1  ;;  %v2212_v0 = vadd.f32 %v2204_v6, %v6269_v29  ;;  %v2240_v9 = vld [vmem:[#allocation7 + $0xa0] sm:$0xff] }
 0x776   :  { %v2211_v13 = vadd.f32 %v2165_v47, %v6268_v61  ;;  %v2243_v61 = vld [vmem:[#allocation7 + $0xb8] sm:$0xff] }
 0x777   :  { %v3317_v42 = vmul.f32 -1.442695, %v2210_v51 }
 0x778   :  { %v3318_v28 = vmul.f32 -1.442695, %v2211_v13 }
 0x779   :  { %3637 = vpow2.f32 %v3317_v42 }
 0x77a   :  { %3639 = vpow2.f32 %v3318_v28 }
 0x77b   :  { %3641 = vtanh.f32 %v2212_v0 }
 0x783   :  { %v3638_v15 = vpop.eup %3637 }
 0x784   :  { %v3640_v39 = vpop.eup %3639  ;;  %v2217_v10 = vadd.f32 1.0, %v3638_v15 }
 0x785   :  { %v2223_v16 = vadd.f32 1.0, %v3640_v39  ;;  %v3642_v22 = vpop.eup %3641 }
 0x786   :  { %3643 = vrcp.f32 %v2217_v10 }
 0x787   :  { %3645 = vrcp.f32 %v2223_v16 }
 0x790   :  { %v3644_v5 = vpop.eup %3643 }
 0x791   :  { %v3646_v34 = vpop.eup %3645  ;;  %v2234_v50 = vmul.f32 %v3644_v5, %v3642_v22  ;;  %v2242_v5 = vld [vmem:[#allocation7 + $0xb0] sm:$0xff] }
 0x792   :  { %v2233_v47 = vmul.f32 %v3646_v34, %v5115_v45  ;;  %v2278_v2 = vpop.f32.mrb[60].mxu0  ;;  %v2319_v4 = vpop.f32.mrb[60].mxu1 }
 0x793   :  { %v2326_v51 = vadd.f32 %v2278_v2, %v2240_v9  ;;  %v2280_v13 = vpop.f32.mrb[61].mxu0  ;;  %v2321_v6 = vpop.f32.mrb[61].mxu1  ;;  %v2328_v34 = vadd.f32 %v2319_v4, %v2242_v5  ;;  %v5392_v5 = vld [vmem:[#allocation11 + $0x8] ss:$16 sps:$4 sm:$0xff]  }
 0x794   :  { %v5282_v42 = vadd.f32 %v2234_v50, %v2233_v47  ;;  %v2327_v28 = vadd.f32 %v2280_v13, %v2241_v49  ;;  %v2282_v0 = vpop.f32.mrb[62].mxu0  ;;  %v2323_v15 = vpop.f32.mrb[62].mxu1  ;;  %v2329_v22 = vadd.f32 %v2321_v6, %v2243_v61 }
 0x795   :  { %v3320_v39 = vmul.f32 -1.442695, %v2326_v51  ;;  %v2283_v10 = vpop.f32.mrb[63].mxu0  ;;  %v2324_v16 = vpop.f32.mrb[63].mxu1 }
 0x796   :  { %v3321_v29 = vmul.f32 -1.442695, %v2327_v28  ;;  %v3322_v45 = vmul.f32 -1.442695, %v2329_v22  ;;  %v5384_v16 = vld [vmem:[#allocation11 + $0xc] ss:$16 sps:$4 sm:$0xff]  }
 0x797   :  { %3647 = vpow2.f32 %v3320_v39  ;;  %v5389_v22 = vld [vmem:[#allocation11] ss:$16 sps:$4 sm:$0xff]  }
 0x798   :  { %3649 = vpow2.f32 %v3321_v29 }
 0x799   :  { %3651 = vpow2.f32 %v3322_v45  ;;  %v5395_v45 = vld [vmem:[#allocation11 + $0x24] ss:$16 sps:$4 sm:$0xff]  }
 0x79a   :  { %3653 = vtanh.f32 %v2328_v34  ;;  %v5398_v34 = vld [vmem:[#allocation11 + $0x2c] ss:$16 sps:$4 sm:$0xff]  }
 0x79b   :  { %6285 = vst [vmem:[#allocation60_spill] sm:$0xff] %v5398_v34 }
 0x7a1   :  { %v3648_v1 = vpop.eup %3647 }
 0x7a2   :  { %v3650_v9 = vpop.eup %3649  ;;  %v2333_v2 = vadd.f32 1.0, %v3648_v1  ;;  %v2213_v1 = vadd.f32 %v5276_v20, %v4558_v44  ;;  %v5381_v20 = vld [vmem:[#allocation11 + $0x4] ss:$16 sps:$4 sm:$0xff]  }
 0x7a3   :  { %v2339_v50 = vadd.f32 1.0, %v3650_v9  ;;  %v3652_v49 = vpop.eup %3651  ;;  %v5403_v9 = vld [vmem:[#allocation11 + $0x20] ss:$16 sps:$4 sm:$0xff]  }
 0x7a4   :  { %3655 = vrcp.f32 %v2333_v2  ;;  %v3654_v47 = vpop.eup %3653  ;;  %v2346_v0 = vadd.f32 1.0, %v3652_v49  ;;  %v3319_v6 = vmul.f32 -1.442695, %v2213_v1  ;;  %6286 = vst [vmem:[#allocation21_spill] sm:$0xff] %v5403_v9  ;;  %v5406_v2 = vld [vmem:[#allocation11 + $0x28] ss:$16 sps:$4 sm:$0xff]  }
 0x7a5   :  { %3657 = vrcp.f32 %v2339_v50  ;;  %6287 = vst [vmem:[#allocation22_spill] sm:$0xff] %v5406_v2  ;;  %v5409_v50 = vld [vmem:[#allocation11 + $0x44] ss:$16 sps:$4 sm:$0xff]   ;;  %v5412_v49 = vld [vmem:[#allocation11 + $0x4c] ss:$16 sps:$4 sm:$0xff]  }
 0x7a6   :  { %3659 = vrcp.f32 %v2346_v0  ;;  %6288 = vst [vmem:[#allocation23_spill] sm:$0xff] %v5409_v50  ;;  %6289 = vst [vmem:[#allocation24_spill] sm:$0xff] %v5412_v49  ;;  %v5427_v0 = vld [vmem:[#allocation11 + $0x60] ss:$16 sps:$4 sm:$0xff]   ;;  %v5433_v1 = vld [vmem:[#allocation11 + $0x84] ss:$16 sps:$4 sm:$0xff]  }
 0x7a7   :  { %6294 = vst [vmem:[#allocation29_spill] sm:$0xff] %v5427_v0  ;;  %6296 = vst [vmem:[#allocation31_spill] sm:$0xff] %v5433_v1 }
 0x7ae   :  { %v3656_v51 = vpop.eup %3655 }
 0x7af   :  { %v3658_v13 = vpop.eup %3657  ;;  %v2350_v28 = vmul.f32 %v3656_v51, %v3654_v47  ;;  %v5415_v47 = vld [vmem:[#allocation11 + $0x40] ss:$16 sps:$4 sm:$0xff]   ;;  %v5418_v51 = vld [vmem:[#allocation11 + $0x48] ss:$16 sps:$4 sm:$0xff]  }
 0x7b0   :  { %v2349_v29 = vmul.f32 %v3658_v13, %v5118_v11  ;;  %v3660_v4 = vpop.eup %3659  ;;  %6290 = vst [vmem:[#allocation25_spill] sm:$0xff] %v5415_v47  ;;  %6291 = vst [vmem:[#allocation26_spill] sm:$0xff] %v5418_v51  ;;  %v5421_v13 = vld [vmem:[#allocation11 + $0x64] ss:$16 sps:$4 sm:$0xff]  }
 0x7b1   :  { %6292 = vst [vmem:[#allocation27_spill] sm:$0xff] %v5421_v13 }
 0x7b2   :  { %v5285_v61 = vadd.f32 %v2350_v28, %v2349_v29  ;;  %v5424_v28 = vld [vmem:[#allocation11 + $0x6c] ss:$16 sps:$4 sm:$0xff]   ;;  %v5430_v29 = vld [vmem:[#allocation11 + $0x68] ss:$16 sps:$4 sm:$0xff]  }
 0x7b3   :  { %6293 = vst [vmem:[#allocation28_spill] sm:$0xff] %v5424_v28  ;;  %6295 = vst [vmem:[#allocation30_spill] sm:$0xff] %v5430_v29 }
 0x7b4   :  { %3661 = vtanh.f32 %v5285_v61 }
 0x7b5   :  { %3663 = vpow2.f32 %v3319_v6  ;;  %v5439_v6 = vld [vmem:[#allocation11 + $0x80] ss:$16 sps:$4 sm:$0xff]  }
 0x7b6   :  { %3665 = vtanh.f32 %v5282_v42  ;;  %6298 = vst [vmem:[#allocation33_spill] sm:$0xff] %v5439_v6 }
 0x7be   :  { %v3662_v15 = vpop.eup %3661 }
 0x7bf   :  { %v2353_v39 = vmul.f32 %v3662_v15, %v3660_v4  ;;  %v3664_v11 = vpop.eup %3663  ;;  %v5436_v4 = vld [vmem:[#allocation11 + $0x8c] ss:$16 sps:$4 sm:$0xff]   ;;  %v5442_v15 = vld [vmem:[#allocation11 + $0x88] ss:$16 sps:$4 sm:$0xff]  }
 0x7c0   :  { %6297 = vst [vmem:[#allocation32_spill] sm:$0xff] %v5436_v4  ;;  %6299 = vst [vmem:[#allocation34_spill] sm:$0xff] %v5442_v15 }
 0x7c1   :  { %v5290_v10 = vpack.c.bf16 %v2353_v39, %v2353_v39  ;;  %v5445_v39 = vld [vmem:[#allocation11 + $0xa4] ss:$16 sps:$4 sm:$0xff]  }
 0x7c2   :  { %6300 = vst [vmem:[#allocation35_spill] sm:$0xff] %v5445_v39 }
 0x7c3   :  { %2388 = vmatmul.mubr.bf16.vlgmr.msra.gmra.mrb[64].mxu0 %v5290_v10  ;;  %2429 = vmatmul.mubr.bf16.vlgmr.msra.gmra.mrb[64].mxu1 %v5290_v10 }
 0x7c4   :  { %2438 = vmatpush1.bf16.msra.mxu0 %v4944_v3  ;;  %2479 = vmatpush1.bf16.msra.mxu1 %v4947_v30  ;;  %v2230_v3 = vadd.f32 1.0, %v3664_v11  ;;  %v3666_v30 = vpop.eup %3665  ;;  %v5451_v11 = vld [vmem:[#allocation11 + $0xa0] ss:$16 sps:$4 sm:$0xff]  }
 0x7c5   :  { %2439 = vmatprep.subr.bf16.mxu0 %v4950_v58  ;;  %2480 = vmatprep.subr.bf16.mxu1 %v4953_v43  ;;  %6302 = vst [vmem:[#allocation37_spill] sm:$0xff] %v5451_v11 }
 0x7c6   :  { %2469 = vmatprep.mubr.bf16.mxu0 %v6027_v52  ;;  %2510 = vmatprep.mubr.bf16.mxu1 %v6027_v52  ;;  %3667 = vrcp.f32 %v2230_v3  ;;  %v5454_v3 = vld [vmem:[#allocation11 + $0xa8] ss:$16 sps:$4 sm:$0xff]  }
 0x7c7   :  { %6303 = vst [vmem:[#allocation38_spill] sm:$0xff] %v5454_v3 }
 0x7c8   :  { %2440 = vmatpush1.bf16.msra.mxu0 %v4958_v41  ;;  %2481 = vmatpush1.bf16.msra.mxu1 %v4961_v31  ;;  %v6270_v31 = vld [vmem:[#allocation17_spill] sm:$0xff] }
 0x7c9   :  { %2441 = vmatprep.subr.bf16.mxu0 %v4964_v14  ;;  %2482 = vmatprep.subr.bf16.mxu1 %v4967_v32  ;;  %v6271_v14 = vld [vmem:[#allocation18_spill] sm:$0xff]  ;;  %v6272_v32 = vld [vmem:[#allocation19_spill] sm:$0xff] }
 0x7cc   :  { %2442 = vmatpush1.bf16.msra.mxu0 %v4970_v37  ;;  %2483 = vmatpush1.bf16.msra.mxu1 %v4973_v26  ;;  %v6273_v37 = vld [vmem:[#allocation20_spill] sm:$0xff]  ;;  %v6274_v26 = vld [vmem:[#allocation46_spill] sm:$0xff] }
 0x7cd   :  { %2443 = vmatprep.subr.bf16.mxu0 %v4976_v19  ;;  %2484 = vmatprep.subr.bf16.mxu1 %v4979_v46  ;;  %v6275_v19 = vld [vmem:[#allocation47_spill] sm:$0xff]  ;;  %v6276_v46 = vld [vmem:[#allocation48_spill] sm:$0xff] }
 0x7d0   :  { %2444 = vmatpush1.bf16.msra.mxu0 %v4982_v24  ;;  %2485 = vmatpush1.bf16.msra.mxu1 %v6215_v55  ;;  %v3668_v58 = vpop.eup %3667  ;;  %v6277_v24 = vld [vmem:[#allocation49_spill] sm:$0xff]  ;;  %v6282_v55 = vld [vmem:[#allocation54_spill] sm:$0xff] }
 0x7d1   :  { %2445 = vmatprep.subr.bf16.mxu0 %v6216_v60  ;;  %2486 = vmatprep.subr.bf16.mxu1 %v6217_v33  ;;  %v2237_v43 = vmul.f32 %v3668_v58, %v3666_v30  ;;  %v5352_v60 = vld [vmem:[#allocation9 + $0xac] ss:$16 sps:$4 sm:$0xff]   ;;  %v5457_v30 = vld [vmem:[#allocation11 + $0xc4] ss:$16 sps:$4 sm:$0xff]  }
 0x7d2   :  { %v6283_v33 = vld [vmem:[#allocation58_spill] sm:$0xff]  ;;  %6304 = vst [vmem:[#allocation39_spill] sm:$0xff] %v5457_v30 }
 0x7d3   :  { %v2238_v41 = vpack.c.bf16 %v2237_v43, %v2237_v43  ;;  %v5460_v58 = vld [vmem:[#allocation11 + $0xcc] ss:$16 sps:$4 sm:$0xff]   ;;  %v5463_v43 = vld [vmem:[#allocation11 + $0xc0] ss:$16 sps:$4 sm:$0xff]  }
 0x7d4   :  { %2446 = vmatpush1.bf16.msra.mxu0 %v6218_v38  ;;  %2487 = vmatpush1.bf16.msra.mxu1 %v6219_v12  ;;  %v5356_v38 = vld [vmem:[#allocation9 + $0xa8] ss:$16 sps:$4 sm:$0xff]   ;;  %v6284_v12 = vld [vmem:[#allocation59_spill] sm:$0xff]  ;;  %6305 = vst [vmem:[#allocation40_spill] sm:$0xff] %v5460_v58  ;;  %6306 = vst [vmem:[#allocation41_spill] sm:$0xff] %v5463_v43 }
 0x7d5   :  { %2447 = vmatprep.subr.bf16.mxu0 %v6220_v53  ;;  %2488 = vmatprep.subr.bf16.mxu1 %v6221_v54  ;;  %v5360_v53 = vld [vmem:[#allocation9 + $0xcc] ss:$16 sps:$4 sm:$0xff]   ;;  %v5363_v54 = vld [vmem:[#allocation9 + $0xc0] ss:$16 sps:$4 sm:$0xff]  }
 0x7d8   :  { %2448 = vmatpush1.bf16.msra.mxu0 %v6222_v21  ;;  %2489 = vmatpush1.bf16.msra.mxu1 %v6223_v48  ;;  %v5366_v21 = vld [vmem:[#allocation9 + $0xc8] ss:$16 sps:$4 sm:$0xff]   ;;  %v5369_v48 = vld [vmem:[#allocation9 + $0xe4] ss:$16 sps:$4 sm:$0xff]  }
 0x7d9   :  { %2449 = vmatprep.subr.bf16.mxu0 %v6224_v59  ;;  %2490 = vmatprep.subr.bf16.mxu1 %v6225_v35  ;;  %v5372_v59 = vld [vmem:[#allocation9 + $0xec] ss:$16 sps:$4 sm:$0xff]   ;;  %v5375_v35 = vld [vmem:[#allocation9 + $0xe0] ss:$16 sps:$4 sm:$0xff]  }
 0x7dc   :  { %2450 = vmatpush1.bf16.msra.mxu0 %v6226_v56  ;;  %2491 = vmatpush1.bf16.msra.mxu1 %v5022_v36  ;;  %v6280_v36 = vld [vmem:[#allocation52_spill] sm:$0xff] }
 0x7dd   :  { %2451 = vmatprep.subr.bf16.mxu0 %v5025_v25  ;;  %2492 = vmatprep.subr.bf16.mxu1 %v5028_v27  ;;  %v6281_v25 = vld [vmem:[#allocation53_spill] sm:$0xff]  ;;  %v5348_v27 = vld [vmem:[#allocation9 + $0x88] ss:$16 sps:$4 sm:$0xff]  }
 0x7de   :  { %v5378_v56 = vld [vmem:[#allocation9 + $0xe8] ss:$16 sps:$4 sm:$0xff]  }
 0x7e0   :  { %2452 = vmatpush1.bf16.msra.mxu0 %v5031_v57  ;;  %2493 = vmatpush1.bf16.msra.mxu1 %v5034_v23  ;;  %v6278_v23 = vld [vmem:[#allocation50_spill] sm:$0xff]  ;;  %v6279_v57 = vld [vmem:[#allocation51_spill] sm:$0xff] }
 0x7e1   :  { %2553 = vmatprep.subr.bf16.mxu0 %v5160_v8  ;;  %2594 = vmatprep.subr.bf16.mxu1 %v5163_v63 }
 0x7e3   :  { %2470 = vmatmul.mubr.bf16.vlgmr.msra.gmra.mrb[68].mxu0 %v2238_v41  ;;  %2511 = vmatmul.mubr.bf16.vlgmr.msra.gmra.mrb[68].mxu1 %v2238_v41  ;;  %v5466_v41 = vld [vmem:[#allocation11 + $0xc8] ss:$16 sps:$4 sm:$0xff]  }
 0x7e4   :  { %2554 = vmatpush1.bf16.msra.mxu0 %v5166_v7  ;;  %2595 = vmatpush1.bf16.msra.mxu1 %v5169_v17  ;;  %6307 = vst [vmem:[#allocation42_spill] sm:$0xff] %v5466_v41 }
 0x7e5   :  { %2555 = vmatprep.subr.bf16.mxu0 %v6270_v31  ;;  %2596 = vmatprep.subr.bf16.mxu1 %v6271_v14 }
 0x7e6   :  { %2585 = vmatprep.mubr.bf16.mxu0 %v6027_v52  ;;  %2626 = vmatprep.mubr.bf16.mxu1 %v6027_v52 }
 0x7e8   :  { %2556 = vmatpush1.bf16.msra.mxu0 %v6272_v32  ;;  %2597 = vmatpush1.bf16.msra.mxu1 %v6273_v37 }
 0x7e9   :  { %2557 = vmatprep.subr.bf16.mxu0 %v6274_v26  ;;  %2598 = vmatprep.subr.bf16.mxu1 %v6275_v19 }
 0x7ec   :  { %2558 = vmatpush1.bf16.msra.mxu0 %v6276_v46  ;;  %2599 = vmatpush1.bf16.msra.mxu1 %v6277_v24 }
 0x7ed   :  { %2559 = vmatprep.subr.bf16.mxu0 %v6278_v23  ;;  %2600 = vmatprep.subr.bf16.mxu1 %v6279_v57 }
 0x7f0   :  { %2560 = vmatpush1.bf16.msra.mxu0 %v5204_v18  ;;  %2601 = vmatpush1.bf16.msra.mxu1 %v6280_v36 }
 0x7f1   :  { %2561 = vmatprep.subr.bf16.mxu0 %v6281_v25  ;;  %2602 = vmatprep.subr.bf16.mxu1 %v5213_v40 }
 0x7f4   :  { %2562 = vmatpush1.bf16.msra.mxu0 %v5216_v62  ;;  %2603 = vmatpush1.bf16.msra.mxu1 %v5348_v27 }
 0x7f5   :  { %2563 = vmatprep.subr.bf16.mxu0 %v6282_v55  ;;  %2604 = vmatprep.subr.bf16.mxu1 %v5352_v60 }
 0x7f8   :  { %2564 = vmatpush1.bf16.msra.mxu0 %v6283_v33  ;;  %2605 = vmatpush1.bf16.msra.mxu1 %v5356_v38 }
 0x7f9   :  { %2565 = vmatprep.subr.bf16.mxu0 %v6284_v12  ;;  %2606 = vmatprep.subr.bf16.mxu1 %v5360_v53 }
 0x7fc   :  { %2566 = vmatpush1.bf16.msra.mxu0 %v5363_v54  ;;  %2607 = vmatpush1.bf16.msra.mxu1 %v5366_v21 }
 0x7fd   :  { %2567 = vmatprep.subr.bf16.mxu0 %v5369_v48  ;;  %2608 = vmatprep.subr.bf16.mxu1 %v5372_v59 }
 0x800   :  { %2568 = vmatpush1.bf16.msra.mxu0 %v5375_v35  ;;  %2609 = vmatpush1.bf16.msra.mxu1 %v5378_v56 }
 0x801   :  { %2664 = vmatprep.subr.bf16.mxu0 %v5381_v20  ;;  %2705 = vmatprep.subr.bf16.mxu1 %v5384_v16 }
 0x803   :  { %2586 = vmatmul.mubr.bf16.vlgmr.msra.gmra.mrb[72].mxu0 %v5290_v10  ;;  %2627 = vmatmul.mubr.bf16.vlgmr.msra.gmra.mrb[72].mxu1 %v5290_v10  ;;  %v5448_v10 = vld [vmem:[#allocation11 + $0xac] ss:$16 sps:$4 sm:$0xff]  }
 0x804   :  { %2665 = vmatpush1.bf16.msra.mxu0 %v5389_v22  ;;  %2706 = vmatpush1.bf16.msra.mxu1 %v5392_v5  ;;  %6301 = vst [vmem:[#allocation36_spill] sm:$0xff] %v5448_v10 }
 0x805   :  { %2666 = vmatprep.subr.bf16.mxu0 %v5395_v45  ;;  %2707 = vmatprep.subr.bf16.mxu1 %v5398_v34  ;;  %v6315_v34 = vld [vmem:[#allocation56_spill] sm:$0xff] }
 0x806   :  { %2696 = vmatprep.mubr.bf16.mxu0 %v6027_v52  ;;  %2737 = vmatprep.mubr.bf16.mxu1 %v6027_v52 }
 0x808   :  { %2667 = vmatpush1.bf16.msra.mxu0 %v5403_v9  ;;  %2708 = vmatpush1.bf16.msra.mxu1 %v5406_v2 }
 0x809   :  { %2668 = vmatprep.subr.bf16.mxu0 %v5409_v50  ;;  %2709 = vmatprep.subr.bf16.mxu1 %v5412_v49 }
 0x80c   :  { %2669 = vmatpush1.bf16.msra.mxu0 %v5415_v47  ;;  %2710 = vmatpush1.bf16.msra.mxu1 %v5418_v51 }
 0x80d   :  { %2670 = vmatprep.subr.bf16.mxu0 %v5421_v13  ;;  %2711 = vmatprep.subr.bf16.mxu1 %v5424_v28 }
 0x810   :  { %2671 = vmatpush1.bf16.msra.mxu0 %v5427_v0  ;;  %2712 = vmatpush1.bf16.msra.mxu1 %v5430_v29 }
 0x811   :  { %2672 = vmatprep.subr.bf16.mxu0 %v5433_v1  ;;  %2713 = vmatprep.subr.bf16.mxu1 %v5436_v4 }
 0x814   :  { %2673 = vmatpush1.bf16.msra.mxu0 %v5439_v6  ;;  %2714 = vmatpush1.bf16.msra.mxu1 %v5442_v15 }
 0x815   :  { %2674 = vmatprep.subr.bf16.mxu0 %v5445_v39  ;;  %2715 = vmatprep.subr.bf16.mxu1 %v5448_v10 }
 0x818   :  { %2675 = vmatpush1.bf16.msra.mxu0 %v5451_v11  ;;  %2716 = vmatpush1.bf16.msra.mxu1 %v5454_v3  ;;  %v5469_v11 = vld [vmem:[#allocation11 + $0xe4] ss:$16 sps:$4 sm:$0xff]   ;;  %v5472_v3 = vld [vmem:[#allocation11 + $0xec] ss:$16 sps:$4 sm:$0xff]  }
 0x819   :  { %2676 = vmatprep.subr.bf16.mxu0 %v5457_v30  ;;  %2717 = vmatprep.subr.bf16.mxu1 %v5460_v58  ;;  %6308 = vst [vmem:[#allocation43_spill] sm:$0xff] %v5469_v11  ;;  %6309 = vst [vmem:[#allocation44_spill] sm:$0xff] %v5472_v3  ;;  %v5475_v30 = vld [vmem:[#allocation11 + $0xe0] ss:$16 sps:$4 sm:$0xff]   ;;  %v5478_v58 = vld [vmem:[#allocation11 + $0xe8] ss:$16 sps:$4 sm:$0xff]  }
 0x81a   :  { %6310 = vst [vmem:[#allocation45_spill] sm:$0xff] %v5475_v30  ;;  %6311 = vst [vmem:[#allocation17_spill] sm:$0xff] %v5478_v58 }
 0x81c   :  { %2677 = vmatpush1.bf16.msra.mxu0 %v5463_v43  ;;  %2718 = vmatpush1.bf16.msra.mxu1 %v5466_v41  ;;  %v5481_v43 = vld [vmem:[#allocation12 + $0x4] ss:$16 sps:$4 sm:$0xff]   ;;  %v5484_v41 = vld [vmem:[#allocation12 + $0xc] ss:$16 sps:$4 sm:$0xff]  }
 0x81d   :  { %2678 = vmatprep.subr.bf16.mxu0 %v5469_v11  ;;  %2719 = vmatprep.subr.bf16.mxu1 %v5472_v3  ;;  %6312 = vst [vmem:[#allocation18_spill] sm:$0xff] %v5481_v43  ;;  %6313 = vst [vmem:[#allocation19_spill] sm:$0xff] %v5484_v41 }
 0x820   :  { %2679 = vmatpush1.bf16.msra.mxu0 %v5475_v30  ;;  %2720 = vmatpush1.bf16.msra.mxu1 %v5478_v58 }
 0x821   :  { %2746 = vmatprep.subr.bf16.mxu0 %v5481_v43  ;;  %2787 = vmatprep.subr.bf16.mxu1 %v5484_v41  ;;  %v6314_v41 = vld [vmem:[#allocation55_spill] sm:$0xff] }
 0x896   :  { %v2389_v11 = vpop.f32.mrb[64].mxu0  ;;  %v2430_v10 = vpop.f32.mrb[64].mxu1 }
 0x897   :  { %v2391_v39 = vpop.f32.mrb[65].mxu0  ;;  %v2432_v3 = vpop.f32.mrb[65].mxu1 }
 0x898   :  { %v2393_v15 = vpop.f32.mrb[66].mxu0  ;;  %v2434_v6 = vpop.f32.mrb[66].mxu1 }
 0x899   :  { %v2394_v4 = vpop.f32.mrb[67].mxu0  ;;  %v2435_v30 = vpop.f32.mrb[67].mxu1 }
 0x89a   :  { %v6316_v30 = vld [vmem:[#allocation57_spill] sm:$0xff] }
 0x8b6   :  { %v2471_v1 = vpop.f32.mrb[68].mxu0  ;;  %v2512_v29 = vpop.f32.mrb[68].mxu1 }
 0x8b7   :  { %v2472_v0 = vadd.f32 %v2471_v1, %v2389_v11  ;;  %v2513_v58 = vadd.f32 %v2512_v29, %v2430_v10  ;;  %v2473_v28 = vpop.f32.mrb[69].mxu0  ;;  %v2514_v13 = vpop.f32.mrb[69].mxu1 }
 0x8b8   :  { %v2474_v51 = vadd.f32 %v2473_v28, %v2391_v39  ;;  %v5487_v43 = vadd.f32 %v2514_v13, %v2432_v3  ;;  %v2475_v47 = vpop.f32.mrb[70].mxu0  ;;  %v2516_v49 = vpop.f32.mrb[70].mxu1  ;;  %v2549_v28 = vld [vmem:[#allocation7 + $0xc0] sm:$0xff] }
 0x8b9   :  { %v2519_v50 = vadd.f32 %v2472_v0, %v6314_v41  ;;  %v2476_v2 = vpop.f32.mrb[71].mxu0  ;;  %v2517_v9 = vpop.f32.mrb[71].mxu1  ;;  %v2521_v1 = vadd.f32 %v2513_v58, %v6316_v30  ;;  %v2550_v0 = vld [vmem:[#allocation7 + $0xc8] sm:$0xff] }
 0x8ba   :  { %v2520_v15 = vadd.f32 %v2474_v51, %v6315_v34  ;;  %v2552_v34 = vld [vmem:[#allocation7 + $0xd8] sm:$0xff] }
 0x8bb   :  { %v3323_v6 = vmul.f32 -1.442695, %v2519_v50 }
 0x8bc   :  { %v3324_v4 = vmul.f32 -1.442695, %v2520_v15 }
 0x8bd   :  { %3669 = vpow2.f32 %v3323_v6 }
 0x8be   :  { %3671 = vpow2.f32 %v3324_v4 }
 0x8bf   :  { %3673 = vtanh.f32 %v2521_v1 }
 0x8c7   :  { %v3670_v29 = vpop.eup %3669 }
 0x8c8   :  { %v3672_v10 = vpop.eup %3671  ;;  %v2526_v11 = vadd.f32 1.0, %v3670_v29 }
 0x8c9   :  { %v2532_v13 = vadd.f32 1.0, %v3672_v10  ;;  %v3674_v49 = vpop.eup %3673 }
 0x8ca   :  { %3675 = vrcp.f32 %v2526_v11 }
 0x8cb   :  { %3677 = vrcp.f32 %v2532_v13 }
 0x8d4   :  { %v3676_v47 = vpop.eup %3675 }
 0x8d5   :  { %v3678_v2 = vpop.eup %3677  ;;  %v2543_v9 = vmul.f32 %v3676_v47, %v3674_v49  ;;  %v2551_v47 = vld [vmem:[#allocation7 + $0xd0] sm:$0xff] }
 0x8d6   :  { %v2542_v50 = vmul.f32 %v3678_v2, %v5282_v42  ;;  %v2587_v51 = vpop.f32.mrb[72].mxu0  ;;  %v2628_v39 = vpop.f32.mrb[72].mxu1 }
 0x8d7   :  { %v2635_v3 = vadd.f32 %v2587_v51, %v2549_v28  ;;  %v2589_v15 = vpop.f32.mrb[73].mxu0  ;;  %v2630_v58 = vpop.f32.mrb[73].mxu1  ;;  %v2637_v2 = vadd.f32 %v2628_v39, %v2551_v47  ;;  %v5519_v47 = vld [vmem:[#allocation12 + $0x20] ss:$16 sps:$4 sm:$0xff]  }
 0x8d8   :  { %v5493_v6 = vadd.f32 %v2543_v9, %v2542_v50  ;;  %v2636_v4 = vadd.f32 %v2589_v15, %v2550_v0  ;;  %v2591_v1 = vpop.f32.mrb[74].mxu0  ;;  %v2632_v29 = vpop.f32.mrb[74].mxu1  ;;  %v2638_v49 = vadd.f32 %v2630_v58, %v2552_v34 }
 0x8d9   :  { %v3326_v10 = vmul.f32 -1.442695, %v2635_v3  ;;  %v2592_v11 = vpop.f32.mrb[75].mxu0  ;;  %v2633_v13 = vpop.f32.mrb[75].mxu1 }
 0x8da   :  { %v3327_v30 = vmul.f32 -1.442695, %v2636_v4  ;;  %v3328_v42 = vmul.f32 -1.442695, %v2638_v49  ;;  %v5508_v13 = vld [vmem:[#allocation12 + $0x8] ss:$16 sps:$4 sm:$0xff]  }
 0x8db   :  { %3679 = vpow2.f32 %v3326_v10  ;;  %v5514_v49 = vld [vmem:[#allocation12 + $0x2c] ss:$16 sps:$4 sm:$0xff]  }
 0x8dc   :  { %3681 = vpow2.f32 %v3327_v30 }
 0x8dd   :  { %3683 = vpow2.f32 %v3328_v42  ;;  %v5522_v42 = vld [vmem:[#allocation12 + $0x28] ss:$16 sps:$4 sm:$0xff]  }
 0x8de   :  { %3685 = vtanh.f32 %v2637_v2  ;;  %v5525_v2 = vld [vmem:[#allocation12 + $0x44] ss:$16 sps:$4 sm:$0xff]  }
 0x8e5   :  { %v3680_v41 = vpop.eup %3679 }
 0x8e6   :  { %v3682_v28 = vpop.eup %3681  ;;  %v2642_v51 = vadd.f32 1.0, %v3680_v41  ;;  %v2522_v41 = vadd.f32 %v5487_v43, %v4558_v44  ;;  %v5511_v43 = vld [vmem:[#allocation12 + $0x24] ss:$16 sps:$4 sm:$0xff]  }
 0x8e7   :  { %v2648_v9 = vadd.f32 1.0, %v3682_v28  ;;  %v3684_v0 = vpop.eup %3683  ;;  %v5528_v28 = vld [vmem:[#allocation12 + $0x4c] ss:$16 sps:$4 sm:$0xff]  }
 0x8e8   :  { %3687 = vrcp.f32 %v2642_v51  ;;  %v3686_v50 = vpop.eup %3685  ;;  %v2655_v1 = vadd.f32 1.0, %v3684_v0  ;;  %v3325_v58 = vmul.f32 -1.442695, %v2522_v41  ;;  %v5534_v0 = vld [vmem:[#allocation12 + $0x48] ss:$16 sps:$4 sm:$0xff]  }
 0x8e9   :  { %3689 = vrcp.f32 %v2648_v9  ;;  %v5531_v9 = vld [vmem:[#allocation12 + $0x40] ss:$16 sps:$4 sm:$0xff]   ;;  %v5553_v41 = vld [vmem:[#allocation12 + $0x8c] ss:$16 sps:$4 sm:$0xff]  }
 0x8ea   :  { %3691 = vrcp.f32 %v2655_v1  ;;  %v5546_v1 = vld [vmem:[#allocation12 + $0x68] ss:$16 sps:$4 sm:$0xff]   ;;  %6319 = vst [vmem:[#allocation47_spill] sm:$0xff] %v5553_v41 }
 0x8eb   :  { %6317 = vst [vmem:[#allocation20_spill] sm:$0xff] %v5546_v1 }
 0x8f2   :  { %v3688_v3 = vpop.eup %3687 }
 0x8f3   :  { %v3690_v15 = vpop.eup %3689  ;;  %v2659_v4 = vmul.f32 %v3688_v3, %v3686_v50  ;;  %v5537_v50 = vld [vmem:[#allocation12 + $0x64] ss:$16 sps:$4 sm:$0xff]   ;;  %v5540_v3 = vld [vmem:[#allocation12 + $0x6c] ss:$16 sps:$4 sm:$0xff]  }
 0x8f4   :  { %v2658_v30 = vmul.f32 %v3690_v15, %v5285_v61  ;;  %v3692_v39 = vpop.eup %3691  ;;  %v5505_v61 = vld [vmem:[#allocation12] ss:$16 sps:$4 sm:$0xff]  }
 0x8f6   :  { %v5496_v34 = vadd.f32 %v2659_v4, %v2658_v30  ;;  %v5543_v4 = vld [vmem:[#allocation12 + $0x60] ss:$16 sps:$4 sm:$0xff]   ;;  %v5550_v30 = vld [vmem:[#allocation12 + $0x84] ss:$16 sps:$4 sm:$0xff]  }
 0x8f7   :  { %6318 = vst [vmem:[#allocation46_spill] sm:$0xff] %v5550_v30 }
 0x8f8   :  { %3693 = vtanh.f32 %v5496_v34 }
 0x8f9   :  { %3695 = vpow2.f32 %v3325_v58  ;;  %v5559_v58 = vld [vmem:[#allocation12 + $0x88] ss:$16 sps:$4 sm:$0xff]  }
 0x8fa   :  { %3697 = vtanh.f32 %v5493_v6  ;;  %6321 = vst [vmem:[#allocation49_spill] sm:$0xff] %v5559_v58 }
 0x902   :  { %v3694_v29 = vpop.eup %3693 }
 0x903   :  { %v2662_v10 = vmul.f32 %v3694_v29, %v3692_v39  ;;  %v3696_v51 = vpop.eup %3695  ;;  %v5556_v39 = vld [vmem:[#allocation12 + $0x80] ss:$16 sps:$4 sm:$0xff]   ;;  %v5562_v29 = vld [vmem:[#allocation12 + $0xa4] ss:$16 sps:$4 sm:$0xff]  }
 0x904   :  { %v2539_v15 = vadd.f32 1.0, %v3696_v51  ;;  %6320 = vst [vmem:[#allocation48_spill] sm:$0xff] %v5556_v39  ;;  %6322 = vst [vmem:[#allocation50_spill] sm:$0xff] %v5562_v29  ;;  %v5568_v51 = vld [vmem:[#allocation12 + $0xa0] ss:$16 sps:$4 sm:$0xff]  }
 0x905   :  { %v5501_v11 = vpack.c.bf16 %v2662_v10, %v2662_v10  ;;  %v5565_v10 = vld [vmem:[#allocation12 + $0xac] ss:$16 sps:$4 sm:$0xff]   ;;  %6324 = vst [vmem:[#allocation52_spill] sm:$0xff] %v5568_v51 }
 0x906   :  { %3699 = vrcp.f32 %v2539_v15  ;;  %6323 = vst [vmem:[#allocation51_spill] sm:$0xff] %v5565_v10  ;;  %v5571_v15 = vld [vmem:[#allocation12 + $0xa8] ss:$16 sps:$4 sm:$0xff]  }
 0x907   :  { %2697 = vmatmul.mubr.bf16.vlgmr.msra.gmra.mrb[76].mxu0 %v5501_v11  ;;  %2738 = vmatmul.mubr.bf16.vlgmr.msra.gmra.mrb[76].mxu1 %v5501_v11  ;;  %6325 = vst [vmem:[#allocation53_spill] sm:$0xff] %v5571_v15 }
 0x908   :  { %2747 = vmatpush1.bf16.msra.mxu0 %v5505_v61  ;;  %2788 = vmatpush1.bf16.msra.mxu1 %v5508_v13 }
 0x909   :  { %2748 = vmatprep.subr.bf16.mxu0 %v5511_v43  ;;  %2789 = vmatprep.subr.bf16.mxu1 %v5514_v49 }
 0x90a   :  { %2778 = vmatprep.mubr.bf16.mxu0 %v6027_v52  ;;  %2819 = vmatprep.mubr.bf16.mxu1 %v6027_v52 }
 0x90c   :  { %2749 = vmatpush1.bf16.msra.mxu0 %v5519_v47  ;;  %2790 = vmatpush1.bf16.msra.mxu1 %v5522_v42 }
 0x90d   :  { %2750 = vmatprep.subr.bf16.mxu0 %v5525_v2  ;;  %2791 = vmatprep.subr.bf16.mxu1 %v5528_v28 }
 0x910   :  { %2751 = vmatpush1.bf16.msra.mxu0 %v5531_v9  ;;  %2792 = vmatpush1.bf16.msra.mxu1 %v5534_v0 }
 0x911   :  { %2752 = vmatprep.subr.bf16.mxu0 %v5537_v50  ;;  %2793 = vmatprep.subr.bf16.mxu1 %v5540_v3 }
 0x914   :  { %2753 = vmatpush1.bf16.msra.mxu0 %v5543_v4  ;;  %2794 = vmatpush1.bf16.msra.mxu1 %v5546_v1  ;;  %v5595_v1 = vld [vmem:[#allocation12 + $0xe8] ss:$16 sps:$4 sm:$0xff]  }
 0x915   :  { %2754 = vmatprep.subr.bf16.mxu0 %v5550_v30  ;;  %2795 = vmatprep.subr.bf16.mxu1 %v5553_v41  ;;  %v5580_v30 = vld [vmem:[#allocation12 + $0xc0] ss:$16 sps:$4 sm:$0xff]  }
 0x916   :  { %6328 = vst [vmem:[#allocation59_spill] sm:$0xff] %v5580_v30 }
 0x918   :  { %2755 = vmatpush1.bf16.msra.mxu0 %v5556_v39  ;;  %2796 = vmatpush1.bf16.msra.mxu1 %v5559_v58  ;;  %v5574_v39 = vld [vmem:[#allocation12 + $0xc4] ss:$16 sps:$4 sm:$0xff]   ;;  %v5577_v58 = vld [vmem:[#allocation12 + $0xcc] ss:$16 sps:$4 sm:$0xff]  }
 0x919   :  { %2756 = vmatprep.subr.bf16.mxu0 %v5562_v29  ;;  %2797 = vmatprep.subr.bf16.mxu1 %v5565_v10  ;;  %6326 = vst [vmem:[#allocation54_spill] sm:$0xff] %v5574_v39  ;;  %6327 = vst [vmem:[#allocation58_spill] sm:$0xff] %v5577_v58  ;;  %v3698_v29 = vpop.eup %3697  ;;  %v5583_v10 = vld [vmem:[#allocation12 + $0xc8] ss:$16 sps:$4 sm:$0xff]  }
 0x91a   :  { %v3700_v41 = vpop.eup %3699 }
 0x91c   :  { %2757 = vmatpush1.bf16.msra.mxu0 %v5568_v51  ;;  %2798 = vmatpush1.bf16.msra.mxu1 %v5571_v15  ;;  %v5586_v51 = vld [vmem:[#allocation12 + $0xe4] ss:$16 sps:$4 sm:$0xff]   ;;  %v5589_v15 = vld [vmem:[#allocation12 + $0xec] ss:$16 sps:$4 sm:$0xff]  }
 0x91d   :  { %2758 = vmatprep.subr.bf16.mxu0 %v5574_v39  ;;  %2799 = vmatprep.subr.bf16.mxu1 %v5577_v58  ;;  %v2546_v39 = vmul.f32 %v3700_v41, %v3698_v29  ;;  %v5592_v58 = vld [vmem:[#allocation12 + $0xe0] ss:$16 sps:$4 sm:$0xff]  }
 0x920   :  { %2759 = vmatpush1.bf16.msra.mxu0 %v5580_v30  ;;  %2800 = vmatpush1.bf16.msra.mxu1 %v5583_v10  ;;  %v2547_v30 = vpack.c.bf16 %v2546_v39, %v2546_v39 }
 0x921   :  { %2760 = vmatprep.subr.bf16.mxu0 %v5586_v51  ;;  %2801 = vmatprep.subr.bf16.mxu1 %v5589_v15 }
 0x924   :  { %2761 = vmatpush1.bf16.msra.mxu0 %v5592_v58  ;;  %2802 = vmatpush1.bf16.msra.mxu1 %v5595_v1 }
 0x925   :  { %2862 = vmatprep.subr.bf16.mxu0 %v5160_v8  ;;  %2903 = vmatprep.subr.bf16.mxu1 %v5163_v63  ;;  %v6329_v8 = vld [vmem:[#allocation60_spill] sm:$0xff]  ;;  %v6330_v63 = vld [vmem:[#allocation21_spill] sm:$0xff] }
 0x927   :  { %2779 = vmatmul.mubr.bf16.vlgmr.msra.gmra.mrb[80].mxu0 %v2547_v30  ;;  %2820 = vmatmul.mubr.bf16.vlgmr.msra.gmra.mrb[80].mxu1 %v2547_v30 }
 0x928   :  { %2863 = vmatpush1.bf16.msra.mxu0 %v5166_v7  ;;  %2904 = vmatpush1.bf16.msra.mxu1 %v5169_v17  ;;  %v6331_v7 = vld [vmem:[#allocation22_spill] sm:$0xff]  ;;  %v6332_v17 = vld [vmem:[#allocation23_spill] sm:$0xff] }
 0x929   :  { %2864 = vmatprep.subr.bf16.mxu0 %v6270_v31  ;;  %2905 = vmatprep.subr.bf16.mxu1 %v6271_v14  ;;  %v6336_v31 = vld [vmem:[#allocation27_spill] sm:$0xff]  ;;  %v6337_v14 = vld [vmem:[#allocation28_spill] sm:$0xff] }
 0x92a   :  { %2894 = vmatprep.mubr.bf16.mxu0 %v6027_v52  ;;  %2935 = vmatprep.mubr.bf16.mxu1 %v6027_v52 }
 0x92c   :  { %2865 = vmatpush1.bf16.msra.mxu0 %v6272_v32  ;;  %2906 = vmatpush1.bf16.msra.mxu1 %v6273_v37  ;;  %v6338_v32 = vld [vmem:[#allocation29_spill] sm:$0xff]  ;;  %v6339_v37 = vld [vmem:[#allocation30_spill] sm:$0xff] }
 0x92d   :  { %2866 = vmatprep.subr.bf16.mxu0 %v6274_v26  ;;  %2907 = vmatprep.subr.bf16.mxu1 %v6275_v19  ;;  %v6340_v26 = vld [vmem:[#allocation31_spill] sm:$0xff]  ;;  %v6341_v19 = vld [vmem:[#allocation32_spill] sm:$0xff] }
 0x930   :  { %2867 = vmatpush1.bf16.msra.mxu0 %v6276_v46  ;;  %2908 = vmatpush1.bf16.msra.mxu1 %v6277_v24  ;;  %v6342_v46 = vld [vmem:[#allocation33_spill] sm:$0xff]  ;;  %v6343_v24 = vld [vmem:[#allocation34_spill] sm:$0xff] }
 0x931   :  { %2868 = vmatprep.subr.bf16.mxu0 %v6278_v23  ;;  %2909 = vmatprep.subr.bf16.mxu1 %v6279_v57  ;;  %v6344_v23 = vld [vmem:[#allocation35_spill] sm:$0xff]  ;;  %v6345_v57 = vld [vmem:[#allocation36_spill] sm:$0xff] }
 0x934   :  { %2869 = vmatpush1.bf16.msra.mxu0 %v5204_v18  ;;  %2910 = vmatpush1.bf16.msra.mxu1 %v6280_v36  ;;  %v6335_v18 = vld [vmem:[#allocation26_spill] sm:$0xff]  ;;  %v6346_v36 = vld [vmem:[#allocation37_spill] sm:$0xff] }
 0x935   :  { %2870 = vmatprep.subr.bf16.mxu0 %v6281_v25  ;;  %2911 = vmatprep.subr.bf16.mxu1 %v5213_v40  ;;  %v6333_v40 = vld [vmem:[#allocation24_spill] sm:$0xff]  ;;  %v6347_v25 = vld [vmem:[#allocation38_spill] sm:$0xff] }
 0x938   :  { %2871 = vmatpush1.bf16.msra.mxu0 %v5216_v62  ;;  %2912 = vmatpush1.bf16.msra.mxu1 %v5348_v27  ;;  %v6334_v62 = vld [vmem:[#allocation25_spill] sm:$0xff]  ;;  %v6348_v27 = vld [vmem:[#allocation39_spill] sm:$0xff] }
 0x939   :  { %2872 = vmatprep.subr.bf16.mxu0 %v6282_v55  ;;  %2913 = vmatprep.subr.bf16.mxu1 %v5352_v60  ;;  %v6349_v55 = vld [vmem:[#allocation40_spill] sm:$0xff]  ;;  %v6350_v60 = vld [vmem:[#allocation41_spill] sm:$0xff] }
 0x93c   :  { %2873 = vmatpush1.bf16.msra.mxu0 %v6283_v33  ;;  %2914 = vmatpush1.bf16.msra.mxu1 %v5356_v38  ;;  %v6351_v33 = vld [vmem:[#allocation42_spill] sm:$0xff]  ;;  %v6352_v38 = vld [vmem:[#allocation43_spill] sm:$0xff] }
 0x93d   :  { %2874 = vmatprep.subr.bf16.mxu0 %v6284_v12  ;;  %2915 = vmatprep.subr.bf16.mxu1 %v5360_v53  ;;  %v6353_v12 = vld [vmem:[#allocation44_spill] sm:$0xff]  ;;  %v6354_v53 = vld [vmem:[#allocation45_spill] sm:$0xff] }
 0x940   :  { %2875 = vmatpush1.bf16.msra.mxu0 %v5363_v54  ;;  %2916 = vmatpush1.bf16.msra.mxu1 %v5366_v21  ;;  %v6355_v54 = vld [vmem:[#allocation17_spill] sm:$0xff]  ;;  %v6356_v21 = vld [vmem:[#allocation18_spill] sm:$0xff] }
 0x941   :  { %2876 = vmatprep.subr.bf16.mxu0 %v5369_v48  ;;  %2917 = vmatprep.subr.bf16.mxu1 %v5372_v59  ;;  %v6357_v48 = vld [vmem:[#allocation19_spill] sm:$0xff] }
 0x944   :  { %2877 = vmatpush1.bf16.msra.mxu0 %v5375_v35  ;;  %2918 = vmatpush1.bf16.msra.mxu1 %v5378_v56 }
 0x945   :  { %2973 = vmatprep.subr.bf16.mxu0 %v5381_v20  ;;  %3014 = vmatprep.subr.bf16.mxu1 %v5384_v16 }
 0x947   :  { %2895 = vmatmul.mubr.bf16.vlgmr.msra.gmra.mrb[84].mxu0 %v5501_v11  ;;  %2936 = vmatmul.mubr.bf16.vlgmr.msra.gmra.mrb[84].mxu1 %v5501_v11 }
 0x948   :  { %2974 = vmatpush1.bf16.msra.mxu0 %v5389_v22  ;;  %3015 = vmatpush1.bf16.msra.mxu1 %v5392_v5 }
 0x949   :  { %2975 = vmatprep.subr.bf16.mxu0 %v5395_v45  ;;  %3016 = vmatprep.subr.bf16.mxu1 %v6329_v8 }
 0x94a   :  { %3005 = vmatprep.mubr.bf16.mxu0 %v6027_v52  ;;  %3046 = vmatprep.mubr.bf16.mxu1 %v6027_v52 }
 0x94c   :  { %2976 = vmatpush1.bf16.msra.mxu0 %v6330_v63  ;;  %3017 = vmatpush1.bf16.msra.mxu1 %v6331_v7 }
 0x94d   :  { %2977 = vmatprep.subr.bf16.mxu0 %v6332_v17  ;;  %3018 = vmatprep.subr.bf16.mxu1 %v6333_v40 }
 0x950   :  { %2978 = vmatpush1.bf16.msra.mxu0 %v6334_v62  ;;  %3019 = vmatpush1.bf16.msra.mxu1 %v6335_v18  ;;  %v6358_v62 = vld [vmem:[#allocation55_spill] sm:$0xff] }
 0x951   :  { %2979 = vmatprep.subr.bf16.mxu0 %v6336_v31  ;;  %3020 = vmatprep.subr.bf16.mxu1 %v6337_v14 }
 0x954   :  { %2980 = vmatpush1.bf16.msra.mxu0 %v6338_v32  ;;  %3021 = vmatpush1.bf16.msra.mxu1 %v6339_v37  ;;  %v6359_v32 = vld [vmem:[#allocation56_spill] sm:$0xff] }
 0x955   :  { %2981 = vmatprep.subr.bf16.mxu0 %v6340_v26  ;;  %3022 = vmatprep.subr.bf16.mxu1 %v6341_v19 }
 0x958   :  { %2982 = vmatpush1.bf16.msra.mxu0 %v6342_v46  ;;  %3023 = vmatpush1.bf16.msra.mxu1 %v6343_v24  ;;  %v6360_v46 = vld [vmem:[#allocation57_spill] sm:$0xff] }
 0x959   :  { %2983 = vmatprep.subr.bf16.mxu0 %v6344_v23  ;;  %3024 = vmatprep.subr.bf16.mxu1 %v6345_v57 }
 0x95c   :  { %2984 = vmatpush1.bf16.msra.mxu0 %v6346_v36  ;;  %3025 = vmatpush1.bf16.msra.mxu1 %v6347_v25 }
 0x95d   :  { %2985 = vmatprep.subr.bf16.mxu0 %v6348_v27  ;;  %3026 = vmatprep.subr.bf16.mxu1 %v6349_v55 }
 0x960   :  { %2986 = vmatpush1.bf16.msra.mxu0 %v6350_v60  ;;  %3027 = vmatpush1.bf16.msra.mxu1 %v6351_v33  ;;  %v2858_v60 = vld [vmem:[#allocation7 + $0xe0] sm:$0xff] }
 0x961   :  { %2987 = vmatprep.subr.bf16.mxu0 %v6352_v38  ;;  %3028 = vmatprep.subr.bf16.mxu1 %v6353_v12  ;;  %v2859_v12 = vld [vmem:[#allocation7 + $0xe8] sm:$0xff] }
 0x964   :  { %2988 = vmatpush1.bf16.msra.mxu0 %v6354_v53  ;;  %3029 = vmatpush1.bf16.msra.mxu1 %v6355_v54 }
 0x965   :  { %3055 = vmatprep.subr.bf16.mxu0 %v6356_v21  ;;  %3096 = vmatprep.subr.bf16.mxu1 %v6357_v48 }
 0x9da   :  { %v2698_v59 = vpop.f32.mrb[76].mxu0  ;;  %v2739_v35 = vpop.f32.mrb[76].mxu1 }
 0x9db   :  { %v2700_v56 = vpop.f32.mrb[77].mxu0  ;;  %v2741_v20 = vpop.f32.mrb[77].mxu1 }
 0x9dc   :  { %v2702_v16 = vpop.f32.mrb[78].mxu0  ;;  %v2743_v22 = vpop.f32.mrb[78].mxu1 }
 0x9dd   :  { %v2703_v5 = vpop.f32.mrb[79].mxu0  ;;  %v2744_v45 = vpop.f32.mrb[79].mxu1 }
 0x9fa   :  { %v2780_v11 = vpop.f32.mrb[80].mxu0  ;;  %v2821_v30 = vpop.f32.mrb[80].mxu1 }
 0x9fb   :  { %v2781_v41 = vadd.f32 %v2780_v11, %v2698_v59  ;;  %v2822_v39 = vadd.f32 %v2821_v30, %v2739_v35  ;;  %v2782_v29 = vpop.f32.mrb[81].mxu0  ;;  %v2823_v8 = vpop.f32.mrb[81].mxu1 }
 0x9fc   :  { %v2783_v63 = vadd.f32 %v2782_v29, %v2700_v56  ;;  %v5670_v7 = vadd.f32 %v2823_v8, %v2741_v20  ;;  %v2784_v17 = vpop.f32.mrb[82].mxu0  ;;  %v2825_v40 = vpop.f32.mrb[82].mxu1  ;;  %v2860_v29 = vld [vmem:[#allocation7 + $0xf0] sm:$0xff] }
 0x9fd   :  { %v2828_v18 = vadd.f32 %v2781_v41, %v6358_v62  ;;  %v2785_v31 = vpop.f32.mrb[83].mxu0  ;;  %v2826_v14 = vpop.f32.mrb[83].mxu1  ;;  %v2830_v24 = vadd.f32 %v2822_v39, %v6360_v46  ;;  %v2861_v41 = vld [vmem:[#allocation7 + $0xf8] sm:$0xff] }
 0x9fe   :  { %v2829_v37 = vadd.f32 %v2783_v63, %v6359_v32 }
 0x9ff   :  { %v3329_v26 = vmul.f32 -1.442695, %v2828_v18 }
 0xa00   :  { %v3330_v19 = vmul.f32 -1.442695, %v2829_v37 }
 0xa01   :  { %3701 = vpow2.f32 %v3329_v26 }
 0xa02   :  { %3703 = vpow2.f32 %v3330_v19 }
 0xa03   :  { %3705 = vtanh.f32 %v2830_v24 }
 0xa0b   :  { %v3702_v23 = vpop.eup %3701 }
 0xa0c   :  { %v3704_v57 = vpop.eup %3703  ;;  %v2835_v36 = vadd.f32 1.0, %v3702_v23 }
 0xa0d   :  { %v2841_v25 = vadd.f32 1.0, %v3704_v57  ;;  %v3706_v27 = vpop.eup %3705 }
 0xa0e   :  { %3707 = vrcp.f32 %v2835_v36  ;;  %v2831_v36 = vadd.f32 %v5670_v7, %v4558_v44  ;;  %v6372_v7 = vld [vmem:[#allocation59_spill] sm:$0xff] }
 0xa0f   :  { %3709 = vrcp.f32 %v2841_v25 }
 0xa18   :  { %v3708_v55 = vpop.eup %3707 }
 0xa19   :  { %v3710_v33 = vpop.eup %3709  ;;  %v2852_v38 = vmul.f32 %v3708_v55, %v3706_v27  ;;  %v3331_v27 = vmul.f32 -1.442695, %v2831_v36 }
 0xa1a   :  { %v2851_v53 = vmul.f32 %v3710_v33, %v5493_v6  ;;  %v2896_v54 = vpop.f32.mrb[84].mxu0  ;;  %v2937_v21 = vpop.f32.mrb[84].mxu1 }
 0xa1b   :  { %v2944_v48 = vadd.f32 %v2896_v54, %v2858_v60  ;;  %v2898_v59 = vpop.f32.mrb[85].mxu0  ;;  %v2939_v35 = vpop.f32.mrb[85].mxu1  ;;  %v2946_v8 = vadd.f32 %v2937_v21, %v2860_v29 }
 0xa1c   :  { %v5676_v56 = vadd.f32 %v2852_v38, %v2851_v53  ;;  %v2945_v20 = vadd.f32 %v2898_v59, %v2859_v12  ;;  %v2900_v16 = vpop.f32.mrb[86].mxu0  ;;  %v2941_v22 = vpop.f32.mrb[86].mxu1  ;;  %v2947_v39 = vadd.f32 %v2939_v35, %v2861_v41 }
 0xa1d   :  { %v3332_v5 = vmul.f32 -1.442695, %v2944_v48  ;;  %v2901_v45 = vpop.f32.mrb[87].mxu0  ;;  %v2942_v11 = vpop.f32.mrb[87].mxu1 }
 0xa1e   :  { %v3333_v30 = vmul.f32 -1.442695, %v2945_v20  ;;  %v3334_v6 = vmul.f32 -1.442695, %v2947_v39 }
 0xa1f   :  { %3711 = vpow2.f32 %v3332_v5 }
 0xa20   :  { %3713 = vpow2.f32 %v3333_v30 }
 0xa21   :  { %3715 = vpow2.f32 %v3334_v6 }
 0xa22   :  { %3717 = vtanh.f32 %v2946_v8 }
 0xa29   :  { %v3712_v63 = vpop.eup %3711 }
 0xa2a   :  { %v3714_v17 = vpop.eup %3713  ;;  %v2951_v40 = vadd.f32 1.0, %v3712_v63 }
 0xa2b   :  { %v2957_v18 = vadd.f32 1.0, %v3714_v17  ;;  %v3716_v31 = vpop.eup %3715 }
 0xa2c   :  { %3719 = vrcp.f32 %v2951_v40  ;;  %v3718_v14 = vpop.eup %3717  ;;  %v2964_v24 = vadd.f32 1.0, %v3716_v31 }
 0xa2d   :  { %3721 = vrcp.f32 %v2957_v18 }
 0xa2e   :  { %3723 = vrcp.f32 %v2964_v24 }
 0xa36   :  { %v3720_v37 = vpop.eup %3719 }
 0xa37   :  { %v3722_v26 = vpop.eup %3721  ;;  %v2968_v19 = vmul.f32 %v3720_v37, %v3718_v14 }
 0xa38   :  { %v2967_v23 = vmul.f32 %v3722_v26, %v5496_v34  ;;  %v3724_v25 = vpop.eup %3723 }
 0xa3a   :  { %v2969_v57 = vadd.f32 %v2968_v19, %v2967_v23 }
 0xa3c   :  { %3725 = vtanh.f32 %v2969_v57 }
 0xa3d   :  { %3727 = vpow2.f32 %v3331_v27  ;;  %v3338_v27 = vld [vmem:[%s5733_s5] ss:$0 sm:$0xff] }
 0xa3e   :  { %3729 = vtanh.f32 %v5676_v56 }
 0xa46   :  { %v3726_v55 = vpop.eup %3725 }
 0xa47   :  { %v2971_v60 = vmul.f32 %v3726_v55, %v3724_v25  ;;  %v3728_v34 = vpop.eup %3727 }
 0xa49   :  { %v2972_v33 = vpack.c.bf16 %v2971_v60, %v2971_v60 }
 0xa4b   :  { %3006 = vmatmul.mubr.bf16.vlgmr.msra.gmra.mrb[88].mxu0 %v2972_v33  ;;  %3047 = vmatmul.mubr.bf16.vlgmr.msra.gmra.mrb[88].mxu1 %v2972_v33  ;;  %v3183_v33 = vstv %s5734_s6 }
 0xa4c   :  { %3056 = vmatpush1.bf16.msra.mxu0 %v5505_v61  ;;  %3097 = vmatpush1.bf16.msra.mxu1 %v5508_v13  ;;  %v2848_v61 = vadd.f32 1.0, %v3728_v34  ;;  %v6362_v13 = vld [vmem:[#allocation46_spill] sm:$0xff] }
 0xa4d   :  { %3057 = vmatprep.subr.bf16.mxu0 %v5511_v43  ;;  %3098 = vmatprep.subr.bf16.mxu1 %v5514_v49  ;;  %v6363_v43 = vld [vmem:[#allocation47_spill] sm:$0xff]  ;;  %v6364_v49 = vld [vmem:[#allocation48_spill] sm:$0xff] }
 0xa4e   :  { %3087 = vmatprep.mubr.bf16.mxu0 %v6027_v52  ;;  %3128 = vmatprep.mubr.bf16.mxu1 %v6027_v52  ;;  %v6361_v52 = vld [vmem:[#allocation20_spill] sm:$0xff]  ;;  %3731 = vrcp.f32 %v2848_v61 }
 0xa50   :  { %3058 = vmatpush1.bf16.msra.mxu0 %v5519_v47  ;;  %3099 = vmatpush1.bf16.msra.mxu1 %v5522_v42  ;;  %v6365_v47 = vld [vmem:[#allocation49_spill] sm:$0xff]  ;;  %v6366_v42 = vld [vmem:[#allocation50_spill] sm:$0xff] }
 0xa51   :  { %3059 = vmatprep.subr.bf16.mxu0 %v5525_v2  ;;  %3100 = vmatprep.subr.bf16.mxu1 %v5528_v28  ;;  %v6367_v2 = vld [vmem:[#allocation51_spill] sm:$0xff]  ;;  %v6368_v28 = vld [vmem:[#allocation52_spill] sm:$0xff] }
 0xa54   :  { %3060 = vmatpush1.bf16.msra.mxu0 %v5531_v9  ;;  %3101 = vmatpush1.bf16.msra.mxu1 %v5534_v0  ;;  %v6369_v9 = vld [vmem:[#allocation53_spill] sm:$0xff]  ;;  %v6370_v0 = vld [vmem:[#allocation54_spill] sm:$0xff] }
 0xa55   :  { %3061 = vmatprep.subr.bf16.mxu0 %v5537_v50  ;;  %3102 = vmatprep.subr.bf16.mxu1 %v5540_v3  ;;  %v6371_v50 = vld [vmem:[#allocation58_spill] sm:$0xff]  ;;  %v3730_v3 = vpop.eup %3729 }
 0xa58   :  { %3062 = vmatpush1.bf16.msra.mxu0 %v5543_v4  ;;  %3103 = vmatpush1.bf16.msra.mxu1 %v6361_v52  ;;  %v3732_v4 = vpop.eup %3731 }
 0xa59   :  { %3063 = vmatprep.subr.bf16.mxu0 %v6362_v13  ;;  %3104 = vmatprep.subr.bf16.mxu1 %v6363_v43  ;;  %v2855_v38 = vmul.f32 %v3732_v4, %v3730_v3 }
 0xa5b   :  { %v2856_v12 = vpack.c.bf16 %v2855_v38, %v2855_v38 }
 0xa5c   :  { %3064 = vmatpush1.bf16.msra.mxu0 %v6364_v49  ;;  %3105 = vmatpush1.bf16.msra.mxu1 %v6365_v47 }
 0xa5d   :  { %3065 = vmatprep.subr.bf16.mxu0 %v6366_v42  ;;  %3106 = vmatprep.subr.bf16.mxu1 %v6367_v2 }
 0xa60   :  { %3066 = vmatpush1.bf16.msra.mxu0 %v6368_v28  ;;  %3107 = vmatpush1.bf16.msra.mxu1 %v6369_v9 }
 0xa61   :  { %3067 = vmatprep.subr.bf16.mxu0 %v6370_v0  ;;  %3108 = vmatprep.subr.bf16.mxu1 %v6371_v50 }
 0xa64   :  { %3068 = vmatpush1.bf16.msra.mxu0 %v6372_v7  ;;  %3109 = vmatpush1.bf16.msra.mxu1 %v5583_v10 }
 0xa65   :  { %3069 = vmatprep.subr.bf16.mxu0 %v5586_v51  ;;  %3110 = vmatprep.subr.bf16.mxu1 %v5589_v15 }
 0xa68   :  { %3070 = vmatpush1.bf16.msra.mxu0 %v5592_v58  ;;  %3111 = vmatpush1.bf16.msra.mxu1 %v5595_v1 }
 0xa6b   :  { %3088 = vmatmul.mubr.bf16.vlgmr.msra.gmra.mrb[92].mxu0 %v2856_v12  ;;  %3129 = vmatmul.mubr.bf16.vlgmr.msra.gmra.mrb[92].mxu1 %v2856_v12 }
 0xb1e   :  { %v3007_v53 = vpop.f32.mrb[88].mxu0  ;;  %v3048_v54 = vpop.f32.mrb[88].mxu1 }
 0xb1f   :  { %v3009_v21 = vpop.f32.mrb[89].mxu0  ;;  %v3050_v48 = vpop.f32.mrb[89].mxu1 }
 0xb20   :  { %v3011_v59 = vpop.f32.mrb[90].mxu0  ;;  %v3052_v35 = vpop.f32.mrb[90].mxu1 }
 0xb21   :  { %v3012_v20 = vpop.f32.mrb[91].mxu0  ;;  %v3053_v10 = vpop.f32.mrb[91].mxu1 }
 0xb3e   :  { %v3089_v16 = vpop.f32.mrb[92].mxu0  ;;  %v3130_v51 = vpop.f32.mrb[92].mxu1 }
 0xb3f   :  { %v3090_v22 = vadd.f32 %v3089_v16, %v3007_v53  ;;  %v3131_v15 = vadd.f32 %v3130_v51, %v3048_v54  ;;  %v3091_v5 = vpop.f32.mrb[93].mxu0  ;;  %v3132_v45 = vpop.f32.mrb[93].mxu1 }
 0xb40   :  { %v3092_v58 = vadd.f32 %v3091_v5, %v3009_v21  ;;  %v3133_v11 = vadd.f32 %v3132_v45, %v3050_v48  ;;  %v3093_v1 = vpop.f32.mrb[94].mxu0  ;;  %v3134_v30 = vpop.f32.mrb[94].mxu1 }
 0xb41   :  { %v3137_v41 = vadd.f32 %v3090_v22, %v6358_v62  ;;  %v3094_v39 = vpop.f32.mrb[95].mxu0  ;;  %v3135_v29 = vpop.f32.mrb[95].mxu1  ;;  %v3139_v18 = vadd.f32 %v3131_v15, %v6360_v46 }
 0xb42   :  { %v3138_v6 = vadd.f32 %v3092_v58, %v6359_v32  ;;  %v3140_v17 = vadd.f32 %v3133_v11, %v4558_v44 }
 0xb43   :  { %v3335_v8 = vmul.f32 -1.442695, %v3137_v41 }
 0xb44   :  { %v3336_v63 = vmul.f32 -1.442695, %v3138_v6  ;;  %v3337_v40 = vmul.f32 -1.442695, %v3140_v17 }
 0xb45   :  { %3733 = vpow2.f32 %v3335_v8 }
 0xb46   :  { %3735 = vpow2.f32 %v3336_v63 }
 0xb47   :  { %3737 = vpow2.f32 %v3337_v40 }
 0xb48   :  { %3739 = vtanh.f32 %v3139_v18 }
 0xb4f   :  { %v3734_v31 = vpop.eup %3733 }
 0xb50   :  { %v3736_v14 = vpop.eup %3735  ;;  %v3144_v37 = vadd.f32 1.0, %v3734_v31 }
 0xb51   :  { %v3150_v26 = vadd.f32 1.0, %v3736_v14  ;;  %v3738_v62 = vpop.eup %3737 }
 0xb52   :  { %3741 = vrcp.f32 %v3144_v37  ;;  %v3740_v19 = vpop.eup %3739  ;;  %v3157_v57 = vadd.f32 1.0, %v3738_v62 }
 0xb53   :  { %3743 = vrcp.f32 %v3150_v26 }
 0xb54   :  { %3745 = vrcp.f32 %v3157_v57 }
 0xb5c   :  { %v3742_v32 = vpop.eup %3741 }
 0xb5d   :  { %v3744_v24 = vpop.eup %3743  ;;  %v3161_v23 = vmul.f32 %v3742_v32, %v3740_v19 }
 0xb5e   :  { %v3160_v36 = vmul.f32 %v3744_v24, %v5676_v56  ;;  %v3746_v46 = vpop.eup %3745 }
 0xb60   :  { %v3162_v44 = vadd.f32 %v3161_v23, %v3160_v36 }
 0xb62   :  { %3747 = vtanh.f32 %v3162_v44 }
 0xb6c   :  { %v3748_v25 = vpop.eup %3747 }
 0xb6d   :  { %v3164_v55 = vmul.f32 %v3748_v25, %v3746_v46 }
 0xb6f   :  { %v3179_v60 = vmul.f32 %v3338_v27, %v3164_v55 }
 0xb71   :  { %3180 = vadd.xlane.f32.xlu0 %v3179_v60 }
 0xbfe   :  { %v3181_v34 = vpop.xlane.xlu0 %3180 }
 0xbff   :  { %v3184_v61 = vadd.f32 %v3183_v33, %v3181_v34 }
 0xc01   :  { %3186 = vst.msk [vmem:[%s5735_s7] sm:$0xff] %vm3185_vm0, %v3184_v61 }
 0xc02   :  { %3191 = vsyncpa [#allocation8], 1 }
 0xc03   :  { %3192 = vsyncpa [#allocation10], 1 }
 0xc04   :  { %3193 = vsyncpa [#allocation13], 1 }

</bundles_post_ra>
